<compile_context>
chip_gen: v7x
topology: tpu7x:2x2x1
jax: 0.10.0
libtpu: 0.0.40
codegen_flags: <defaults>
</compile_context>

<pallas_src>
import jax
import jax.numpy as jnp
import numpy as np
from jax.experimental import pallas as pl
from jax.experimental.pallas import tpu as pltpu

LANES = 128  # TPU lane width; all channel dims are zero-padded to this.


# ------------------------------- small helpers -------------------------------

def _pad8(n):
    return ((n + 7) // 8) * 8


def _pad_lanes(n):
    return max(LANES, ((n + LANES - 1) // LANES) * LANES)


def _pick_bt(b, max_bt=8):
    """Largest divisor of b that is <= max_bt (items per grid step)."""
    bt = 1
    for d in range(1, min(b, max_bt) + 1):
        if b % d == 0:
            bt = d
    return bt


def _im2col_3x3(img, w_out_pad, k_pad):
    """img: (B, H, W, Cin) -> (B, H-2, w_out_pad, k_pad) valid-3x3 patches.

    Tap order (dy, dx, ci) matches an HWIO weight flattened with
    .reshape(9*Cin, Cout).  Output columns >= W-2 and K lanes >= 9*Cin are
    zero padding (so they contribute nothing to the conv matmul).
    """
    _, H, W, Cin = img.shape
    Ho, Wo = H - 2, W - 2
    taps = [img[:, dy:dy + Ho, dx:dx + Wo, :] for dy in range(3) for dx in range(3)]
    p = jnp.concatenate(taps, axis=-1)                       # (B, Ho, Wo, 9*Cin)
    return jnp.pad(p, ((0, 0), (0, 0), (0, w_out_pad - Wo), (0, k_pad - 9 * Cin)))


# ------------------------------ pallas wrapper --------------------------------

def depth_corr_pallas(z_nhwc, x_nhwc, p, out_channels, max_bt=8):
    B, Hz, Wz, Cin = z_nhwc.shape
    _, Hx, Wx, _ = x_nhwc.shape
    Hk, Wk = Hz - 2, Wz - 2                  # template feature size
    Hs, Ws = Hx - 2, Wx - 2                  # search feature size
    Ho, Wo = Hs - Hk + 1, Ws - Wk + 1        # correlation output size
    Wop = _pad8(Wo)                          # padded output width (sublane mult.)
    Wsp = _pad8(Wop + Wk - 1)                # search width incl. q-shift margin
    Mz = _pad8(Hk * Wk)                      # template rows (indexed by p*Wk+q)
    HWs = Hs * Wsp
    Kp = _pad_lanes(9 * Cin)                 # im2col K, padded to 128 lanes
    Bt = _pick_bt(B, max_bt)

    # im2col in the wrapper: lane-dense, K-padded bf16 patch slabs (MXU lhs).
    zp = _im2col_3x3(z_nhwc, Wk, Kp).reshape(B, Hk * Wk, Kp)
    zp = jnp.pad(zp, ((0, 0), (0, Mz - Hk * Wk), (0, 0))).astype(jnp.bfloat16)
    xp = _im2col_3x3(x_nhwc, Wsp, Kp).reshape(B, HWs, Kp).astype(jnp.bfloat16)

    def kernel(zp_ref, xp_ref, wk_ref, sk_ref, bk_ref, ws_ref, ss_ref, bs_ref,
               w1_ref, s1_ref, b1_ref, w2_ref, b2_ref, o_ref, kf_scr, sf_scr):
        # conv_kernel (3x3 + BN + ReLU), batched over the Bt items of this step:
        # one MXU matmul with M = Bt*Mz.  Result parked in VMEM scratch so the
        # per-(p,q) broadcasts below are cheap loads, not live-value extracts.
        lhs_z = zp_ref[...].reshape(Bt * Mz, Kp)
        kf = jnp.dot(lhs_z, wk_ref[...], preferred_element_type=jnp.float32)
        kf = jnp.maximum(kf * sk_ref[0] + bk_ref[0], 0.0)
        kf_scr[...] = kf.reshape(Bt, Mz, LANES)

        @pl.loop(0, Bt)  # sequential over items; bounds vregs & code size
        def _(b):
            # conv_search (3x3 + BN + ReLU) for item b -> VMEM scratch.
            # Padded columns (>= Ws) come from zero patches -> ReLU(bias): finite,
            # and they only reach output columns >= Wo, which are dropped.
            sfv = jnp.dot(xp_ref[b], ws_ref[...], preferred_element_type=jnp.float32)
            sfv = jnp.maximum(sfv * ss_ref[0] + bs_ref[0], 0.0)
            sf_scr[...] = sfv.reshape(Hs, Wsp, LANES)

            # Depthwise cross-correlation (conv2d_dw_group), f32 on the VPU.
            # q-shift  : sublane-offset window LOAD from scratch (no value roll)
            # p-shift  : free leading-dim slice of the loaded window
            # kf[p,q]  : single-row load from scratch, broadcast over the window
            kfb = kf_scr.at[b]
            acc = None
            for q in range(Wk):
                win = sf_scr[:, q:q + Wop, :]            # (Hs, Wop, LANES)
                for r in range(Hk):
                    prod = win[r:r + Ho] * kfb[r * Wk + q]
                    acc = prod if acc is None else acc + prod

            # Head: 1x1 conv (no bias) + BN + ReLU, then 1x1 conv + bias, as two
            # lane-dense matmuls over M = Ho*Wop rows for this item.
            feat = acc.reshape(Ho * Wop, LANES).astype(jnp.bfloat16)
            h = jnp.dot(feat, w1_ref[...], preferred_element_type=jnp.float32)
            h = jnp.maximum(h * s1_ref[0] + b1_ref[0], 0.0).astype(jnp.bfloat16)
            y = jnp.dot(h, w2_ref[...], preferred_element_type=jnp.float32) + b2_ref[0]
            o_ref[b] = y.reshape(Ho, Wop, LANES)

    out = pl.pallas_call(
        kernel,
        out_shape=jax.ShapeDtypeStruct((B, Ho, Wop, LANES), jnp.float32),
        grid=(B // Bt,),
        in_specs=[
            pl.BlockSpec((Bt, Mz, Kp), lambda g: (g, 0, 0)),     # z patches
            pl.BlockSpec((Bt, HWs, Kp), lambda g: (g, 0, 0)),    # x patches
            pl.BlockSpec((Kp, LANES), lambda g: (0, 0)),         # wk
            pl.BlockSpec((1, LANES), lambda g: (0, 0)),          # sk
            pl.BlockSpec((1, LANES), lambda g: (0, 0)),          # bk
            pl.BlockSpec((Kp, LANES), lambda g: (0, 0)),         # ws
            pl.BlockSpec((1, LANES), lambda g: (0, 0)),          # ss
            pl.BlockSpec((1, LANES), lambda g: (0, 0)),          # bs
            pl.BlockSpec((LANES, LANES), lambda g: (0, 0)),      # w1
            pl.BlockSpec((1, LANES), lambda g: (0, 0)),          # s1
            pl.BlockSpec((1, LANES), lambda g: (0, 0)),          # b1
            pl.BlockSpec((LANES, LANES), lambda g: (0, 0)),      # w2
            pl.BlockSpec((1, LANES), lambda g: (0, 0)),          # b2
        ],
        out_specs=pl.BlockSpec((Bt, Ho, Wop, LANES), lambda g: (g, 0, 0, 0)),
        scratch_shapes=[
            pltpu.VMEM((Bt, Mz, LANES), jnp.float32),    # kf: all Bt template feats
            pltpu.VMEM((Hs, Wsp, LANES), jnp.float32),   # sf: one item, reused
        ],
        compiler_params=pltpu.CompilerParams(dimension_semantics=("parallel",)),
    )(zp, xp,
      p["wk"], p["sk"], p["bk"],
      p["ws"], p["ss"], p["bs"],
      p["w1"], p["s1"], p["b1"],
      p["w2"], p["b2"])

    # Drop spatial (garbage) and channel (zero) padding in the wrapper.
    return out[:, :, :Wo, :out_channels]


def depth_corr_forward(prepared, kernel_nchw, search_nchw, out_channels):
    z = jnp.transpose(kernel_nchw, (0, 2, 3, 1))   # NCHW -> NHWC
    x = jnp.transpose(search_nchw, (0, 2, 3, 1))
    out = depth_corr_pallas(z, x, prepared, out_channels)
    # NOTE: callers that can consume NHWC should skip this final transpose.
    return jnp.transpose(out, (0, 3, 1, 2))        # NHWC -> NCHW (match PyTorch)


# ------------------------------ parameters ------------------------------------

def fold_bn(gamma, beta, mean, var, eps=1e-5):
    scale = gamma / jnp.sqrt(var + eps)
    bias = beta - mean * scale
    return scale[None, :].astype(jnp.float32), bias[None, :].astype(jnp.float32)


def init_params(key, in_channels, hidden, out_channels, ksize=3):
    ks = jax.random.split(key, 17)

    def wn(k, shape, s=0.1):
        return (s * jax.random.normal(k, shape)).astype(jnp.float32)

    def bn(k1, k2, k3, k4, c):
        gamma = 1.0 + 0.1 * jax.random.normal(k1, (c,))
        beta = 0.1 * jax.random.normal(k2, (c,))
        mean = 0.1 * jax.random.normal(k3, (c,))
        var = 0.5 + jnp.abs(jax.random.normal(k4, (c,)))
        return fold_bn(gamma, beta, mean, var)

    return {
        "wk": wn(ks[0], (ksize, ksize, in_channels, hidden)),   # conv_kernel (HWIO)
        "bnk": bn(ks[1], ks[2], ks[3], ks[4], hidden),
        "ws": wn(ks[5], (ksize, ksize, in_channels, hidden)),   # conv_search (HWIO)
        "bns": bn(ks[6], ks[7], ks[8], ks[9], hidden),
        "w1": wn(ks[10], (hidden, hidden)),                     # head 1x1, no bias
        "bnh": bn(ks[11], ks[12], ks[13], ks[14], hidden),
        "w2": wn(ks[15], (hidden, out_channels)),               # head 1x1, with bias
        "b2": wn(ks[16], (1, out_channels)),
    }


def _pad_to(a, shape):
    return jnp.pad(a, [(0, t - s) for s, t in zip(a.shape, shape)])


def prepare_params(params):
    """Flatten conv weights to (Kp, Cout_pad), zero-pad channel dims to 128 lanes
    and cast matmul weights to bf16 (done once, outside the forward pass)."""
    ksz, _, cin, hidden = params["wk"].shape
    kp = _pad_lanes(ksz * ksz * cin)
    sk, bk = params["bnk"]
    ss, bs = params["bns"]
    s1, b1 = params["bnh"]
    wk = params["wk"].reshape(-1, hidden)
    ws = params["ws"].reshape(-1, hidden)
    return {
        "wk": _pad_to(wk, (kp, LANES)).astype(jnp.bfloat16),
        "sk": _pad_to(sk, (1, LANES)),
        "bk": _pad_to(bk, (1, LANES)),
        "ws": _pad_to(ws, (kp, LANES)).astype(jnp.bfloat16),
        "ss": _pad_to(ss, (1, LANES)),
        "bs": _pad_to(bs, (1, LANES)),
        "w1": _pad_to(params["w1"], (LANES, LANES)).astype(jnp.bfloat16),
        "s1": _pad_to(s1, (1, LANES)),
        "b1": _pad_to(b1, (1, LANES)),
        "w2": _pad_to(params["w2"], (LANES, LANES)).astype(jnp.bfloat16),
        "b2": _pad_to(params["b2"], (1, LANES)),
    }


# ------------------------------ plain-JAX reference ---------------------------

def reference_forward(params, kernel_nchw, search_nchw):
    z = jnp.transpose(kernel_nchw, (0, 2, 3, 1))
    x = jnp.transpose(search_nchw, (0, 2, 3, 1))

    def conv_bn_relu(inp, w, scale, bias):
        y = jax.lax.conv_general_dilated(
            inp, w, (1, 1), "VALID",
            dimension_numbers=("NHWC", "HWIO", "NHWC"))
        return jnp.maximum(y * scale[0] + bias[0], 0.0)

    kf = conv_bn_relu(z, params["wk"], *params["bnk"])
    sf = conv_bn_relu(x, params["ws"], *params["bns"])
    B, Hs, Ws, C = sf.shape
    _, Hk, Wk, _ = kf.shape
    lhs = sf.transpose(1, 2, 0, 3).reshape(1, Hs, Ws, B * C)
    rhs = kf.transpose(1, 2, 0, 3).reshape(Hk, Wk, 1, B * C)
    y = jax.lax.conv_general_dilated(
        lhs, rhs, (1, 1), "VALID",
        dimension_numbers=("NHWC", "HWIO", "NHWC"),
        feature_group_count=B * C)
    Ho, Wo = Hs - Hk + 1, Ws - Wk + 1
    feat = y.reshape(Ho, Wo, B, C).transpose(2, 0, 1, 3)
    s1, b1 = params["bnh"]
    h = jnp.maximum(jnp.einsum("bhwc,cd->bhwd", feat, params["w1"]) * s1[0] + b1[0], 0.0)
    out = jnp.einsum("bhwc,cd->bhwd", h, params["w2"]) + params["b2"][0]
    return jnp.transpose(out, (0, 3, 1, 2))


# ------------------------------ main -------------------------------------------

if __name__ == "__main__":
    in_channels, hidden, out_channels = 4, 32, 8
    key = jax.random.PRNGKey(0)
    kz, kx, kp = jax.random.split(key, 3)
    # template ("kernel") and search inputs, NCHW like PyTorch
    z = jax.random.normal(kz, (2, in_channels, 8, 8), jnp.float32)
    x = jax.random.normal(kx, (2, in_channels, 16, 16), jnp.float32)
    params = init_params(kp, in_channels, hidden, out_channels)
    prepared = prepare_params(params)

    fwd = jax.jit(depth_corr_forward, static_argnames=("out_channels",))
    out = fwd(prepared, z, x, out_channels=out_channels)
    out = jax.block_until_ready(out)

    ref = reference_forward(params, z, x)
    assert out.shape == (2, out_channels, 9, 9), out.shape
    # bf16 MXU operands (f32 accumulation) -> slightly looser tolerance than f32.
    np.testing.assert_allclose(np.asarray(out), np.asarray(ref), rtol=5e-2, atol=5e-2)
    print("KERNEL_OK")
</pallas_src>

<mosaic_0001>
module attributes {stable_mosaic.version = 11 : i64} {
  func.func @kernel(%arg0: i32, %arg1: memref<2x40x128xbf16, #tpu.memory_space<vmem>>, %arg2: memref<2x336x128xbf16, #tpu.memory_space<vmem>>, %arg3: memref<128x128xbf16, #tpu.memory_space<vmem>>, %arg4: memref<1x128xf32, #tpu.memory_space<vmem>>, %arg5: memref<1x128xf32, #tpu.memory_space<vmem>>, %arg6: memref<128x128xbf16, #tpu.memory_space<vmem>>, %arg7: memref<1x128xf32, #tpu.memory_space<vmem>>, %arg8: memref<1x128xf32, #tpu.memory_space<vmem>>, %arg9: memref<128x128xbf16, #tpu.memory_space<vmem>>, %arg10: memref<1x128xf32, #tpu.memory_space<vmem>>, %arg11: memref<1x128xf32, #tpu.memory_space<vmem>>, %arg12: memref<128x128xbf16, #tpu.memory_space<vmem>>, %arg13: memref<1x128xf32, #tpu.memory_space<vmem>>, %arg14: memref<2x9x16x128xf32, #tpu.memory_space<vmem>>, %arg15: memref<2x40x128xf32, #tpu.memory_space<vmem>>, %arg16: memref<14x24x128xf32, #tpu.memory_space<vmem>>) attributes {dimension_semantics = [#tpu.dimension_semantics<parallel>], iteration_bounds = array<i64: 1>, scalar_prefetch = 0 : i64, scratch_operands = 2 : i64, tpu.core_type = #tpu.core_type<tc>, window_params = [{transform_indices = @transform_0, window_bounds = array<i64: 2, 40, 128>}, {transform_indices = @transform_1, window_bounds = array<i64: 2, 336, 128>}, {pipeline_mode = #tpu.pipeline_mode<synchronous>, transform_indices = @transform_2, window_bounds = array<i64: 128, 128>}, {pipeline_mode = #tpu.pipeline_mode<synchronous>, transform_indices = @transform_3, window_bounds = array<i64: 1, 128>}, {pipeline_mode = #tpu.pipeline_mode<synchronous>, transform_indices = @transform_4, window_bounds = array<i64: 1, 128>}, {pipeline_mode = #tpu.pipeline_mode<synchronous>, transform_indices = @transform_5, window_bounds = array<i64: 128, 128>}, {pipeline_mode = #tpu.pipeline_mode<synchronous>, transform_indices = @transform_6, window_bounds = array<i64: 1, 128>}, {pipeline_mode = #tpu.pipeline_mode<synchronous>, transform_indices = @transform_7, window_bounds = array<i64: 1, 128>}, {pipeline_mode = #tpu.pipeline_mode<synchronous>, transform_indices = @transform_8, window_bounds = array<i64: 128, 128>}, {pipeline_mode = #tpu.pipeline_mode<synchronous>, transform_indices = @transform_9, window_bounds = array<i64: 1, 128>}, {pipeline_mode = #tpu.pipeline_mode<synchronous>, transform_indices = @transform_10, window_bounds = array<i64: 1, 128>}, {pipeline_mode = #tpu.pipeline_mode<synchronous>, transform_indices = @transform_11, window_bounds = array<i64: 128, 128>}, {pipeline_mode = #tpu.pipeline_mode<synchronous>, transform_indices = @transform_12, window_bounds = array<i64: 1, 128>}, {transform_indices = @transform_13, window_bounds = array<i64: 2, 9, 16, 128>}]} {
    %c0 = arith.constant 0 : index
    %c0_0 = arith.constant 0 : index
    %c0_1 = arith.constant 0 : index
    %0 = vector.load %arg1[%c0, %c0_0, %c0_1] : memref<2x40x128xbf16, #tpu.memory_space<vmem>>, vector<2x40x128xbf16>
    %1 = vector.shape_cast %0 : vector<2x40x128xbf16> to vector<80x128xbf16>
    %c0_2 = arith.constant 0 : index
    %c0_3 = arith.constant 0 : index
    %2 = vector.load %arg3[%c0_2, %c0_3] : memref<128x128xbf16, #tpu.memory_space<vmem>>, vector<128x128xbf16>
    %cst = arith.constant dense<0.000000e+00> : vector<80x128xf32>
    %3 = tpu.matmul %1, %2, %cst {dimension_numbers = #tpu.dot_dimension_numbers<[1], [0], [0], [1], [0, 0, 1, 1], [], []>} : vector<80x128xbf16>, vector<128x128xbf16>, vector<80x128xf32> -> vector<80x128xf32>
    %c0_4 = arith.constant 0 : index
    %c0_5 = arith.constant 0 : index
    %4 = vector.load %arg4[%c0_4, %c0_5] : memref<1x128xf32, #tpu.memory_space<vmem>>, vector<1x128xf32>
    %5 = vector.shape_cast %4 : vector<1x128xf32> to vector<128xf32>
    %6 = vector.shape_cast %5 : vector<128xf32> to vector<1x128xf32>
    %7 = vector.broadcast %6 : vector<1x128xf32> to vector<80x128xf32>
    %8 = arith.mulf %3, %7 : vector<80x128xf32>
    %c0_6 = arith.constant 0 : index
    %c0_7 = arith.constant 0 : index
    %9 = vector.load %arg5[%c0_6, %c0_7] : memref<1x128xf32, #tpu.memory_space<vmem>>, vector<1x128xf32>
    %10 = vector.shape_cast %9 : vector<1x128xf32> to vector<128xf32>
    %11 = vector.shape_cast %10 : vector<128xf32> to vector<1x128xf32>
    %12 = vector.broadcast %11 : vector<1x128xf32> to vector<80x128xf32>
    %13 = arith.addf %8, %12 : vector<80x128xf32>
    %cst_8 = arith.constant 0.000000e+00 : f32
    %14 = vector.broadcast %cst_8 : f32 to vector<80x128xf32>
    %15 = arith.maximumf %13, %14 : vector<80x128xf32>
    %16 = vector.shape_cast %15 : vector<80x128xf32> to vector<2x40x128xf32>
    %c0_9 = arith.constant 0 : index
    %c0_10 = arith.constant 0 : index
    %c0_11 = arith.constant 0 : index
    %17 = vector.load %arg15[%c0_9, %c0_10, %c0_11] : memref<2x40x128xf32, #tpu.memory_space<vmem>>, vector<2x40x128xf32>
    tpu.vector_store %arg15[%c0_9, %c0_10, %c0_11], %16 {strides = array<i32>} : memref<2x40x128xf32, #tpu.memory_space<vmem>>, vector<2x40x128xf32>,
    %c0_i32 = arith.constant 0 : i32
    %c2_i32 = arith.constant 2 : i32
    %18 = arith.addi %c0_i32, %c2_i32 : i32
    %c1_i32 = arith.constant 1 : i32
    scf.for %arg17 = %c0_i32 to %18 step %c1_i32  : i32 {
      %c1_i32_13 = arith.constant 1 : i32
      %19 = arith.muli %arg17, %c1_i32_13 : i32
      %c0_i32_14 = arith.constant 0 : i32
      %20 = arith.addi %c0_i32_14, %19 : i32
      %21 = arith.index_cast %20 : i32 to index
      %c0_15 = arith.constant 0 : index
      %c0_16 = arith.constant 0 : index
      %22 = vector.load %arg2[%21, %c0_15, %c0_16] : memref<2x336x128xbf16, #tpu.memory_space<vmem>>, vector<1x336x128xbf16>
      %23 = vector.shape_cast %22 : vector<1x336x128xbf16> to vector<336x128xbf16>
      %c0_17 = arith.constant 0 : index
      %c0_18 = arith.constant 0 : index
      %24 = vector.load %arg6[%c0_17, %c0_18] : memref<128x128xbf16, #tpu.memory_space<vmem>>, vector<128x128xbf16>
      %cst_19 = arith.constant dense<0.000000e+00> : vector<336x128xf32>
      %25 = tpu.matmul %23, %24, %cst_19 {dimension_numbers = #tpu.dot_dimension_numbers<[1], [0], [0], [1], [0, 0, 1, 1], [], []>} : vector<336x128xbf16>, vector<128x128xbf16>, vector<336x128xf32> -> vector<336x128xf32>
      %c0_20 = arith.constant 0 : index
      %c0_21 = arith.constant 0 : index
      %26 = vector.load %arg7[%c0_20, %c0_21] : memref<1x128xf32, #tpu.memory_space<vmem>>, vector<1x128xf32>
      %27 = vector.shape_cast %26 : vector<1x128xf32> to vector<128xf32>
      %28 = vector.shape_cast %27 : vector<128xf32> to vector<1x128xf32>
      %29 = vector.broadcast %28 : vector<1x128xf32> to vector<336x128xf32>
      %30 = arith.mulf %25, %29 : vector<336x128xf32>
      %c0_22 = arith.constant 0 : index
      %c0_23 = arith.constant 0 : index
      %31 = vector.load %arg8[%c0_22, %c0_23] : memref<1x128xf32, #tpu.memory_space<vmem>>, vector<1x128xf32>
      %32 = vector.shape_cast %31 : vector<1x128xf32> to vector<128xf32>
      %33 = vector.shape_cast %32 : vector<128xf32> to vector<1x128xf32>
      %34 = vector.broadcast %33 : vector<1x128xf32> to vector<336x128xf32>
      %35 = arith.addf %30, %34 : vector<336x128xf32>
      %cst_24 = arith.constant 0.000000e+00 : f32
      %36 = vector.broadcast %cst_24 : f32 to vector<336x128xf32>
      %37 = arith.maximumf %35, %36 : vector<336x128xf32>
      %38 = vector.shape_cast %37 : vector<336x128xf32> to vector<14x24x128xf32>
      %c0_25 = arith.constant 0 : index
      %c0_26 = arith.constant 0 : index
      %c0_27 = arith.constant 0 : index
      %39 = vector.load %arg16[%c0_25, %c0_26, %c0_27] : memref<14x24x128xf32, #tpu.memory_space<vmem>>, vector<14x24x128xf32>
      tpu.vector_store %arg16[%c0_25, %c0_26, %c0_27], %38 {strides = array<i32>} : memref<14x24x128xf32, #tpu.memory_space<vmem>>, vector<14x24x128xf32>,
      %c0_28 = arith.constant 0 : index
      %c0_29 = arith.constant 0 : index
      %c0_30 = arith.constant 0 : index
      %40 = vector.load %arg16[%c0_28, %c0_29, %c0_30] : memref<14x24x128xf32, #tpu.memory_space<vmem>>, vector<14x16x128xf32>
      %41 = vector.extract_strided_slice %40 {offsets = [0, 0, 0], sizes = [9, 16, 128], strides = [1, 1, 1]} : vector<14x16x128xf32> to vector<9x16x128xf32>
      %c0_i32_31 = arith.constant 0 : i32
      %c0_i32_32 = arith.constant 0 : i32
      %42 = tpu.memref_slice %arg15[%20, %c0_i32_31, %c0_i32_32] : memref<2x40x128xf32, #tpu.memory_space<vmem>> -> memref<1x40x128xf32, #tpu.memory_space<vmem>>
      %43 = tpu.memref_squeeze %42 : memref<1x40x128xf32, #tpu.memory_space<vmem>> -> memref<40x128xf32, #tpu.memory_space<vmem>>
      %c0_33 = arith.constant 0 : index
      %c0_34 = arith.constant 0 : index
      %44 = vector.load %43[%c0_33, %c0_34] : memref<40x128xf32, #tpu.memory_space<vmem>>, vector<1x128xf32>
      %45 = vector.shape_cast %44 : vector<1x128xf32> to vector<128xf32>
      %46 = vector.shape_cast %45 : vector<128xf32> to vector<1x1x128xf32>
      %47 = vector.broadcast %46 : vector<1x1x128xf32> to vector<9x16x128xf32>
      %48 = arith.mulf %41, %47 : vector<9x16x128xf32>
      %49 = vector.extract_strided_slice %40 {offsets = [1, 0, 0], sizes = [9, 16, 128], strides = [1, 1, 1]} : vector<14x16x128xf32> to vector<9x16x128xf32>
      %c0_i32_35 = arith.constant 0 : i32
      %c0_i32_36 = arith.constant 0 : i32
      %50 = tpu.memref_slice %arg15[%20, %c0_i32_35, %c0_i32_36] : memref<2x40x128xf32, #tpu.memory_space<vmem>> -> memref<1x40x128xf32, #tpu.memory_space<vmem>>
      %51 = tpu.memref_squeeze %50 : memref<1x40x128xf32, #tpu.memory_space<vmem>> -> memref<40x128xf32, #tpu.memory_space<vmem>>
      %c6 = arith.constant 6 : index
      %c0_37 = arith.constant 0 : index
      %52 = vector.load %51[%c6, %c0_37] : memref<40x128xf32, #tpu.memory_space<vmem>>, vector<1x128xf32>
      %53 = vector.shape_cast %52 : vector<1x128xf32> to vector<128xf32>
      %54 = vector.shape_cast %53 : vector<128xf32> to vector<1x1x128xf32>
      %55 = vector.broadcast %54 : vector<1x1x128xf32> to vector<9x16x128xf32>
      %56 = arith.mulf %49, %55 : vector<9x16x128xf32>
      %57 = arith.addf %48, %56 : vector<9x16x128xf32>
      %58 = vector.extract_strided_slice %40 {offsets = [2, 0, 0], sizes = [9, 16, 128], strides = [1, 1, 1]} : vector<14x16x128xf32> to vector<9x16x128xf32>
      %c0_i32_38 = arith.constant 0 : i32
      %c0_i32_39 = arith.constant 0 : i32
      %59 = tpu.memref_slice %arg15[%20, %c0_i32_38, %c0_i32_39] : memref<2x40x128xf32, #tpu.memory_space<vmem>> -> memref<1x40x128xf32, #tpu.memory_space<vmem>>
      %60 = tpu.memref_squeeze %59 : memref<1x40x128xf32, #tpu.memory_space<vmem>> -> memref<40x128xf32, #tpu.memory_space<vmem>>
      %c12 = arith.constant 12 : index
      %c0_40 = arith.constant 0 : index
      %61 = vector.load %60[%c12, %c0_40] : memref<40x128xf32, #tpu.memory_space<vmem>>, vector<1x128xf32>
      %62 = vector.shape_cast %61 : vector<1x128xf32> to vector<128xf32>
      %63 = vector.shape_cast %62 : vector<128xf32> to vector<1x1x128xf32>
      %64 = vector.broadcast %63 : vector<1x1x128xf32> to vector<9x16x128xf32>
      %65 = arith.mulf %58, %64 : vector<9x16x128xf32>
      %66 = arith.addf %57, %65 : vector<9x16x128xf32>
      %67 = vector.extract_strided_slice %40 {offsets = [3, 0, 0], sizes = [9, 16, 128], strides = [1, 1, 1]} : vector<14x16x128xf32> to vector<9x16x128xf32>
      %c0_i32_41 = arith.constant 0 : i32
      %c0_i32_42 = arith.constant 0 : i32
      %68 = tpu.memref_slice %arg15[%20, %c0_i32_41, %c0_i32_42] : memref<2x40x128xf32, #tpu.memory_space<vmem>> -> memref<1x40x128xf32, #tpu.memory_space<vmem>>
      %69 = tpu.memref_squeeze %68 : memref<1x40x128xf32, #tpu.memory_space<vmem>> -> memref<40x128xf32, #tpu.memory_space<vmem>>
      %c18 = arith.constant 18 : index
      %c0_43 = arith.constant 0 : index
      %70 = vector.load %69[%c18, %c0_43] : memref<40x128xf32, #tpu.memory_space<vmem>>, vector<1x128xf32>
      %71 = vector.shape_cast %70 : vector<1x128xf32> to vector<128xf32>
      %72 = vector.shape_cast %71 : vector<128xf32> to vector<1x1x128xf32>
      %73 = vector.broadcast %72 : vector<1x1x128xf32> to vector<9x16x128xf32>
      %74 = arith.mulf %67, %73 : vector<9x16x128xf32>
      %75 = arith.addf %66, %74 : vector<9x16x128xf32>
      %76 = vector.extract_strided_slice %40 {offsets = [4, 0, 0], sizes = [9, 16, 128], strides = [1, 1, 1]} : vector<14x16x128xf32> to vector<9x16x128xf32>
      %c0_i32_44 = arith.constant 0 : i32
      %c0_i32_45 = arith.constant 0 : i32
      %77 = tpu.memref_slice %arg15[%20, %c0_i32_44, %c0_i32_45] : memref<2x40x128xf32, #tpu.memory_space<vmem>> -> memref<1x40x128xf32, #tpu.memory_space<vmem>>
      %78 = tpu.memref_squeeze %77 : memref<1x40x128xf32, #tpu.memory_space<vmem>> -> memref<40x128xf32, #tpu.memory_space<vmem>>
      %c24 = arith.constant 24 : index
      %c0_46 = arith.constant 0 : index
      %79 = vector.load %78[%c24, %c0_46] : memref<40x128xf32, #tpu.memory_space<vmem>>, vector<1x128xf32>
      %80 = vector.shape_cast %79 : vector<1x128xf32> to vector<128xf32>
      %81 = vector.shape_cast %80 : vector<128xf32> to vector<1x1x128xf32>
      %82 = vector.broadcast %81 : vector<1x1x128xf32> to vector<9x16x128xf32>
      %83 = arith.mulf %76, %82 : vector<9x16x128xf32>
      %84 = arith.addf %75, %83 : vector<9x16x128xf32>
      %85 = vector.extract_strided_slice %40 {offsets = [5, 0, 0], sizes = [9, 16, 128], strides = [1, 1, 1]} : vector<14x16x128xf32> to vector<9x16x128xf32>
      %c0_i32_47 = arith.constant 0 : i32
      %c0_i32_48 = arith.constant 0 : i32
      %86 = tpu.memref_slice %arg15[%20, %c0_i32_47, %c0_i32_48] : memref<2x40x128xf32, #tpu.memory_space<vmem>> -> memref<1x40x128xf32, #tpu.memory_space<vmem>>
      %87 = tpu.memref_squeeze %86 : memref<1x40x128xf32, #tpu.memory_space<vmem>> -> memref<40x128xf32, #tpu.memory_space<vmem>>
      %c30 = arith.constant 30 : index
      %c0_49 = arith.constant 0 : index
      %88 = vector.load %87[%c30, %c0_49] : memref<40x128xf32, #tpu.memory_space<vmem>>, vector<1x128xf32>
      %89 = vector.shape_cast %88 : vector<1x128xf32> to vector<128xf32>
      %90 = vector.shape_cast %89 : vector<128xf32> to vector<1x1x128xf32>
      %91 = vector.broadcast %90 : vector<1x1x128xf32> to vector<9x16x128xf32>
      %92 = arith.mulf %85, %91 : vector<9x16x128xf32>
      %93 = arith.addf %84, %92 : vector<9x16x128xf32>
      %c0_50 = arith.constant 0 : index
      %c1 = arith.constant 1 : index
      %c0_51 = arith.constant 0 : index
      %94 = vector.load %arg16[%c0_50, %c1, %c0_51] : memref<14x24x128xf32, #tpu.memory_space<vmem>>, vector<14x16x128xf32>
      %95 = vector.extract_strided_slice %94 {offsets = [0, 0, 0], sizes = [9, 16, 128], strides = [1, 1, 1]} : vector<14x16x128xf32> to vector<9x16x128xf32>
      %c0_i32_52 = arith.constant 0 : i32
      %c0_i32_53 = arith.constant 0 : i32
      %96 = tpu.memref_slice %arg15[%20, %c0_i32_52, %c0_i32_53] : memref<2x40x128xf32, #tpu.memory_space<vmem>> -> memref<1x40x128xf32, #tpu.memory_space<vmem>>
      %97 = tpu.memref_squeeze %96 : memref<1x40x128xf32, #tpu.memory_space<vmem>> -> memref<40x128xf32, #tpu.memory_space<vmem>>
      %c1_54 = arith.constant 1 : index
      %c0_55 = arith.constant 0 : index
      %98 = vector.load %97[%c1_54, %c0_55] : memref<40x128xf32, #tpu.memory_space<vmem>>, vector<1x128xf32>
      %99 = vector.shape_cast %98 : vector<1x128xf32> to vector<128xf32>
      %100 = vector.shape_cast %99 : vector<128xf32> to vector<1x1x128xf32>
      %101 = vector.broadcast %100 : vector<1x1x128xf32> to vector<9x16x128xf32>
      %102 = arith.mulf %95, %101 : vector<9x16x128xf32>
      %103 = arith.addf %93, %102 : vector<9x16x128xf32>
      %104 = vector.extract_strided_slice %94 {offsets = [1, 0, 0], sizes = [9, 16, 128], strides = [1, 1, 1]} : vector<14x16x128xf32> to vector<9x16x128xf32>
      %c0_i32_56 = arith.constant 0 : i32
      %c0_i32_57 = arith.constant 0 : i32
      %105 = tpu.memref_slice %arg15[%20, %c0_i32_56, %c0_i32_57] : memref<2x40x128xf32, #tpu.memory_space<vmem>> -> memref<1x40x128xf32, #tpu.memory_space<vmem>>
      %106 = tpu.memref_squeeze %105 : memref<1x40x128xf32, #tpu.memory_space<vmem>> -> memref<40x128xf32, #tpu.memory_space<vmem>>
      %c7 = arith.constant 7 : index
      %c0_58 = arith.constant 0 : index
      %107 = vector.load %106[%c7, %c0_58] : memref<40x128xf32, #tpu.memory_space<vmem>>, vector<1x128xf32>
      %108 = vector.shape_cast %107 : vector<1x128xf32> to vector<128xf32>
      %109 = vector.shape_cast %108 : vector<128xf32> to vector<1x1x128xf32>
      %110 = vector.broadcast %109 : vector<1x1x128xf32> to vector<9x16x128xf32>
      %111 = arith.mulf %104, %110 : vector<9x16x128xf32>
      %112 = arith.addf %103, %111 : vector<9x16x128xf32>
      %113 = vector.extract_strided_slice %94 {offsets = [2, 0, 0], sizes = [9, 16, 128], strides = [1, 1, 1]} : vector<14x16x128xf32> to vector<9x16x128xf32>
      %c0_i32_59 = arith.constant 0 : i32
      %c0_i32_60 = arith.constant 0 : i32
      %114 = tpu.memref_slice %arg15[%20, %c0_i32_59, %c0_i32_60] : memref<2x40x128xf32, #tpu.memory_space<vmem>> -> memref<1x40x128xf32, #tpu.memory_space<vmem>>
      %115 = tpu.memref_squeeze %114 : memref<1x40x128xf32, #tpu.memory_space<vmem>> -> memref<40x128xf32, #tpu.memory_space<vmem>>
      %c13 = arith.constant 13 : index
      %c0_61 = arith.constant 0 : index
      %116 = vector.load %115[%c13, %c0_61] : memref<40x128xf32, #tpu.memory_space<vmem>>, vector<1x128xf32>
      %117 = vector.shape_cast %116 : vector<1x128xf32> to vector<128xf32>
      %118 = vector.shape_cast %117 : vector<128xf32> to vector<1x1x128xf32>
      %119 = vector.broadcast %118 : vector<1x1x128xf32> to vector<9x16x128xf32>
      %120 = arith.mulf %113, %119 : vector<9x16x128xf32>
      %121 = arith.addf %112, %120 : vector<9x16x128xf32>
      %122 = vector.extract_strided_slice %94 {offsets = [3, 0, 0], sizes = [9, 16, 128], strides = [1, 1, 1]} : vector<14x16x128xf32> to vector<9x16x128xf32>
      %c0_i32_62 = arith.constant 0 : i32
      %c0_i32_63 = arith.constant 0 : i32
      %123 = tpu.memref_slice %arg15[%20, %c0_i32_62, %c0_i32_63] : memref<2x40x128xf32, #tpu.memory_space<vmem>> -> memref<1x40x128xf32, #tpu.memory_space<vmem>>
      %124 = tpu.memref_squeeze %123 : memref<1x40x128xf32, #tpu.memory_space<vmem>> -> memref<40x128xf32, #tpu.memory_space<vmem>>
      %c19 = arith.constant 19 : index
      %c0_64 = arith.constant 0 : index
      %125 = vector.load %124[%c19, %c0_64] : memref<40x128xf32, #tpu.memory_space<vmem>>, vector<1x128xf32>
      %126 = vector.shape_cast %125 : vector<1x128xf32> to vector<128xf32>
      %127 = vector.shape_cast %126 : vector<128xf32> to vector<1x1x128xf32>
      %128 = vector.broadcast %127 : vector<1x1x128xf32> to vector<9x16x128xf32>
      %129 = arith.mulf %122, %128 : vector<9x16x128xf32>
      %130 = arith.addf %121, %129 : vector<9x16x128xf32>
      %131 = vector.extract_strided_slice %94 {offsets = [4, 0, 0], sizes = [9, 16, 128], strides = [1, 1, 1]} : vector<14x16x128xf32> to vector<9x16x128xf32>
      %c0_i32_65 = arith.constant 0 : i32
      %c0_i32_66 = arith.constant 0 : i32
      %132 = tpu.memref_slice %arg15[%20, %c0_i32_65, %c0_i32_66] : memref<2x40x128xf32, #tpu.memory_space<vmem>> -> memref<1x40x128xf32, #tpu.memory_space<vmem>>
      %133 = tpu.memref_squeeze %132 : memref<1x40x128xf32, #tpu.memory_space<vmem>> -> memref<40x128xf32, #tpu.memory_space<vmem>>
      %c25 = arith.constant 25 : index
      %c0_67 = arith.constant 0 : index
      %134 = vector.load %133[%c25, %c0_67] : memref<40x128xf32, #tpu.memory_space<vmem>>, vector<1x128xf32>
      %135 = vector.shape_cast %134 : vector<1x128xf32> to vector<128xf32>
      %136 = vector.shape_cast %135 : vector<128xf32> to vector<1x1x128xf32>
      %137 = vector.broadcast %136 : vector<1x1x128xf32> to vector<9x16x128xf32>
      %138 = arith.mulf %131, %137 : vector<9x16x128xf32>
      %139 = arith.addf %130, %138 : vector<9x16x128xf32>
      %140 = vector.extract_strided_slice %94 {offsets = [5, 0, 0], sizes = [9, 16, 128], strides = [1, 1, 1]} : vector<14x16x128xf32> to vector<9x16x128xf32>
      %c0_i32_68 = arith.constant 0 : i32
      %c0_i32_69 = arith.constant 0 : i32
      %141 = tpu.memref_slice %arg15[%20, %c0_i32_68, %c0_i32_69] : memref<2x40x128xf32, #tpu.memory_space<vmem>> -> memref<1x40x128xf32, #tpu.memory_space<vmem>>
      %142 = tpu.memref_squeeze %141 : memref<1x40x128xf32, #tpu.memory_space<vmem>> -> memref<40x128xf32, #tpu.memory_space<vmem>>
      %c31 = arith.constant 31 : index
      %c0_70 = arith.constant 0 : index
      %143 = vector.load %142[%c31, %c0_70] : memref<40x128xf32, #tpu.memory_space<vmem>>, vector<1x128xf32>
      %144 = vector.shape_cast %143 : vector<1x128xf32> to vector<128xf32>
      %145 = vector.shape_cast %144 : vector<128xf32> to vector<1x1x128xf32>
      %146 = vector.broadcast %145 : vector<1x1x128xf32> to vector<9x16x128xf32>
      %147 = arith.mulf %140, %146 : vector<9x16x128xf32>
      %148 = arith.addf %139, %147 : vector<9x16x128xf32>
      %c0_71 = arith.constant 0 : index
      %c2 = arith.constant 2 : index
      %c0_72 = arith.constant 0 : index
      %149 = vector.load %arg16[%c0_71, %c2, %c0_72] : memref<14x24x128xf32, #tpu.memory_space<vmem>>, vector<14x16x128xf32>
      %150 = vector.extract_strided_slice %149 {offsets = [0, 0, 0], sizes = [9, 16, 128], strides = [1, 1, 1]} : vector<14x16x128xf32> to vector<9x16x128xf32>
      %c0_i32_73 = arith.constant 0 : i32
      %c0_i32_74 = arith.constant 0 : i32
      %151 = tpu.memref_slice %arg15[%20, %c0_i32_73, %c0_i32_74] : memref<2x40x128xf32, #tpu.memory_space<vmem>> -> memref<1x40x128xf32, #tpu.memory_space<vmem>>
      %152 = tpu.memref_squeeze %151 : memref<1x40x128xf32, #tpu.memory_space<vmem>> -> memref<40x128xf32, #tpu.memory_space<vmem>>
      %c2_75 = arith.constant 2 : index
      %c0_76 = arith.constant 0 : index
      %153 = vector.load %152[%c2_75, %c0_76] : memref<40x128xf32, #tpu.memory_space<vmem>>, vector<1x128xf32>
      %154 = vector.shape_cast %153 : vector<1x128xf32> to vector<128xf32>
      %155 = vector.shape_cast %154 : vector<128xf32> to vector<1x1x128xf32>
      %156 = vector.broadcast %155 : vector<1x1x128xf32> to vector<9x16x128xf32>
      %157 = arith.mulf %150, %156 : vector<9x16x128xf32>
      %158 = arith.addf %148, %157 : vector<9x16x128xf32>
      %159 = vector.extract_strided_slice %149 {offsets = [1, 0, 0], sizes = [9, 16, 128], strides = [1, 1, 1]} : vector<14x16x128xf32> to vector<9x16x128xf32>
      %c0_i32_77 = arith.constant 0 : i32
      %c0_i32_78 = arith.constant 0 : i32
      %160 = tpu.memref_slice %arg15[%20, %c0_i32_77, %c0_i32_78] : memref<2x40x128xf32, #tpu.memory_space<vmem>> -> memref<1x40x128xf32, #tpu.memory_space<vmem>>
      %161 = tpu.memref_squeeze %160 : memref<1x40x128xf32, #tpu.memory_space<vmem>> -> memref<40x128xf32, #tpu.memory_space<vmem>>
      %c8 = arith.constant 8 : index
      %c0_79 = arith.constant 0 : index
      %162 = vector.load %161[%c8, %c0_79] : memref<40x128xf32, #tpu.memory_space<vmem>>, vector<1x128xf32>
      %163 = vector.shape_cast %162 : vector<1x128xf32> to vector<128xf32>
      %164 = vector.shape_cast %163 : vector<128xf32> to vector<1x1x128xf32>
      %165 = vector.broadcast %164 : vector<1x1x128xf32> to vector<9x16x128xf32>
      %166 = arith.mulf %159, %165 : vector<9x16x128xf32>
      %167 = arith.addf %158, %166 : vector<9x16x128xf32>
      %168 = vector.extract_strided_slice %149 {offsets = [2, 0, 0], sizes = [9, 16, 128], strides = [1, 1, 1]} : vector<14x16x128xf32> to vector<9x16x128xf32>
      %c0_i32_80 = arith.constant 0 : i32
      %c0_i32_81 = arith.constant 0 : i32
      %169 = tpu.memref_slice %arg15[%20, %c0_i32_80, %c0_i32_81] : memref<2x40x128xf32, #tpu.memory_space<vmem>> -> memref<1x40x128xf32, #tpu.memory_space<vmem>>
      %170 = tpu.memref_squeeze %169 : memref<1x40x128xf32, #tpu.memory_space<vmem>> -> memref<40x128xf32, #tpu.memory_space<vmem>>
      %c14 = arith.constant 14 : index
      %c0_82 = arith.constant 0 : index
      %171 = vector.load %170[%c14, %c0_82] : memref<40x128xf32, #tpu.memory_space<vmem>>, vector<1x128xf32>
      %172 = vector.shape_cast %171 : vector<1x128xf32> to vector<128xf32>
      %173 = vector.shape_cast %172 : vector<128xf32> to vector<1x1x128xf32>
      %174 = vector.broadcast %173 : vector<1x1x128xf32> to vector<9x16x128xf32>
      %175 = arith.mulf %168, %174 : vector<9x16x128xf32>
      %176 = arith.addf %167, %175 : vector<9x16x128xf32>
      %177 = vector.extract_strided_slice %149 {offsets = [3, 0, 0], sizes = [9, 16, 128], strides = [1, 1, 1]} : vector<14x16x128xf32> to vector<9x16x128xf32>
      %c0_i32_83 = arith.constant 0 : i32
      %c0_i32_84 = arith.constant 0 : i32
      %178 = tpu.memref_slice %arg15[%20, %c0_i32_83, %c0_i32_84] : memref<2x40x128xf32, #tpu.memory_space<vmem>> -> memref<1x40x128xf32, #tpu.memory_space<vmem>>
      %179 = tpu.memref_squeeze %178 : memref<1x40x128xf32, #tpu.memory_space<vmem>> -> memref<40x128xf32, #tpu.memory_space<vmem>>
      %c20 = arith.constant 20 : index
      %c0_85 = arith.constant 0 : index
      %180 = vector.load %179[%c20, %c0_85] : memref<40x128xf32, #tpu.memory_space<vmem>>, vector<1x128xf32>
      %181 = vector.shape_cast %180 : vector<1x128xf32> to vector<128xf32>
      %182 = vector.shape_cast %181 : vector<128xf32> to vector<1x1x128xf32>
      %183 = vector.broadcast %182 : vector<1x1x128xf32> to vector<9x16x128xf32>
      %184 = arith.mulf %177, %183 : vector<9x16x128xf32>
      %185 = arith.addf %176, %184 : vector<9x16x128xf32>
      %186 = vector.extract_strided_slice %149 {offsets = [4, 0, 0], sizes = [9, 16, 128], strides = [1, 1, 1]} : vector<14x16x128xf32> to vector<9x16x128xf32>
      %c0_i32_86 = arith.constant 0 : i32
      %c0_i32_87 = arith.constant 0 : i32
      %187 = tpu.memref_slice %arg15[%20, %c0_i32_86, %c0_i32_87] : memref<2x40x128xf32, #tpu.memory_space<vmem>> -> memref<1x40x128xf32, #tpu.memory_space<vmem>>
      %188 = tpu.memref_squeeze %187 : memref<1x40x128xf32, #tpu.memory_space<vmem>> -> memref<40x128xf32, #tpu.memory_space<vmem>>
      %c26 = arith.constant 26 : index
      %c0_88 = arith.constant 0 : index
      %189 = vector.load %188[%c26, %c0_88] : memref<40x128xf32, #tpu.memory_space<vmem>>, vector<1x128xf32>
      %190 = vector.shape_cast %189 : vector<1x128xf32> to vector<128xf32>
      %191 = vector.shape_cast %190 : vector<128xf32> to vector<1x1x128xf32>
      %192 = vector.broadcast %191 : vector<1x1x128xf32> to vector<9x16x128xf32>
      %193 = arith.mulf %186, %192 : vector<9x16x128xf32>
      %194 = arith.addf %185, %193 : vector<9x16x128xf32>
      %195 = vector.extract_strided_slice %149 {offsets = [5, 0, 0], sizes = [9, 16, 128], strides = [1, 1, 1]} : vector<14x16x128xf32> to vector<9x16x128xf32>
      %c0_i32_89 = arith.constant 0 : i32
      %c0_i32_90 = arith.constant 0 : i32
      %196 = tpu.memref_slice %arg15[%20, %c0_i32_89, %c0_i32_90] : memref<2x40x128xf32, #tpu.memory_space<vmem>> -> memref<1x40x128xf32, #tpu.memory_space<vmem>>
      %197 = tpu.memref_squeeze %196 : memref<1x40x128xf32, #tpu.memory_space<vmem>> -> memref<40x128xf32, #tpu.memory_space<vmem>>
      %c32 = arith.constant 32 : index
      %c0_91 = arith.constant 0 : index
      %198 = vector.load %197[%c32, %c0_91] : memref<40x128xf32, #tpu.memory_space<vmem>>, vector<1x128xf32>
      %199 = vector.shape_cast %198 : vector<1x128xf32> to vector<128xf32>
      %200 = vector.shape_cast %199 : vector<128xf32> to vector<1x1x128xf32>
      %201 = vector.broadcast %200 : vector<1x1x128xf32> to vector<9x16x128xf32>
      %202 = arith.mulf %195, %201 : vector<9x16x128xf32>
      %203 = arith.addf %194, %202 : vector<9x16x128xf32>
      %c0_92 = arith.constant 0 : index
      %c3 = arith.constant 3 : index
      %c0_93 = arith.constant 0 : index
      %204 = vector.load %arg16[%c0_92, %c3, %c0_93] : memref<14x24x128xf32, #tpu.memory_space<vmem>>, vector<14x16x128xf32>
      %205 = vector.extract_strided_slice %204 {offsets = [0, 0, 0], sizes = [9, 16, 128], strides = [1, 1, 1]} : vector<14x16x128xf32> to vector<9x16x128xf32>
      %c0_i32_94 = arith.constant 0 : i32
      %c0_i32_95 = arith.constant 0 : i32
      %206 = tpu.memref_slice %arg15[%20, %c0_i32_94, %c0_i32_95] : memref<2x40x128xf32, #tpu.memory_space<vmem>> -> memref<1x40x128xf32, #tpu.memory_space<vmem>>
      %207 = tpu.memref_squeeze %206 : memref<1x40x128xf32, #tpu.memory_space<vmem>> -> memref<40x128xf32, #tpu.memory_space<vmem>>
      %c3_96 = arith.constant 3 : index
      %c0_97 = arith.constant 0 : index
      %208 = vector.load %207[%c3_96, %c0_97] : memref<40x128xf32, #tpu.memory_space<vmem>>, vector<1x128xf32>
      %209 = vector.shape_cast %208 : vector<1x128xf32> to vector<128xf32>
      %210 = vector.shape_cast %209 : vector<128xf32> to vector<1x1x128xf32>
      %211 = vector.broadcast %210 : vector<1x1x128xf32> to vector<9x16x128xf32>
      %212 = arith.mulf %205, %211 : vector<9x16x128xf32>
      %213 = arith.addf %203, %212 : vector<9x16x128xf32>
      %214 = vector.extract_strided_slice %204 {offsets = [1, 0, 0], sizes = [9, 16, 128], strides = [1, 1, 1]} : vector<14x16x128xf32> to vector<9x16x128xf32>
      %c0_i32_98 = arith.constant 0 : i32
      %c0_i32_99 = arith.constant 0 : i32
      %215 = tpu.memref_slice %arg15[%20, %c0_i32_98, %c0_i32_99] : memref<2x40x128xf32, #tpu.memory_space<vmem>> -> memref<1x40x128xf32, #tpu.memory_space<vmem>>
      %216 = tpu.memref_squeeze %215 : memref<1x40x128xf32, #tpu.memory_space<vmem>> -> memref<40x128xf32, #tpu.memory_space<vmem>>
      %c9 = arith.constant 9 : index
      %c0_100 = arith.constant 0 : index
      %217 = vector.load %216[%c9, %c0_100] : memref<40x128xf32, #tpu.memory_space<vmem>>, vector<1x128xf32>
      %218 = vector.shape_cast %217 : vector<1x128xf32> to vector<128xf32>
      %219 = vector.shape_cast %218 : vector<128xf32> to vector<1x1x128xf32>
      %220 = vector.broadcast %219 : vector<1x1x128xf32> to vector<9x16x128xf32>
      %221 = arith.mulf %214, %220 : vector<9x16x128xf32>
      %222 = arith.addf %213, %221 : vector<9x16x128xf32>
      %223 = vector.extract_strided_slice %204 {offsets = [2, 0, 0], sizes = [9, 16, 128], strides = [1, 1, 1]} : vector<14x16x128xf32> to vector<9x16x128xf32>
      %c0_i32_101 = arith.constant 0 : i32
      %c0_i32_102 = arith.constant 0 : i32
      %224 = tpu.memref_slice %arg15[%20, %c0_i32_101, %c0_i32_102] : memref<2x40x128xf32, #tpu.memory_space<vmem>> -> memref<1x40x128xf32, #tpu.memory_space<vmem>>
      %225 = tpu.memref_squeeze %224 : memref<1x40x128xf32, #tpu.memory_space<vmem>> -> memref<40x128xf32, #tpu.memory_space<vmem>>
      %c15 = arith.constant 15 : index
      %c0_103 = arith.constant 0 : index
      %226 = vector.load %225[%c15, %c0_103] : memref<40x128xf32, #tpu.memory_space<vmem>>, vector<1x128xf32>
      %227 = vector.shape_cast %226 : vector<1x128xf32> to vector<128xf32>
      %228 = vector.shape_cast %227 : vector<128xf32> to vector<1x1x128xf32>
      %229 = vector.broadcast %228 : vector<1x1x128xf32> to vector<9x16x128xf32>
      %230 = arith.mulf %223, %229 : vector<9x16x128xf32>
      %231 = arith.addf %222, %230 : vector<9x16x128xf32>
      %232 = vector.extract_strided_slice %204 {offsets = [3, 0, 0], sizes = [9, 16, 128], strides = [1, 1, 1]} : vector<14x16x128xf32> to vector<9x16x128xf32>
      %c0_i32_104 = arith.constant 0 : i32
      %c0_i32_105 = arith.constant 0 : i32
      %233 = tpu.memref_slice %arg15[%20, %c0_i32_104, %c0_i32_105] : memref<2x40x128xf32, #tpu.memory_space<vmem>> -> memref<1x40x128xf32, #tpu.memory_space<vmem>>
      %234 = tpu.memref_squeeze %233 : memref<1x40x128xf32, #tpu.memory_space<vmem>> -> memref<40x128xf32, #tpu.memory_space<vmem>>
      %c21 = arith.constant 21 : index
      %c0_106 = arith.constant 0 : index
      %235 = vector.load %234[%c21, %c0_106] : memref<40x128xf32, #tpu.memory_space<vmem>>, vector<1x128xf32>
      %236 = vector.shape_cast %235 : vector<1x128xf32> to vector<128xf32>
      %237 = vector.shape_cast %236 : vector<128xf32> to vector<1x1x128xf32>
      %238 = vector.broadcast %237 : vector<1x1x128xf32> to vector<9x16x128xf32>
      %239 = arith.mulf %232, %238 : vector<9x16x128xf32>
      %240 = arith.addf %231, %239 : vector<9x16x128xf32>
      %241 = vector.extract_strided_slice %204 {offsets = [4, 0, 0], sizes = [9, 16, 128], strides = [1, 1, 1]} : vector<14x16x128xf32> to vector<9x16x128xf32>
      %c0_i32_107 = arith.constant 0 : i32
      %c0_i32_108 = arith.constant 0 : i32
      %242 = tpu.memref_slice %arg15[%20, %c0_i32_107, %c0_i32_108] : memref<2x40x128xf32, #tpu.memory_space<vmem>> -> memref<1x40x128xf32, #tpu.memory_space<vmem>>
      %243 = tpu.memref_squeeze %242 : memref<1x40x128xf32, #tpu.memory_space<vmem>> -> memref<40x128xf32, #tpu.memory_space<vmem>>
      %c27 = arith.constant 27 : index
      %c0_109 = arith.constant 0 : index
      %244 = vector.load %243[%c27, %c0_109] : memref<40x128xf32, #tpu.memory_space<vmem>>, vector<1x128xf32>
      %245 = vector.shape_cast %244 : vector<1x128xf32> to vector<128xf32>
      %246 = vector.shape_cast %245 : vector<128xf32> to vector<1x1x128xf32>
      %247 = vector.broadcast %246 : vector<1x1x128xf32> to vector<9x16x128xf32>
      %248 = arith.mulf %241, %247 : vector<9x16x128xf32>
      %249 = arith.addf %240, %248 : vector<9x16x128xf32>
      %250 = vector.extract_strided_slice %204 {offsets = [5, 0, 0], sizes = [9, 16, 128], strides = [1, 1, 1]} : vector<14x16x128xf32> to vector<9x16x128xf32>
      %c0_i32_110 = arith.constant 0 : i32
      %c0_i32_111 = arith.constant 0 : i32
      %251 = tpu.memref_slice %arg15[%20, %c0_i32_110, %c0_i32_111] : memref<2x40x128xf32, #tpu.memory_space<vmem>> -> memref<1x40x128xf32, #tpu.memory_space<vmem>>
      %252 = tpu.memref_squeeze %251 : memref<1x40x128xf32, #tpu.memory_space<vmem>> -> memref<40x128xf32, #tpu.memory_space<vmem>>
      %c33 = arith.constant 33 : index
      %c0_112 = arith.constant 0 : index
      %253 = vector.load %252[%c33, %c0_112] : memref<40x128xf32, #tpu.memory_space<vmem>>, vector<1x128xf32>
      %254 = vector.shape_cast %253 : vector<1x128xf32> to vector<128xf32>
      %255 = vector.shape_cast %254 : vector<128xf32> to vector<1x1x128xf32>
      %256 = vector.broadcast %255 : vector<1x1x128xf32> to vector<9x16x128xf32>
      %257 = arith.mulf %250, %256 : vector<9x16x128xf32>
      %258 = arith.addf %249, %257 : vector<9x16x128xf32>
      %c0_113 = arith.constant 0 : index
      %c4 = arith.constant 4 : index
      %c0_114 = arith.constant 0 : index
      %259 = vector.load %arg16[%c0_113, %c4, %c0_114] : memref<14x24x128xf32, #tpu.memory_space<vmem>>, vector<14x16x128xf32>
      %260 = vector.extract_strided_slice %259 {offsets = [0, 0, 0], sizes = [9, 16, 128], strides = [1, 1, 1]} : vector<14x16x128xf32> to vector<9x16x128xf32>
      %c0_i32_115 = arith.constant 0 : i32
      %c0_i32_116 = arith.constant 0 : i32
      %261 = tpu.memref_slice %arg15[%20, %c0_i32_115, %c0_i32_116] : memref<2x40x128xf32, #tpu.memory_space<vmem>> -> memref<1x40x128xf32, #tpu.memory_space<vmem>>
      %262 = tpu.memref_squeeze %261 : memref<1x40x128xf32, #tpu.memory_space<vmem>> -> memref<40x128xf32, #tpu.memory_space<vmem>>
      %c4_117 = arith.constant 4 : index
      %c0_118 = arith.constant 0 : index
      %263 = vector.load %262[%c4_117, %c0_118] : memref<40x128xf32, #tpu.memory_space<vmem>>, vector<1x128xf32>
      %264 = vector.shape_cast %263 : vector<1x128xf32> to vector<128xf32>
      %265 = vector.shape_cast %264 : vector<128xf32> to vector<1x1x128xf32>
      %266 = vector.broadcast %265 : vector<1x1x128xf32> to vector<9x16x128xf32>
      %267 = arith.mulf %260, %266 : vector<9x16x128xf32>
      %268 = arith.addf %258, %267 : vector<9x16x128xf32>
      %269 = vector.extract_strided_slice %259 {offsets = [1, 0, 0], sizes = [9, 16, 128], strides = [1, 1, 1]} : vector<14x16x128xf32> to vector<9x16x128xf32>
      %c0_i32_119 = arith.constant 0 : i32
      %c0_i32_120 = arith.constant 0 : i32
      %270 = tpu.memref_slice %arg15[%20, %c0_i32_119, %c0_i32_120] : memref<2x40x128xf32, #tpu.memory_space<vmem>> -> memref<1x40x128xf32, #tpu.memory_space<vmem>>
      %271 = tpu.memref_squeeze %270 : memref<1x40x128xf32, #tpu.memory_space<vmem>> -> memref<40x128xf32, #tpu.memory_space<vmem>>
      %c10 = arith.constant 10 : index
      %c0_121 = arith.constant 0 : index
      %272 = vector.load %271[%c10, %c0_121] : memref<40x128xf32, #tpu.memory_space<vmem>>, vector<1x128xf32>
      %273 = vector.shape_cast %272 : vector<1x128xf32> to vector<128xf32>
      %274 = vector.shape_cast %273 : vector<128xf32> to vector<1x1x128xf32>
      %275 = vector.broadcast %274 : vector<1x1x128xf32> to vector<9x16x128xf32>
      %276 = arith.mulf %269, %275 : vector<9x16x128xf32>
      %277 = arith.addf %268, %276 : vector<9x16x128xf32>
      %278 = vector.extract_strided_slice %259 {offsets = [2, 0, 0], sizes = [9, 16, 128], strides = [1, 1, 1]} : vector<14x16x128xf32> to vector<9x16x128xf32>
      %c0_i32_122 = arith.constant 0 : i32
      %c0_i32_123 = arith.constant 0 : i32
      %279 = tpu.memref_slice %arg15[%20, %c0_i32_122, %c0_i32_123] : memref<2x40x128xf32, #tpu.memory_space<vmem>> -> memref<1x40x128xf32, #tpu.memory_space<vmem>>
      %280 = tpu.memref_squeeze %279 : memref<1x40x128xf32, #tpu.memory_space<vmem>> -> memref<40x128xf32, #tpu.memory_space<vmem>>
      %c16 = arith.constant 16 : index
      %c0_124 = arith.constant 0 : index
      %281 = vector.load %280[%c16, %c0_124] : memref<40x128xf32, #tpu.memory_space<vmem>>, vector<1x128xf32>
      %282 = vector.shape_cast %281 : vector<1x128xf32> to vector<128xf32>
      %283 = vector.shape_cast %282 : vector<128xf32> to vector<1x1x128xf32>
      %284 = vector.broadcast %283 : vector<1x1x128xf32> to vector<9x16x128xf32>
      %285 = arith.mulf %278, %284 : vector<9x16x128xf32>
      %286 = arith.addf %277, %285 : vector<9x16x128xf32>
      %287 = vector.extract_strided_slice %259 {offsets = [3, 0, 0], sizes = [9, 16, 128], strides = [1, 1, 1]} : vector<14x16x128xf32> to vector<9x16x128xf32>
      %c0_i32_125 = arith.constant 0 : i32
      %c0_i32_126 = arith.constant 0 : i32
      %288 = tpu.memref_slice %arg15[%20, %c0_i32_125, %c0_i32_126] : memref<2x40x128xf32, #tpu.memory_space<vmem>> -> memref<1x40x128xf32, #tpu.memory_space<vmem>>
      %289 = tpu.memref_squeeze %288 : memref<1x40x128xf32, #tpu.memory_space<vmem>> -> memref<40x128xf32, #tpu.memory_space<vmem>>
      %c22 = arith.constant 22 : index
      %c0_127 = arith.constant 0 : index
      %290 = vector.load %289[%c22, %c0_127] : memref<40x128xf32, #tpu.memory_space<vmem>>, vector<1x128xf32>
      %291 = vector.shape_cast %290 : vector<1x128xf32> to vector<128xf32>
      %292 = vector.shape_cast %291 : vector<128xf32> to vector<1x1x128xf32>
      %293 = vector.broadcast %292 : vector<1x1x128xf32> to vector<9x16x128xf32>
      %294 = arith.mulf %287, %293 : vector<9x16x128xf32>
      %295 = arith.addf %286, %294 : vector<9x16x128xf32>
      %296 = vector.extract_strided_slice %259 {offsets = [4, 0, 0], sizes = [9, 16, 128], strides = [1, 1, 1]} : vector<14x16x128xf32> to vector<9x16x128xf32>
      %c0_i32_128 = arith.constant 0 : i32
      %c0_i32_129 = arith.constant 0 : i32
      %297 = tpu.memref_slice %arg15[%20, %c0_i32_128, %c0_i32_129] : memref<2x40x128xf32, #tpu.memory_space<vmem>> -> memref<1x40x128xf32, #tpu.memory_space<vmem>>
      %298 = tpu.memref_squeeze %297 : memref<1x40x128xf32, #tpu.memory_space<vmem>> -> memref<40x128xf32, #tpu.memory_space<vmem>>
      %c28 = arith.constant 28 : index
      %c0_130 = arith.constant 0 : index
      %299 = vector.load %298[%c28, %c0_130] : memref<40x128xf32, #tpu.memory_space<vmem>>, vector<1x128xf32>
      %300 = vector.shape_cast %299 : vector<1x128xf32> to vector<128xf32>
      %301 = vector.shape_cast %300 : vector<128xf32> to vector<1x1x128xf32>
      %302 = vector.broadcast %301 : vector<1x1x128xf32> to vector<9x16x128xf32>
      %303 = arith.mulf %296, %302 : vector<9x16x128xf32>
      %304 = arith.addf %295, %303 : vector<9x16x128xf32>
      %305 = vector.extract_strided_slice %259 {offsets = [5, 0, 0], sizes = [9, 16, 128], strides = [1, 1, 1]} : vector<14x16x128xf32> to vector<9x16x128xf32>
      %c0_i32_131 = arith.constant 0 : i32
      %c0_i32_132 = arith.constant 0 : i32
      %306 = tpu.memref_slice %arg15[%20, %c0_i32_131, %c0_i32_132] : memref<2x40x128xf32, #tpu.memory_space<vmem>> -> memref<1x40x128xf32, #tpu.memory_space<vmem>>
      %307 = tpu.memref_squeeze %306 : memref<1x40x128xf32, #tpu.memory_space<vmem>> -> memref<40x128xf32, #tpu.memory_space<vmem>>
      %c34 = arith.constant 34 : index
      %c0_133 = arith.constant 0 : index
      %308 = vector.load %307[%c34, %c0_133] : memref<40x128xf32, #tpu.memory_space<vmem>>, vector<1x128xf32>
      %309 = vector.shape_cast %308 : vector<1x128xf32> to vector<128xf32>
      %310 = vector.shape_cast %309 : vector<128xf32> to vector<1x1x128xf32>
      %311 = vector.broadcast %310 : vector<1x1x128xf32> to vector<9x16x128xf32>
      %312 = arith.mulf %305, %311 : vector<9x16x128xf32>
      %313 = arith.addf %304, %312 : vector<9x16x128xf32>
      %c0_134 = arith.constant 0 : index
      %c5 = arith.constant 5 : index
      %c0_135 = arith.constant 0 : index
      %314 = vector.load %arg16[%c0_134, %c5, %c0_135] : memref<14x24x128xf32, #tpu.memory_space<vmem>>, vector<14x16x128xf32>
      %315 = vector.extract_strided_slice %314 {offsets = [0, 0, 0], sizes = [9, 16, 128], strides = [1, 1, 1]} : vector<14x16x128xf32> to vector<9x16x128xf32>
      %c0_i32_136 = arith.constant 0 : i32
      %c0_i32_137 = arith.constant 0 : i32
      %316 = tpu.memref_slice %arg15[%20, %c0_i32_136, %c0_i32_137] : memref<2x40x128xf32, #tpu.memory_space<vmem>> -> memref<1x40x128xf32, #tpu.memory_space<vmem>>
      %317 = tpu.memref_squeeze %316 : memref<1x40x128xf32, #tpu.memory_space<vmem>> -> memref<40x128xf32, #tpu.memory_space<vmem>>
      %c5_138 = arith.constant 5 : index
      %c0_139 = arith.constant 0 : index
      %318 = vector.load %317[%c5_138, %c0_139] : memref<40x128xf32, #tpu.memory_space<vmem>>, vector<1x128xf32>
      %319 = vector.shape_cast %318 : vector<1x128xf32> to vector<128xf32>
      %320 = vector.shape_cast %319 : vector<128xf32> to vector<1x1x128xf32>
      %321 = vector.broadcast %320 : vector<1x1x128xf32> to vector<9x16x128xf32>
      %322 = arith.mulf %315, %321 : vector<9x16x128xf32>
      %323 = arith.addf %313, %322 : vector<9x16x128xf32>
      %324 = vector.extract_strided_slice %314 {offsets = [1, 0, 0], sizes = [9, 16, 128], strides = [1, 1, 1]} : vector<14x16x128xf32> to vector<9x16x128xf32>
      %c0_i32_140 = arith.constant 0 : i32
      %c0_i32_141 = arith.constant 0 : i32
      %325 = tpu.memref_slice %arg15[%20, %c0_i32_140, %c0_i32_141] : memref<2x40x128xf32, #tpu.memory_space<vmem>> -> memref<1x40x128xf32, #tpu.memory_space<vmem>>
      %326 = tpu.memref_squeeze %325 : memref<1x40x128xf32, #tpu.memory_space<vmem>> -> memref<40x128xf32, #tpu.memory_space<vmem>>
      %c11 = arith.constant 11 : index
      %c0_142 = arith.constant 0 : index
      %327 = vector.load %326[%c11, %c0_142] : memref<40x128xf32, #tpu.memory_space<vmem>>, vector<1x128xf32>
      %328 = vector.shape_cast %327 : vector<1x128xf32> to vector<128xf32>
      %329 = vector.shape_cast %328 : vector<128xf32> to vector<1x1x128xf32>
      %330 = vector.broadcast %329 : vector<1x1x128xf32> to vector<9x16x128xf32>
      %331 = arith.mulf %324, %330 : vector<9x16x128xf32>
      %332 = arith.addf %323, %331 : vector<9x16x128xf32>
      %333 = vector.extract_strided_slice %314 {offsets = [2, 0, 0], sizes = [9, 16, 128], strides = [1, 1, 1]} : vector<14x16x128xf32> to vector<9x16x128xf32>
      %c0_i32_143 = arith.constant 0 : i32
      %c0_i32_144 = arith.constant 0 : i32
      %334 = tpu.memref_slice %arg15[%20, %c0_i32_143, %c0_i32_144] : memref<2x40x128xf32, #tpu.memory_space<vmem>> -> memref<1x40x128xf32, #tpu.memory_space<vmem>>
      %335 = tpu.memref_squeeze %334 : memref<1x40x128xf32, #tpu.memory_space<vmem>> -> memref<40x128xf32, #tpu.memory_space<vmem>>
      %c17 = arith.constant 17 : index
      %c0_145 = arith.constant 0 : index
      %336 = vector.load %335[%c17, %c0_145] : memref<40x128xf32, #tpu.memory_space<vmem>>, vector<1x128xf32>
      %337 = vector.shape_cast %336 : vector<1x128xf32> to vector<128xf32>
      %338 = vector.shape_cast %337 : vector<128xf32> to vector<1x1x128xf32>
      %339 = vector.broadcast %338 : vector<1x1x128xf32> to vector<9x16x128xf32>
      %340 = arith.mulf %333, %339 : vector<9x16x128xf32>
      %341 = arith.addf %332, %340 : vector<9x16x128xf32>
      %342 = vector.extract_strided_slice %314 {offsets = [3, 0, 0], sizes = [9, 16, 128], strides = [1, 1, 1]} : vector<14x16x128xf32> to vector<9x16x128xf32>
      %c0_i32_146 = arith.constant 0 : i32
      %c0_i32_147 = arith.constant 0 : i32
      %343 = tpu.memref_slice %arg15[%20, %c0_i32_146, %c0_i32_147] : memref<2x40x128xf32, #tpu.memory_space<vmem>> -> memref<1x40x128xf32, #tpu.memory_space<vmem>>
      %344 = tpu.memref_squeeze %343 : memref<1x40x128xf32, #tpu.memory_space<vmem>> -> memref<40x128xf32, #tpu.memory_space<vmem>>
      %c23 = arith.constant 23 : index
      %c0_148 = arith.constant 0 : index
      %345 = vector.load %344[%c23, %c0_148] : memref<40x128xf32, #tpu.memory_space<vmem>>, vector<1x128xf32>
      %346 = vector.shape_cast %345 : vector<1x128xf32> to vector<128xf32>
      %347 = vector.shape_cast %346 : vector<128xf32> to vector<1x1x128xf32>
      %348 = vector.broadcast %347 : vector<1x1x128xf32> to vector<9x16x128xf32>
      %349 = arith.mulf %342, %348 : vector<9x16x128xf32>
      %350 = arith.addf %341, %349 : vector<9x16x128xf32>
      %351 = vector.extract_strided_slice %314 {offsets = [4, 0, 0], sizes = [9, 16, 128], strides = [1, 1, 1]} : vector<14x16x128xf32> to vector<9x16x128xf32>
      %c0_i32_149 = arith.constant 0 : i32
      %c0_i32_150 = arith.constant 0 : i32
      %352 = tpu.memref_slice %arg15[%20, %c0_i32_149, %c0_i32_150] : memref<2x40x128xf32, #tpu.memory_space<vmem>> -> memref<1x40x128xf32, #tpu.memory_space<vmem>>
      %353 = tpu.memref_squeeze %352 : memref<1x40x128xf32, #tpu.memory_space<vmem>> -> memref<40x128xf32, #tpu.memory_space<vmem>>
      %c29 = arith.constant 29 : index
      %c0_151 = arith.constant 0 : index
      %354 = vector.load %353[%c29, %c0_151] : memref<40x128xf32, #tpu.memory_space<vmem>>, vector<1x128xf32>
      %355 = vector.shape_cast %354 : vector<1x128xf32> to vector<128xf32>
      %356 = vector.shape_cast %355 : vector<128xf32> to vector<1x1x128xf32>
      %357 = vector.broadcast %356 : vector<1x1x128xf32> to vector<9x16x128xf32>
      %358 = arith.mulf %351, %357 : vector<9x16x128xf32>
      %359 = arith.addf %350, %358 : vector<9x16x128xf32>
      %360 = vector.extract_strided_slice %314 {offsets = [5, 0, 0], sizes = [9, 16, 128], strides = [1, 1, 1]} : vector<14x16x128xf32> to vector<9x16x128xf32>
      %c0_i32_152 = arith.constant 0 : i32
      %c0_i32_153 = arith.constant 0 : i32
      %361 = tpu.memref_slice %arg15[%20, %c0_i32_152, %c0_i32_153] : memref<2x40x128xf32, #tpu.memory_space<vmem>> -> memref<1x40x128xf32, #tpu.memory_space<vmem>>
      %362 = tpu.memref_squeeze %361 : memref<1x40x128xf32, #tpu.memory_space<vmem>> -> memref<40x128xf32, #tpu.memory_space<vmem>>
      %c35 = arith.constant 35 : index
      %c0_154 = arith.constant 0 : index
      %363 = vector.load %362[%c35, %c0_154] : memref<40x128xf32, #tpu.memory_space<vmem>>, vector<1x128xf32>
      %364 = vector.shape_cast %363 : vector<1x128xf32> to vector<128xf32>
      %365 = vector.shape_cast %364 : vector<128xf32> to vector<1x1x128xf32>
      %366 = vector.broadcast %365 : vector<1x1x128xf32> to vector<9x16x128xf32>
      %367 = arith.mulf %360, %366 : vector<9x16x128xf32>
      %368 = arith.addf %359, %367 : vector<9x16x128xf32>
      %369 = vector.shape_cast %368 : vector<9x16x128xf32> to vector<144x128xf32>
      %370 = arith.truncf %369 : vector<144x128xf32> to vector<144x128xbf16>
      %c0_155 = arith.constant 0 : index
      %c0_156 = arith.constant 0 : index
      %371 = vector.load %arg9[%c0_155, %c0_156] : memref<128x128xbf16, #tpu.memory_space<vmem>>, vector<128x128xbf16>
      %cst_157 = arith.constant dense<0.000000e+00> : vector<144x128xf32>
      %372 = tpu.matmul %370, %371, %cst_157 {dimension_numbers = #tpu.dot_dimension_numbers<[1], [0], [0], [1], [0, 0, 1, 1], [], []>} : vector<144x128xbf16>, vector<128x128xbf16>, vector<144x128xf32> -> vector<144x128xf32>
      %c0_158 = arith.constant 0 : index
      %c0_159 = arith.constant 0 : index
      %373 = vector.load %arg10[%c0_158, %c0_159] : memref<1x128xf32, #tpu.memory_space<vmem>>, vector<1x128xf32>
      %374 = vector.shape_cast %373 : vector<1x128xf32> to vector<128xf32>
      %375 = vector.shape_cast %374 : vector<128xf32> to vector<1x128xf32>
      %376 = vector.broadcast %375 : vector<1x128xf32> to vector<144x128xf32>
      %377 = arith.mulf %372, %376 : vector<144x128xf32>
      %c0_160 = arith.constant 0 : index
      %c0_161 = arith.constant 0 : index
      %378 = vector.load %arg11[%c0_160, %c0_161] : memref<1x128xf32, #tpu.memory_space<vmem>>, vector<1x128xf32>
      %379 = vector.shape_cast %378 : vector<1x128xf32> to vector<128xf32>
      %380 = vector.shape_cast %379 : vector<128xf32> to vector<1x128xf32>
      %381 = vector.broadcast %380 : vector<1x128xf32> to vector<144x128xf32>
      %382 = arith.addf %377, %381 : vector<144x128xf32>
      %cst_162 = arith.constant 0.000000e+00 : f32
      %383 = vector.broadcast %cst_162 : f32 to vector<144x128xf32>
      %384 = arith.maximumf %382, %383 : vector<144x128xf32>
      %385 = arith.truncf %384 : vector<144x128xf32> to vector<144x128xbf16>
      %c0_163 = arith.constant 0 : index
      %c0_164 = arith.constant 0 : index
      %386 = vector.load %arg12[%c0_163, %c0_164] : memref<128x128xbf16, #tpu.memory_space<vmem>>, vector<128x128xbf16>
      %cst_165 = arith.constant dense<0.000000e+00> : vector<144x128xf32>
      %387 = tpu.matmul %385, %386, %cst_165 {dimension_numbers = #tpu.dot_dimension_numbers<[1], [0], [0], [1], [0, 0, 1, 1], [], []>} : vector<144x128xbf16>, vector<128x128xbf16>, vector<144x128xf32> -> vector<144x128xf32>
      %c0_166 = arith.constant 0 : index
      %c0_167 = arith.constant 0 : index
      %388 = vector.load %arg13[%c0_166, %c0_167] : memref<1x128xf32, #tpu.memory_space<vmem>>, vector<1x128xf32>
      %389 = vector.shape_cast %388 : vector<1x128xf32> to vector<128xf32>
      %390 = vector.shape_cast %389 : vector<128xf32> to vector<1x128xf32>
      %391 = vector.broadcast %390 : vector<1x128xf32> to vector<144x128xf32>
      %392 = arith.addf %387, %391 : vector<144x128xf32>
      %393 = vector.shape_cast %392 : vector<144x128xf32> to vector<9x16x128xf32>
      %394 = arith.index_cast %20 : i32 to index
      %c0_168 = arith.constant 0 : index
      %c0_169 = arith.constant 0 : index
      %c0_170 = arith.constant 0 : index
      %395 = vector.load %arg14[%394, %c0_168, %c0_169, %c0_170] : memref<2x9x16x128xf32, #tpu.memory_space<vmem>>, vector<1x9x16x128xf32>
      %396 = vector.shape_cast %395 : vector<1x9x16x128xf32> to vector<9x16x128xf32>
      %397 = vector.shape_cast %393 : vector<9x16x128xf32> to vector<1x9x16x128xf32>
      tpu.vector_store %arg14[%394, %c0_168, %c0_169, %c0_170], %397 {strides = array<i32>} : memref<2x9x16x128xf32, #tpu.memory_space<vmem>>, vector<1x9x16x128xf32>,
    }
    %c2_i32_12 = arith.constant 2 : i32
    return
  }
  func.func @transform_0(%arg0: i32) -> (i32, i32, i32) {
    %c0_i32 = arith.constant 0 : i32
    %c0_i32_0 = arith.constant 0 : i32
    %c0_i32_1 = arith.constant 0 : i32
    return %arg0, %c0_i32, %c0_i32_0 : i32, i32, i32
  }
  func.func @transform_1(%arg0: i32) -> (i32, i32, i32) {
    %c0_i32 = arith.constant 0 : i32
    %c0_i32_0 = arith.constant 0 : i32
    %c0_i32_1 = arith.constant 0 : i32
    return %arg0, %c0_i32, %c0_i32_0 : i32, i32, i32
  }
  func.func @transform_2(%arg0: i32) -> (i32, i32) {
    %c0_i32 = arith.constant 0 : i32
    %c0_i32_0 = arith.constant 0 : i32
    %c0_i32_1 = arith.constant 0 : i32
    return %c0_i32, %c0_i32_0 : i32, i32
  }
  func.func @transform_3(%arg0: i32) -> (i32, i32) {
    %c0_i32 = arith.constant 0 : i32
    %c0_i32_0 = arith.constant 0 : i32
    %c0_i32_1 = arith.constant 0 : i32
    return %c0_i32, %c0_i32_0 : i32, i32
  }
  func.func @transform_4(%arg0: i32) -> (i32, i32) {
    %c0_i32 = arith.constant 0 : i32
    %c0_i32_0 = arith.constant 0 : i32
    %c0_i32_1 = arith.constant 0 : i32
    return %c0_i32, %c0_i32_0 : i32, i32
  }
  func.func @transform_5(%arg0: i32) -> (i32, i32) {
    %c0_i32 = arith.constant 0 : i32
    %c0_i32_0 = arith.constant 0 : i32
    %c0_i32_1 = arith.constant 0 : i32
    return %c0_i32, %c0_i32_0 : i32, i32
  }
  func.func @transform_6(%arg0: i32) -> (i32, i32) {
    %c0_i32 = arith.constant 0 : i32
    %c0_i32_0 = arith.constant 0 : i32
    %c0_i32_1 = arith.constant 0 : i32
    return %c0_i32, %c0_i32_0 : i32, i32
  }
  func.func @transform_7(%arg0: i32) -> (i32, i32) {
    %c0_i32 = arith.constant 0 : i32
    %c0_i32_0 = arith.constant 0 : i32
    %c0_i32_1 = arith.constant 0 : i32
    return %c0_i32, %c0_i32_0 : i32, i32
  }
  func.func @transform_8(%arg0: i32) -> (i32, i32) {
    %c0_i32 = arith.constant 0 : i32
    %c0_i32_0 = arith.constant 0 : i32
    %c0_i32_1 = arith.constant 0 : i32
    return %c0_i32, %c0_i32_0 : i32, i32
  }
  func.func @transform_9(%arg0: i32) -> (i32, i32) {
    %c0_i32 = arith.constant 0 : i32
    %c0_i32_0 = arith.constant 0 : i32
    %c0_i32_1 = arith.constant 0 : i32
    return %c0_i32, %c0_i32_0 : i32, i32
  }
  func.func @transform_10(%arg0: i32) -> (i32, i32) {
    %c0_i32 = arith.constant 0 : i32
    %c0_i32_0 = arith.constant 0 : i32
    %c0_i32_1 = arith.constant 0 : i32
    return %c0_i32, %c0_i32_0 : i32, i32
  }
  func.func @transform_11(%arg0: i32) -> (i32, i32) {
    %c0_i32 = arith.constant 0 : i32
    %c0_i32_0 = arith.constant 0 : i32
    %c0_i32_1 = arith.constant 0 : i32
    return %c0_i32, %c0_i32_0 : i32, i32
  }
  func.func @transform_12(%arg0: i32) -> (i32, i32) {
    %c0_i32 = arith.constant 0 : i32
    %c0_i32_0 = arith.constant 0 : i32
    %c0_i32_1 = arith.constant 0 : i32
    return %c0_i32, %c0_i32_0 : i32, i32
  }
  func.func @transform_13(%arg0: i32) -> (i32, i32, i32, i32) {
    %c0_i32 = arith.constant 0 : i32
    %c0_i32_0 = arith.constant 0 : i32
    %c0_i32_1 = arith.constant 0 : i32
    %c0_i32_2 = arith.constant 0 : i32
    return %arg0, %c0_i32, %c0_i32_0, %c0_i32_1 : i32, i32, i32, i32
  }
}

</mosaic_0001>

<bundles_post_ra>
// kernel: depth_corr_forward.1
= control target key start
LH: loop header
LB: loop body
LE: loop exit
PB: predicated region body
PF: predicated region fallthrough
CT: control target
= control target key end

     0   :  { %v3578_v0 = vmov 0.0   ;;  %vm3579_vm0 = vmmov 0   ;;  %s6582_s1 = inlined_call_operand.vmem [shape: bf16[2,336,128], index: 1, kind: input, shape index: {}]   ;;  %s6583_s5 = inlined_call_operand.vmem [shape: bf16[128,128], index: 5, kind: input, shape index: {}]   ;;  %s6584_s6 = inlined_call_operand.vmem [shape: f32[1,128], index: 6, kind: input, shape index: {}]   ;;  %s6585_s7 = inlined_call_operand.vmem [shape: f32[1,128], index: 7, kind: input, shape index: {}]   ;;  %s6586_s8 = inlined_call_operand.vmem [shape: bf16[128,128], index: 8, kind: input, shape index: {}]   ;;  %s6587_s9 = inlined_call_operand.vmem [shape: f32[1,128], index: 9, kind: input, shape index: {}]   ;;  %s6588_s10 = inlined_call_operand.vmem [shape: f32[1,128], index: 10, kind: input, shape index: {}]   ;;  %s6589_s11 = inlined_call_operand.vmem [shape: bf16[128,128], index: 11, kind: input, shape index: {}]   ;;  %s6590_s12 = inlined_call_operand.vmem [shape: f32[1,128], index: 12, kind: input, shape index: {}]   ;;  %s6591_s13 = inlined_call_operand.vmem [shape: f32[2,9,16,128], index: 13, kind: output, shape index: {}]   ;;  %s6592_s2 = inlined_call_operand.vmem [shape: bf16[128,128], index: 2, kind: input, shape index: {}]   ;;  %s6593_s0 = inlined_call_operand.vmem [shape: bf16[2,40,128], index: 0, kind: input, shape index: {}]   ;;  %s6594_s3 = inlined_call_operand.vmem [shape: f32[1,128], index: 3, kind: input, shape index: {}]   ;;  %s6595_s4 = inlined_call_operand.vmem [shape: f32[1,128], index: 4, kind: input, shape index: {}]  }
   0x1   :  { %3173 = vmatprep.subr.bf16.mxu0 %v3578_v0  ;;  %v3441_v1 = vld [vmem:[%s6592_s2] sm:$0xff]   ;;  %3413 = vmatprep.subr.bf16.mxu1 %v3578_v0  ;;  %v3442_v2 = vld [vmem:[%s6592_s2 + $0x8] sm:$0xff]   ;;  %v3443_v3 = vld [vmem:[%s6592_s2 + $0x10] sm:$0xff]  }
   0x2   :  { %3189 = vmatprep.mubr.msk.bf16.mxu0 %vm3579_vm0, %v3578_v0  ;;  %3201 = vmatprep.mubr.msk.bf16.mxu1 %vm3579_vm0, %v3578_v0  ;;  %v3444_v4 = vld [vmem:[%s6592_s2 + $0x18] sm:$0xff]   ;;  %v3445_v5 = vld [vmem:[%s6592_s2 + $0x20] sm:$0xff]   ;;  %v3446_v6 = vld [vmem:[%s6592_s2 + $0x28] sm:$0xff]  }
   0x3   :  { %3174 = vmatpush3.bf16.msra.mxu0 %v3441_v1  ;;  %3421 = vmatpush3.bf16.msra.mxu1 %v3441_v1  ;;  %v3447_v7 = vld [vmem:[%s6592_s2 + $0x30] sm:$0xff]   ;;  %v3448_v8 = vld [vmem:[%s6592_s2 + $0x38] sm:$0xff]   ;;  %v3449_v9 = vld [vmem:[%s6593_s0] sm:$0xff]  }
   0x4   :  { %3175 = vmatprep.subr.bf16.mxu0 %v3578_v0  ;;  %3414 = vmatprep.subr.bf16.mxu1 %v3578_v0  ;;  %v3450_v10 = vld [vmem:[%s6593_s0 + $0x18] sm:$0xff]   ;;  %v3451_v11 = vld [vmem:[%s6593_s0 + $0x8] sm:$0xff]   ;;  %v3452_v12 = vld [vmem:[%s6593_s0 + $0x20] sm:$0xff]  }
   0x5   :  { %v3453_v13 = vld [vmem:[%s6593_s0 + $0x10] sm:$0xff]   ;;  %v3007_v14 = vld [vmem:[%s6594_s3] ss:$0 sm:$0xff]  ;;  %s3702_s0 = smov 0  }
   0x6   :  { %v3008_v16 = vld [vmem:[%s6595_s4] ss:$0 sm:$0xff] }
   0x7   :  { %3176 = vmatpush3.bf16.msra.mxu0 %v3442_v2  ;;  %3422 = vmatpush3.bf16.msra.mxu1 %v3442_v2 }
   0x8   :  { %3177 = vmatprep.subr.bf16.mxu0 %v3578_v0  ;;  %3415 = vmatprep.subr.bf16.mxu1 %v3578_v0 }
   0xb   :  { %3178 = vmatpush3.bf16.msra.mxu0 %v3443_v3  ;;  %3423 = vmatpush3.bf16.msra.mxu1 %v3443_v3 }
   0xc   :  { %3179 = vmatprep.subr.bf16.mxu0 %v3578_v0  ;;  %3416 = vmatprep.subr.bf16.mxu1 %v3578_v0 }
   0xf   :  { %3180 = vmatpush3.bf16.msra.mxu0 %v3444_v4  ;;  %3424 = vmatpush3.bf16.msra.mxu1 %v3444_v4 }
  0x10   :  { %3181 = vmatprep.subr.bf16.mxu0 %v3578_v0  ;;  %3417 = vmatprep.subr.bf16.mxu1 %v3578_v0 }
  0x13   :  { %3182 = vmatpush3.bf16.msra.mxu0 %v3445_v5  ;;  %3425 = vmatpush3.bf16.msra.mxu1 %v3445_v5 }
  0x14   :  { %3183 = vmatprep.subr.bf16.mxu0 %v3578_v0  ;;  %3418 = vmatprep.subr.bf16.mxu1 %v3578_v0 }
  0x17   :  { %3184 = vmatpush3.bf16.msra.mxu0 %v3446_v6  ;;  %3426 = vmatpush3.bf16.msra.mxu1 %v3446_v6 }
  0x18   :  { %3185 = vmatprep.subr.bf16.mxu0 %v3578_v0  ;;  %3419 = vmatprep.subr.bf16.mxu1 %v3578_v0 }
  0x1b   :  { %3186 = vmatpush3.bf16.msra.mxu0 %v3447_v7  ;;  %3427 = vmatpush3.bf16.msra.mxu1 %v3447_v7 }
  0x1c   :  { %3187 = vmatprep.subr.bf16.mxu0 %v3578_v0  ;;  %3420 = vmatprep.subr.bf16.mxu1 %v3578_v0 }
  0x1f   :  { %3188 = vmatpush3.bf16.msra.mxu0 %v3448_v8  ;;  %3428 = vmatpush3.bf16.msra.mxu1 %v3448_v8 }
  0x22   :  { %3190 = vmatmul.mubr.bf16.vlgmr.msra.gmra.mrb[0].mxu0 %v3449_v9  ;;  %3202 = vmatmul.mubr.bf16.vlgmr.msra.gmra.mrb[0].mxu1 %v3450_v10 }
  0x23   :  { %3193 = vmatprep.mubr.msk.bf16.mxu0 %vm3579_vm0, %v3578_v0  ;;  %3205 = vmatprep.mubr.msk.bf16.mxu1 %vm3579_vm0, %v3578_v0 }
  0x2a   :  { %3194 = vmatmul.mubr.bf16.gmra.mrb[4].mxu0 %v3451_v11  ;;  %3206 = vmatmul.mubr.bf16.gmra.mrb[4].mxu1 %v3452_v12 }
  0x2b   :  { %3197 = vmatprep.mubr.msk.bf16.mxu0 %vm3579_vm0, %v3578_v0 }
  0x32   :  { %3198 = vmatmul.mubr.bf16.gmra.mrb[8].mxu0 %v3453_v13 }
  0xf5   :  { %v183_v15 = vpop.f32.mrb[0].mxu0  ;;  %v207_v17 = vpop.f32.mrb[0].mxu1 }
  0xf6   :  { %v229_v18 = vmul.f32 %v3007_v14, %v183_v15  ;;  %v3191_v19 = vpop.f32.mrb[1].mxu0  ;;  %v235_v20 = vmul.f32 %v3007_v14, %v207_v17  ;;  %v3203_v21 = vpop.f32.mrb[1].mxu1 }
  0xf7   :  { %v186_v22 = vpop.f32.mrb[2].mxu0  ;;  %v210_v23 = vpop.f32.mrb[2].mxu1 }
  0xf8   :  { %v246_v24 = vadd.f32 %v3008_v16, %v229_v18  ;;  %v230_v25 = vmul.f32 %v3007_v14, %v186_v22  ;;  %v3192_v26 = vpop.f32.mrb[3].mxu0  ;;  %v252_v27 = vadd.f32 %v3008_v16, %v235_v20  ;;  %v236_v28 = vmul.f32 %v3007_v14, %v210_v23  ;;  %v3204_v29 = vpop.f32.mrb[3].mxu1 }
  0xfa   :  { %v256_v30 = vmax.f32 %v246_v24, 0.0  ;;  %v247_v31 = vadd.f32 %v3008_v16, %v230_v25  ;;  %v262_v32 = vmax.f32 %v252_v27, 0.0  ;;  %v253_v33 = vadd.f32 %v3008_v16, %v236_v28 }
  0xfc   :  { %266 = vst [vmem:[#allocation2] sm:$0xff] %v256_v30  ;;  %v257_v34 = vmax.f32 %v247_v31, 0.0  ;;  %272 = vst [vmem:[#allocation2 + $0x30] sm:$0xff] %v262_v32  ;;  %v263_v35 = vmax.f32 %v253_v33, 0.0 }
  0xfd   :  { %v191_v36 = vpop.f32.mrb[4].mxu0  ;;  %v215_v37 = vpop.f32.mrb[4].mxu1 }
  0xfe   :  { %267 = vst [vmem:[#allocation2 + $0x8] sm:$0xff] %v257_v34  ;;  %273 = vst [vmem:[#allocation2 + $0x38] sm:$0xff] %v263_v35  ;;  %v231_v38 = vmul.f32 %v3007_v14, %v191_v36  ;;  %v3195_v39 = vpop.f32.mrb[5].mxu0  ;;  %v237_v40 = vmul.f32 %v3007_v14, %v215_v37  ;;  %v3207_v41 = vpop.f32.mrb[5].mxu1 }
  0xff   :  { %v194_v42 = vpop.f32.mrb[6].mxu0  ;;  %v218_v43 = vpop.f32.mrb[6].mxu1 }
 0x100   :  { %v248_v44 = vadd.f32 %v3008_v16, %v231_v38  ;;  %v232_v45 = vmul.f32 %v3007_v14, %v194_v42  ;;  %v3196_v46 = vpop.f32.mrb[7].mxu0  ;;  %v254_v47 = vadd.f32 %v3008_v16, %v237_v40  ;;  %v238_v48 = vmul.f32 %v3007_v14, %v218_v43  ;;  %v3208_v49 = vpop.f32.mrb[7].mxu1 }
 0x102   :  { %v258_v50 = vmax.f32 %v248_v44, 0.0  ;;  %v249_v51 = vadd.f32 %v3008_v16, %v232_v45  ;;  %v264_v52 = vmax.f32 %v254_v47, 0.0  ;;  %v255_v53 = vadd.f32 %v3008_v16, %v238_v48 }
 0x104   :  { %268 = vst [vmem:[#allocation2 + $0x10] sm:$0xff] %v258_v50  ;;  %v259_v54 = vmax.f32 %v249_v51, 0.0  ;;  %274 = vst [vmem:[#allocation2 + $0x40] sm:$0xff] %v264_v52  ;;  %v265_v55 = vmax.f32 %v255_v53, 0.0 }
 0x105   :  { %v199_v56 = vpop.f32.mrb[8].mxu0 }
 0x106   :  { %269 = vst [vmem:[#allocation2 + $0x18] sm:$0xff] %v259_v54  ;;  %275 = vst [vmem:[#allocation2 + $0x48] sm:$0xff] %v265_v55  ;;  %v233_v57 = vmul.f32 %v3007_v14, %v199_v56  ;;  %v3199_v58 = vpop.f32.mrb[9].mxu0 }
 0x107   :  { %v202_v59 = vpop.f32.mrb[10].mxu0 }
 0x108   :  { %v250_v60 = vadd.f32 %v3008_v16, %v233_v57  ;;  %v234_v61 = vmul.f32 %v3007_v14, %v202_v59  ;;  %v3200_v62 = vpop.f32.mrb[11].mxu0 }
 0x10a   :  { %v260_v63 = vmax.f32 %v250_v60, 0.0  ;;  %v251_v0 = vadd.f32 %v3008_v16, %v234_v61 }
 0x10c   :  { %270 = vst [vmem:[#allocation2 + $0x20] sm:$0xff] %v260_v63  ;;  %v261_v1 = vmax.f32 %v251_v0, 0.0 }
 0x10e   :  { %271 = vst [vmem:[#allocation2 + $0x28] sm:$0xff] %v261_v1 }
 0x10f LB: > { %v3454_v2 = vld [vmem:[%s6583_s5] sm:$0xff]   ;;  %v6596_v3 = vmov 0.0   ;;  %v3455_v4 = vld [vmem:[%s6583_s5 + $0x8] sm:$0xff]   ;;  %vm3581_vm1 = vmmov 0   ;;  %s3096_s22 = smul.u32 168, %s3576_s0  ;;  %v3456_v5 = vld [vmem:[%s6583_s5 + $0x10] sm:$0xff]   ;;  %s3576_s0 = sphi %s3702_s0, %s281_s0  }
 0x110   : > { %3209 = vmatprep.subr.bf16.mxu0 %v6596_v3  ;;  %3309 = vmatprep.subr.bf16.mxu1 %v6596_v3  ;;  %v3457_v6 = vld [vmem:[%s6583_s5 + $0x18] sm:$0xff]   ;;  %v3458_v7 = vld [vmem:[%s6583_s5 + $0x20] sm:$0xff]   ;;  %v3459_v8 = vld [vmem:[%s6583_s5 + $0x28] sm:$0xff]   ;;  %s2959_s28 = smul.u32 144, %s3576_s0 }
 0x111   : > { %3210 = vmatpush3.bf16.msra.mxu0 %v3454_v2  ;;  %3225 = vmatprep.mubr.msk.bf16.mxu0 %vm3581_vm1, %v6596_v3  ;;  %s3728_s27 = scalar_lea.vmem %s6582_s1, %s3096_s22  ;;  %v3460_v9 = vld [vmem:[%s6583_s5 + $0x30] sm:$0xff]   ;;  %v3461_v10 = vld [vmem:[%s6583_s5 + $0x38] sm:$0xff]   ;;  %v3814_v32 = vld [vmem:[%s6584_s6] ss:$0 sm:$0xff]  ;;  %s928_s22 = smul.u32 40, %s3576_s0 }
 0x112   : > { %3211 = vmatprep.subr.bf16.mxu0 %v6596_v3  ;;  %3325 = vmatprep.mubr.msk.bf16.mxu1 %vm3581_vm1, %v6596_v3  ;;  %v3462_v11 = vld [vmem:[%s3728_s27] sm:$0xff]   ;;  %v3463_v12 = vld [vmem:[%s3728_s27 + $0x8] sm:$0xff]   ;;  %v3464_v13 = vld [vmem:[%s3728_s27 + $0x10] sm:$0xff]   ;;  %s6541_s16 = scalar_lea.vmem %s6591_s13, %s2959_s28  ;;  %s281_s0 = sadd.s32 1, %s3576_s0  }
 0x113   : > { %v3465_v14 = vld [vmem:[%s3728_s27 + $0x18] sm:$0xff]   ;;  %v3466_v15 = vld [vmem:[%s3728_s27 + $0x20] sm:$0xff]   ;;  %v3467_v16 = vld [vmem:[%s3728_s27 + $0x28] sm:$0xff]   ;;  %p278_p0 = scmp.ge.s32.totalorder %s281_s0, 2  }
 0x114   : > { %v3468_v17 = vld [vmem:[%s3728_s27 + $0x30] sm:$0xff]   ;;  %v3469_v18 = vld [vmem:[%s3728_s27 + $0x38] sm:$0xff]   ;;  %v3470_v19 = vld [vmem:[%s3728_s27 + $0x40] sm:$0xff]  }
 0x115   : > { %3212 = vmatpush3.bf16.msra.mxu0 %v3455_v4  ;;  %v3471_v20 = vld [vmem:[%s3728_s27 + $0x48] sm:$0xff]   ;;  %v3472_v21 = vld [vmem:[%s3728_s27 + $0x50] sm:$0xff]   ;;  %v3473_v22 = vld [vmem:[%s3728_s27 + $0x58] sm:$0xff]  }
 0x116   : > { %3213 = vmatprep.subr.bf16.mxu0 %v6596_v3  ;;  %v3474_v23 = vld [vmem:[%s3728_s27 + $0x60] sm:$0xff]   ;;  %v3475_v24 = vld [vmem:[%s3728_s27 + $0x68] sm:$0xff]   ;;  %v3476_v25 = vld [vmem:[%s3728_s27 + $0x70] sm:$0xff]  }
 0x117   : > { %v3477_v26 = vld [vmem:[%s3728_s27 + $0x78] sm:$0xff]   ;;  %v3478_v27 = vld [vmem:[%s3728_s27 + $0x80] sm:$0xff]   ;;  %v3479_v28 = vld [vmem:[%s3728_s27 + $0x88] sm:$0xff]  }
 0x118   : > { %v3480_v29 = vld [vmem:[%s3728_s27 + $0x90] sm:$0xff]   ;;  %v3481_v30 = vld [vmem:[%s3728_s27 + $0x98] sm:$0xff]   ;;  %v3482_v31 = vld [vmem:[%s3728_s27 + $0xa0] sm:$0xff]   ;;  %s3837_s27 = scalar_lea.vmem [#allocation2], %s928_s22 }
 0x119   : > { %3214 = vmatpush3.bf16.msra.mxu0 %v3456_v5  ;;  %v3819_v34 = vld [vmem:[%s6585_s7] ss:$0 sm:$0xff]  ;;  %v3484_v52 = vld [vmem:[%s6586_s8 + $0x8] sm:$0xff]   ;;  %v3843_v57 = vld [vmem:[%s3837_s27 + $0x6] ss:$0 sm:$0xff] }
 0x11a   : > { %3215 = vmatprep.subr.bf16.mxu0 %v6596_v3  ;;  %v3483_v45 = vld [vmem:[%s6586_s8] sm:$0xff]  }
 0x11b   : > { %3310 = vmatpush3.bf16.msra.mxu1 %v3483_v45  ;;  %v3840_v55 = vld [vmem:[%s3837_s27] ss:$0 sm:$0xff] }
 0x11c   : > { %3311 = vmatprep.subr.bf16.mxu1 %v6596_v3 }
 0x11d   : > { %3216 = vmatpush3.bf16.msra.mxu0 %v3457_v6 }
 0x11e   : > { %3217 = vmatprep.subr.bf16.mxu0 %v6596_v3 }
 0x11f   : > { %3312 = vmatpush3.bf16.msra.mxu1 %v3484_v52 }
 0x120   : > { %3313 = vmatprep.subr.bf16.mxu1 %v6596_v3 }
 0x121   : > { %3218 = vmatpush3.bf16.msra.mxu0 %v3458_v7 }
 0x122   : > { %3219 = vmatprep.subr.bf16.mxu0 %v6596_v3 }
 0x125   : > { %3220 = vmatpush3.bf16.msra.mxu0 %v3459_v8 }
 0x126   : > { %3221 = vmatprep.subr.bf16.mxu0 %v6596_v3 }
 0x129   : > { %3222 = vmatpush3.bf16.msra.mxu0 %v3460_v9 }
 0x12a   : > { %3223 = vmatprep.subr.bf16.mxu0 %v6596_v3 }
 0x12d   : > { %3224 = vmatpush3.bf16.msra.mxu0 %v3461_v10 }
 0x130   : > { %3226 = vmatmul.mubr.bf16.vlgmr.msra.gmra.mrb[0].mxu0 %v3462_v11 }
 0x131   : > { %3229 = vmatprep.mubr.msk.bf16.mxu0 %vm3581_vm1, %v6596_v3 }
 0x138   : > { %3230 = vmatmul.mubr.bf16.gmra.mrb[4].mxu0 %v3463_v12 }
 0x139   : > { %3233 = vmatprep.mubr.msk.bf16.mxu0 %vm3581_vm1, %v6596_v3 }
 0x140   : > { %3234 = vmatmul.mubr.bf16.gmra.mrb[8].mxu0 %v3464_v13 }
 0x141   : > { %3237 = vmatprep.mubr.msk.bf16.mxu0 %vm3581_vm1, %v6596_v3 }
 0x148   : > { %3238 = vmatmul.mubr.bf16.gmra.mrb[12].mxu0 %v3465_v14 }
 0x149   : > { %3241 = vmatprep.mubr.msk.bf16.mxu0 %vm3581_vm1, %v6596_v3 }
 0x150   : > { %3242 = vmatmul.mubr.bf16.gmra.mrb[16].mxu0 %v3466_v15 }
 0x151   : > { %3245 = vmatprep.mubr.msk.bf16.mxu0 %vm3581_vm1, %v6596_v3 }
 0x158   : > { %3246 = vmatmul.mubr.bf16.gmra.mrb[20].mxu0 %v3467_v16 }
 0x159   : > { %3249 = vmatprep.mubr.msk.bf16.mxu0 %vm3581_vm1, %v6596_v3 }
 0x160   : > { %3250 = vmatmul.mubr.bf16.gmra.mrb[24].mxu0 %v3468_v17 }
 0x161   : > { %3253 = vmatprep.mubr.msk.bf16.mxu0 %vm3581_vm1, %v6596_v3 }
 0x168   : > { %3254 = vmatmul.mubr.bf16.gmra.mrb[28].mxu0 %v3469_v18  ;;  %v3858_v18 = vld [vmem:[%s3837_s27 + $0xc] ss:$0 sm:$0xff] }
 0x169   : > { %3257 = vmatprep.mubr.msk.bf16.mxu0 %vm3581_vm1, %v6596_v3 }
 0x170   : > { %3258 = vmatmul.mubr.bf16.gmra.mrb[32].mxu0 %v3470_v19 }
 0x171   : > { %3261 = vmatprep.mubr.msk.bf16.mxu0 %vm3581_vm1, %v6596_v3 }
 0x178   : > { %3262 = vmatmul.mubr.bf16.gmra.mrb[36].mxu0 %v3471_v20 }
 0x179   : > { %3265 = vmatprep.mubr.msk.bf16.mxu0 %vm3581_vm1, %v6596_v3 }
 0x180   : > { %3266 = vmatmul.mubr.bf16.gmra.mrb[40].mxu0 %v3472_v21 }
 0x181   : > { %3269 = vmatprep.mubr.msk.bf16.mxu0 %vm3581_vm1, %v6596_v3 }
 0x188   : > { %3270 = vmatmul.mubr.bf16.gmra.mrb[44].mxu0 %v3473_v22 }
 0x189   : > { %3273 = vmatprep.mubr.msk.bf16.mxu0 %vm3581_vm1, %v6596_v3 }
 0x190   : > { %3274 = vmatmul.mubr.bf16.gmra.mrb[48].mxu0 %v3474_v23 }
 0x191   : > { %3277 = vmatprep.mubr.msk.bf16.mxu0 %vm3581_vm1, %v6596_v3 }
 0x198   : > { %3278 = vmatmul.mubr.bf16.gmra.mrb[52].mxu0 %v3475_v24 }
 0x199   : > { %3281 = vmatprep.mubr.msk.bf16.mxu0 %vm3581_vm1, %v6596_v3 }
 0x1a0   : > { %3282 = vmatmul.mubr.bf16.gmra.mrb[56].mxu0 %v3476_v25 }
 0x1a1   : > { %3285 = vmatprep.mubr.msk.bf16.mxu0 %vm3581_vm1, %v6596_v3 }
 0x1a8   : > { %3286 = vmatmul.mubr.bf16.gmra.mrb[60].mxu0 %v3477_v26 }
 0x1a9   : > { %3289 = vmatprep.mubr.msk.bf16.mxu0 %vm3581_vm1, %v6596_v3 }
 0x1b0   : > { %3290 = vmatmul.mubr.bf16.gmra.mrb[64].mxu0 %v3478_v27  ;;  %v3485_v27 = vld [vmem:[%s6586_s8 + $0x10] sm:$0xff]  }
 0x1b1   : > { %3293 = vmatprep.mubr.msk.bf16.mxu0 %vm3581_vm1, %v6596_v3  ;;  %3314 = vmatpush3.bf16.msra.mxu1 %v3485_v27 }
 0x1b2   : > { %3315 = vmatprep.subr.bf16.mxu1 %v6596_v3 }
 0x1b8   : > { %3294 = vmatmul.mubr.bf16.gmra.mrb[68].mxu0 %v3479_v28 }
 0x1b9   : > { %3297 = vmatprep.mubr.msk.bf16.mxu0 %vm3581_vm1, %v6596_v3 }
 0x1c0   : > { %3298 = vmatmul.mubr.bf16.gmra.mrb[72].mxu0 %v3480_v29 }
 0x1c1   : > { %3301 = vmatprep.mubr.msk.bf16.mxu0 %vm3581_vm1, %v6596_v3 }
 0x1c8   : > { %3302 = vmatmul.mubr.bf16.gmra.mrb[76].mxu0 %v3481_v30 }
 0x1c9   : > { %3305 = vmatprep.mubr.msk.bf16.mxu0 %vm3581_vm1, %v6596_v3 }
 0x1d0   : > { %3306 = vmatmul.mubr.bf16.gmra.mrb[80].mxu0 %v3482_v31 }
 0x203   : > { %v551_v33 = vpop.f32.mrb[0].mxu0 }
 0x204   : > { %v725_v35 = vmul.f32 %v3814_v32, %v551_v33  ;;  %v3227_v36 = vpop.f32.mrb[1].mxu0 }
 0x205   : > { %v554_v37 = vpop.f32.mrb[2].mxu0  ;;  %v3486_v36 = vld [vmem:[%s6586_s8 + $0x18] sm:$0xff]  }
 0x206   : > { %v774_v38 = vadd.f32 %v3819_v34, %v725_v35  ;;  %v726_v39 = vmul.f32 %v3814_v32, %v554_v37  ;;  %v3228_v40 = vpop.f32.mrb[3].mxu0  ;;  %v3879_v37 = vld [vmem:[%s3837_s27 + $0x1] ss:$0 sm:$0xff]  ;;  %3316 = vmatpush3.bf16.msra.mxu1 %v3486_v36 }
 0x207   : > { %3317 = vmatprep.subr.bf16.mxu1 %v6596_v3 }
 0x208   : > { %v816_v41 = vmax.f32 %v774_v38, 0.0  ;;  %v775_v42 = vadd.f32 %v3819_v34, %v726_v39 }
 0x20a   : > { %858 = vst [vmem:[#allocation3] sm:$0xff] %v816_v41  ;;  %v817_v43 = vmax.f32 %v775_v42, 0.0  ;;  %v935_v60 = vmul.f32 %v3840_v55, %v816_v41  ;;  %v3887_v41 = vld [vmem:[%s3837_s27 + $0x2] ss:$0 sm:$0xff]  ;;  %v3890_v42 = vld [vmem:[%s3837_s27 + $0x3] ss:$0 sm:$0xff] }
 0x20b   : > { %v559_v44 = vpop.f32.mrb[4].mxu0 }
 0x20c   : > { %859 = vst [vmem:[#allocation3 + $0x8] sm:$0xff] %v817_v43  ;;  %v727_v46 = vmul.f32 %v3814_v32, %v559_v44  ;;  %v3231_v47 = vpop.f32.mrb[5].mxu0  ;;  %v936_v8 = vmul.f32 %v3840_v55, %v817_v43  ;;  %v3895_v44 = vld [vmem:[%s3837_s27 + $0x4] ss:$0 sm:$0xff] }
 0x20d   : > { %v562_v48 = vpop.f32.mrb[6].mxu0 }
 0x20e   : > { %v776_v49 = vadd.f32 %v3819_v34, %v727_v46  ;;  %v728_v50 = vmul.f32 %v3814_v32, %v562_v48  ;;  %v3232_v51 = vpop.f32.mrb[7].mxu0 }
 0x210   : > { %v818_v53 = vmax.f32 %v776_v49, 0.0  ;;  %v777_v54 = vadd.f32 %v3819_v34, %v728_v50  ;;  %v3071_v50 = vld [vmem:[%s3837_s27 + $0x5] ss:$0 sm:$0xff] }
 0x212   : > { %860 = vst [vmem:[#allocation3 + $0x10] sm:$0xff] %v818_v53  ;;  %v819_v56 = vmax.f32 %v777_v54, 0.0 }
 0x213   : > { %v567_v58 = vpop.f32.mrb[8].mxu0  ;;  %v1158_v45 = vld [vmem:[#allocation3 + $0x1] sm:$0xff] }
 0x214   : > { %861 = vst [vmem:[#allocation3 + $0x18] sm:$0xff] %v819_v56  ;;  %v3235_v59 = vpop.f32.mrb[9].mxu0  ;;  %v958_v61 = vmul.f32 %v3843_v57, %v819_v56  ;;  %v729_v62 = vmul.f32 %v3814_v32, %v567_v58  ;;  %v937_v25 = vmul.f32 %v3840_v55, %v819_v56  ;;  %v1432_v46 = vld [vmem:[#allocation3 + $0x2] sm:$0xff] }
 0x215   : > { %v570_v63 = vpop.f32.mrb[10].mxu0  ;;  %v1706_v51 = vld [vmem:[#allocation3 + $0x3] sm:$0xff] }
 0x216   : > { %v730_v0 = vmul.f32 %v3814_v32, %v570_v63  ;;  %v3236_v1 = vpop.f32.mrb[11].mxu0  ;;  %v976_v2 = vadd.f32 %v958_v61, %v935_v60  ;;  %v778_v4 = vadd.f32 %v3819_v34, %v729_v62  ;;  %v1980_v52 = vld [vmem:[#allocation3 + $0x4] sm:$0xff]  ;;  %v3906_v60 = vmul.f32 %v3879_v37, %v1158_v45  ;;  %v3909_v62 = vld [vmem:[%s3837_s27 + $0x12] ss:$0 sm:$0xff] }
 0x217   : > { %v2254_v53 = vld [vmem:[#allocation3 + $0x5] sm:$0xff]  ;;  %v3915_v1 = vmul.f32 %v3890_v42, %v1706_v51 }
 0x218   : > { %v779_v5 = vadd.f32 %v3819_v34, %v730_v0  ;;  %v820_v6 = vmax.f32 %v778_v4, 0.0  ;;  %v3912_v0 = vmul.f32 %v3887_v41, %v1432_v46 }
 0x219   : > { %v1159_v54 = vld [vmem:[#allocation3 + $0x9] sm:$0xff]  ;;  %6743 = vst [vmem:[#allocation5_spill] sm:$0xff] %v3915_v1 }
 0x21a   : > { %v821_v7 = vmax.f32 %v779_v5, 0.0  ;;  %862 = vst [vmem:[#allocation3 + $0x20] sm:$0xff] %v820_v6  ;;  %v959_v9 = vmul.f32 %v3843_v57, %v820_v6  ;;  %v938_v29 = vmul.f32 %v3840_v55, %v820_v6  ;;  %v1433_v61 = vld [vmem:[#allocation3 + $0xa] sm:$0xff]  ;;  %6742 = vst [vmem:[#allocation4_spill] sm:$0xff] %v3912_v0  ;;  %v3919_v6 = vmul.f32 %v3895_v44, %v1980_v52  ;;  %v3072_v52 = vld [vmem:[%s3837_s27 + $0xb] ss:$0 sm:$0xff] }
 0x21b   : > { %v575_v10 = vpop.f32.mrb[12].mxu0  ;;  %v1981_v5 = vld [vmem:[#allocation3 + $0xc] sm:$0xff]  ;;  %v3068_v0 = vld [vmem:[%s3837_s27 + $0x16] ss:$0 sm:$0xff] }
 0x21c   : > { %863 = vst [vmem:[#allocation3 + $0x28] sm:$0xff] %v821_v7  ;;  %v731_v11 = vmul.f32 %v3814_v32, %v575_v10  ;;  %v3239_v12 = vpop.f32.mrb[13].mxu0  ;;  %v977_v13 = vadd.f32 %v959_v9, %v936_v8  ;;  %6744 = vst [vmem:[#allocation6_spill] sm:$0xff] %v3919_v6  ;;  %v3921_v7 = vmul.f32 %v3071_v50, %v2254_v53  ;;  %v3927_v9 = vld [vmem:[%s3837_s27 + $0x7] ss:$0 sm:$0xff] }
 0x21d   : > { %v578_v14 = vpop.f32.mrb[14].mxu0  ;;  %v3924_v8 = vmul.f32 %v3879_v37, %v1159_v54 }
 0x21e   : > { %v780_v15 = vadd.f32 %v3819_v34, %v731_v11  ;;  %v732_v16 = vmul.f32 %v3814_v32, %v578_v14  ;;  %v3240_v17 = vpop.f32.mrb[15].mxu0  ;;  %6745 = vst [vmem:[#allocation7_spill] sm:$0xff] %v3921_v7  ;;  %v2255_v14 = vld [vmem:[#allocation3 + $0xd] sm:$0xff] }
 0x21f   : > { %v3963_v45 = vmul.f32 %v3071_v50, %v2255_v14 }
 0x220   : > { %v822_v19 = vmax.f32 %v780_v15, 0.0  ;;  %v781_v20 = vadd.f32 %v3819_v34, %v732_v16  ;;  %v3935_v15 = vmul.f32 %v3887_v41, %v1433_v61 }
 0x221   : > { %v1160_v16 = vld [vmem:[#allocation3 + $0x19] sm:$0xff]  ;;  %6749 = vst [vmem:[#allocation11_spill] sm:$0xff] %v3963_v45 }
 0x222   : > { %864 = vst [vmem:[#allocation3 + $0x30] sm:$0xff] %v822_v19  ;;  %v960_v21 = vmul.f32 %v3843_v57, %v822_v19  ;;  %v999_v22 = vmul.f32 %v3858_v18, %v822_v19  ;;  %v3863_v23 = vmax.f32 %v781_v20, 0.0  ;;  %v939_v10 = vmul.f32 %v3840_v55, %v822_v19  ;;  %6746 = vst [vmem:[#allocation8_spill] sm:$0xff] %v3935_v15  ;;  %v1434_v17 = vld [vmem:[#allocation3 + $0x1a] sm:$0xff]  ;;  %v3938_v20 = vld [vmem:[%s3837_s27 + $0x8] ss:$0 sm:$0xff] }
 0x223   : > { %v583_v24 = vpop.f32.mrb[16].mxu0  ;;  %v3966_v46 = vmul.f32 %v3879_v37, %v1160_v16  ;;  %v3977_v51 = vld [vmem:[#allocation3 + $0x1c] sm:$0xff]  ;;  %v3988_v61 = vld [vmem:[#allocation3 + $0x24] sm:$0xff] }
 0x224   : > { %865 = vst [vmem:[#allocation3 + $0x38] sm:$0xff] %v3863_v23  ;;  %v3243_v26 = vpop.f32.mrb[17].mxu0  ;;  %v978_v30 = vadd.f32 %v960_v21, %v937_v25  ;;  %v3871_v31 = vadd.f32 %v999_v22, %v976_v2  ;;  %v961_v33 = vmul.f32 %v3843_v57, %v3863_v23  ;;  %v1000_v38 = vmul.f32 %v3858_v18, %v3863_v23  ;;  %v1707_v2 = vld [vmem:[#allocation3 + $0xb] sm:$0xff]  ;;  %v1708_v25 = vld [vmem:[#allocation3 + $0x1b] sm:$0xff] }
 0x225   : > { %v586_v28 = vpop.f32.mrb[18].mxu0  ;;  %v733_v39 = vmul.f32 %v3814_v32, %v583_v24  ;;  %v3945_v24 = vmul.f32 %v3890_v42, %v1707_v2  ;;  %v3948_v26 = vld [vmem:[%s3837_s27 + $0x9] ss:$0 sm:$0xff]  ;;  %v3981_v53 = vmul.f32 %v3890_v42, %v1708_v25  ;;  %v2257_v2 = vld [vmem:[#allocation3 + $0x25] sm:$0xff] }
 0x226   : > { %v3244_v35 = vpop.f32.mrb[19].mxu0  ;;  %v734_v40 = vmul.f32 %v3814_v32, %v586_v28  ;;  %v3892_v43 = vadd.f32 %v961_v33, %v938_v29  ;;  %v3897_v47 = vadd.f32 %v1000_v38, %v977_v13  ;;  %v3955_v29 = vmul.f32 %v3895_v44, %v1981_v5  ;;  %v1161_v33 = vld [vmem:[#allocation3 + $0x21] sm:$0xff] }
 0x227   : > { %v782_v48 = vadd.f32 %v3819_v34, %v733_v39  ;;  %6747 = vst [vmem:[#allocation9_spill] sm:$0xff] %v3945_v24  ;;  %v1435_v35 = vld [vmem:[#allocation3 + $0x22] sm:$0xff]  ;;  %6752 = vst [vmem:[#allocation14_spill] sm:$0xff] %v3981_v53  ;;  %v3984_v50 = vmul.f32 %v3948_v26, %v1708_v25  ;;  %v3994_v5 = vmul.f32 %v3927_v9, %v1161_v33 }
 0x228   : > { %v783_v49 = vadd.f32 %v3819_v34, %v734_v40  ;;  %6748 = vst [vmem:[#allocation10_spill] sm:$0xff] %v3955_v29  ;;  %v3066_v40 = vld [vmem:[%s3837_s27 + $0xa] ss:$0 sm:$0xff]  ;;  %v4001_v14 = vmul.f32 %v3938_v20, %v1435_v35  ;;  %v3073_v29 = vld [vmem:[%s3837_s27 + $0x11] ss:$0 sm:$0xff] }
 0x229   : > { %v824_v56 = vmax.f32 %v782_v48, 0.0  ;;  %v3972_v48 = vmul.f32 %v3887_v41, %v1434_v17  ;;  %6753 = vst [vmem:[#allocation15_spill] sm:$0xff] %v3984_v50 }
 0x22a   : > { %v3902_v58 = vmax.f32 %v783_v49, 0.0  ;;  %v3975_v49 = vmul.f32 %v3938_v20, %v1434_v17  ;;  %6756 = vst [vmem:[#allocation18_spill] sm:$0xff] %v4001_v14 }
 0x22b   : > { %v591_v59 = vpop.f32.mrb[20].mxu0  ;;  %866 = vst [vmem:[#allocation3 + $0x40] sm:$0xff] %v824_v56  ;;  %6750 = vst [vmem:[#allocation12_spill] sm:$0xff] %v3972_v48 }
 0x22c   : > { %v3247_v63 = vpop.f32.mrb[21].mxu0  ;;  %867 = vst [vmem:[#allocation3 + $0x48] sm:$0xff] %v3902_v58  ;;  %v962_v11 = vmul.f32 %v3843_v57, %v3902_v58  ;;  %v1001_v12 = vmul.f32 %v3858_v18, %v3902_v58  ;;  %v1040_v21 = vmul.f32 %v3909_v62, %v3902_v58  ;;  %v735_v19 = vmul.f32 %v3814_v32, %v591_v59 }
 0x22d   : > { %v594_v4 = vpop.f32.mrb[22].mxu0  ;;  %6751 = vst [vmem:[#allocation13_spill] sm:$0xff] %v3975_v49  ;;  %v2256_v63 = vld [vmem:[#allocation3 + $0x1d] sm:$0xff] }
 0x22e   : > { %v3248_v13 = vpop.f32.mrb[23].mxu0  ;;  %v736_v22 = vmul.f32 %v3814_v32, %v594_v4  ;;  %v3950_v27 = vadd.f32 %v962_v11, %v939_v10  ;;  %v3952_v28 = vadd.f32 %v1001_v12, %v978_v30  ;;  %v3958_v36 = vadd.f32 %v1040_v21, %v3871_v31  ;;  %v1709_v31 = vld [vmem:[#allocation3 + $0x23] sm:$0xff]  ;;  %v1162_v11 = vld [vmem:[#allocation3 + $0x31] sm:$0xff] }
 0x22f   : > { %v784_v38 = vadd.f32 %v3819_v34, %v735_v19  ;;  %v3969_v30 = vmul.f32 %v3927_v9, %v1160_v16  ;;  %v3991_v4 = vmul.f32 %v3879_v37, %v1161_v33  ;;  %v3997_v10 = vmul.f32 %v3887_v41, %v1435_v35  ;;  %v4012_v19 = vld [vmem:[%s3837_s27 + $0xd] ss:$0 sm:$0xff]  ;;  %v4016_v33 = vld [vmem:[%s3837_s27 + $0xe] ss:$0 sm:$0xff] }
 0x230   : > { %v785_v39 = vadd.f32 %v3819_v34, %v736_v22  ;;  %v4004_v16 = vmul.f32 %v3890_v42, %v1709_v31  ;;  %v4007_v17 = vmul.f32 %v3948_v26, %v1709_v31  ;;  %v940_v21 = vmul.f32 %v3840_v55, %v3863_v23  ;;  %v1436_v22 = vld [vmem:[#allocation3 + $0x32] sm:$0xff] }
 0x231   : > { %v3986_v54 = vmax.f32 %v784_v38, 0.0  ;;  %6754 = vst [vmem:[#allocation16_spill] sm:$0xff] %v3991_v4  ;;  %6755 = vst [vmem:[#allocation17_spill] sm:$0xff] %v3997_v10  ;;  %v4019_v38 = vmul.f32 %v3066_v40, %v3977_v51  ;;  %v4024_v31 = vmul.f32 %v3072_v52, %v2256_v63  ;;  %v4026_v23 = vmul.f32 %v3072_v52, %v2257_v2  ;;  %v3061_v63 = vld [vmem:[%s3837_s27 + $0xf] ss:$0 sm:$0xff] }
 0x232   : > { %v827_v56 = vmax.f32 %v785_v39, 0.0  ;;  %6757 = vst [vmem:[#allocation19_spill] sm:$0xff] %v4004_v16  ;;  %6758 = vst [vmem:[#allocation20_spill] sm:$0xff] %v4007_v17  ;;  %v4022_v39 = vmul.f32 %v3066_v40, %v3988_v61  ;;  %v4039_v40 = vmul.f32 %v4012_v19, %v1162_v11  ;;  %v4042_v52 = vmul.f32 %v3887_v41, %v1436_v22  ;;  %v3067_v16 = vld [vmem:[%s3837_s27 + $0x10] ss:$0 sm:$0xff] }
 0x233   : > { %v599_v59 = vpop.f32.mrb[24].mxu0  ;;  %868 = vst [vmem:[#allocation3 + $0x50] sm:$0xff] %v3986_v54  ;;  %6759 = vst [vmem:[#allocation21_spill] sm:$0xff] %v4019_v38  ;;  %v1002_v3 = vmul.f32 %v3858_v18, %v3986_v54  ;;  %v1041_v2 = vmul.f32 %v3909_v62, %v3986_v54  ;;  %v4050_v45 = vmul.f32 %v3938_v20, %v1436_v22  ;;  %v1163_v53 = vld [vmem:[#allocation3 + $0x39] sm:$0xff] }
 0x234   : > { %v737_v12 = vmul.f32 %v3814_v32, %v599_v59  ;;  %v3251_v13 = vpop.f32.mrb[25].mxu0  ;;  %869 = vst [vmem:[#allocation3 + $0x58] sm:$0xff] %v827_v56  ;;  %6760 = vst [vmem:[#allocation22_spill] sm:$0xff] %v4022_v39  ;;  %v4029_v59 = vmul.f32 %v3879_v37, %v1162_v11  ;;  %v4032_v56 = vmul.f32 %v3927_v9, %v1162_v11  ;;  %v2258_v38 = vld [vmem:[#allocation3 + $0x35] sm:$0xff] }
 0x235   : > { %v602_v25 = vpop.f32.mrb[26].mxu0  ;;  %6761 = vst [vmem:[#allocation23_spill] sm:$0xff] %v4024_v31  ;;  %6762 = vst [vmem:[#allocation24_spill] sm:$0xff] %v4026_v23  ;;  %v1710_v13 = vld [vmem:[#allocation3 + $0x33] sm:$0xff]  ;;  %v4053_v7 = vmul.f32 %v4016_v33, %v1436_v22  ;;  %v4058_v39 = vadd.f32 %v1002_v3, %v3892_v43  ;;  %v1711_v50 = vld [vmem:[#allocation3 + $0x3b] sm:$0xff]  ;;  %v941_v3 = vmul.f32 %v3840_v55, %v3902_v58 }
 0x236   : > { %v3252_v35 = vpop.f32.mrb[27].mxu0  ;;  %6763 = vst [vmem:[#allocation25_spill] sm:$0xff] %v4029_v59  ;;  %6764 = vst [vmem:[#allocation26_spill] sm:$0xff] %v4042_v52  ;;  %v786_v23 = vadd.f32 %v3819_v34, %v737_v12  ;;  %v1984_v31 = vld [vmem:[#allocation3 + $0x34] sm:$0xff]  ;;  %v4062_v6 = vmul.f32 %v3890_v42, %v1710_v13  ;;  %v4065_v12 = vmul.f32 %v3948_v26, %v1710_v13 }
 0x237   : > { %v963_v35 = vmul.f32 %v3843_v57, %v3986_v54  ;;  %6765 = vst [vmem:[#allocation27_spill] sm:$0xff] %v4050_v45  ;;  %6766 = vst [vmem:[#allocation28_spill] sm:$0xff] %v4053_v7  ;;  %v1437_v17 = vld [vmem:[#allocation3 + $0x3a] sm:$0xff]  ;;  %v4068_v45 = vadd.f32 %v1041_v2, %v3897_v47  ;;  %v4070_v24 = vmul.f32 %v3061_v63, %v1710_v13 }
 0x238   : > { %6767 = vst [vmem:[#allocation29_spill] sm:$0xff] %v4062_v6  ;;  %6768 = vst [vmem:[#allocation30_spill] sm:$0xff] %v4065_v12  ;;  %v828_v22 = vmax.f32 %v786_v23, 0.0  ;;  %v738_v43 = vmul.f32 %v3814_v32, %v602_v25  ;;  %v4078_v6 = vmul.f32 %v3879_v37, %v1163_v53  ;;  %v4081_v12 = vmul.f32 %v3927_v9, %v1163_v53  ;;  %v1985_v13 = vld [vmem:[#allocation3 + $0x3c] sm:$0xff] }
 0x239   : > { %v4055_v11 = vadd.f32 %v963_v35, %v940_v21  ;;  %6769 = vst [vmem:[#allocation31_spill] sm:$0xff] %v4070_v24  ;;  %v4075_v35 = vmul.f32 %v3067_v16, %v1984_v31  ;;  %v4084_v47 = vmul.f32 %v4012_v19, %v1163_v53  ;;  %v4086_v2 = vmul.f32 %v3073_v29, %v2258_v38  ;;  %v2259_v24 = vld [vmem:[#allocation3 + $0x3d] sm:$0xff] }
 0x23a   : > { %6771 = vst [vmem:[#allocation33_spill] sm:$0xff] %v4078_v6  ;;  %6772 = vst [vmem:[#allocation34_spill] sm:$0xff] %v4081_v12  ;;  %v4089_v58 = vmul.f32 %v3887_v41, %v1437_v17  ;;  %v4092_v25 = vmul.f32 %v3938_v20, %v1437_v17  ;;  %v4095_v31 = vmul.f32 %v4016_v33, %v1437_v17  ;;  %v1164_v38 = vld [vmem:[#allocation3 + $0x49] sm:$0xff] }
 0x23b   : > { %v607_v21 = vpop.f32.mrb[28].mxu0  ;;  %6770 = vst [vmem:[#allocation32_spill] sm:$0xff] %v4075_v35  ;;  %870 = vst [vmem:[#allocation3 + $0x60] sm:$0xff] %v828_v22  ;;  %v4098_v35 = vmul.f32 %v3890_v42, %v1711_v50  ;;  %v964_v1 = vmul.f32 %v3843_v57, %v828_v22  ;;  %v1003_v7 = vmul.f32 %v3858_v18, %v828_v22  ;;  %v1986_v15 = vld [vmem:[#allocation3 + $0x4c] sm:$0xff]  ;;  %v2261_v4 = vld [vmem:[#allocation3 + $0x55] sm:$0xff] }
 0x23c   : > { %v3255_v23 = vpop.f32.mrb[29].mxu0  ;;  %6773 = vst [vmem:[#allocation35_spill] sm:$0xff] %v4086_v2  ;;  %6774 = vst [vmem:[#allocation36_spill] sm:$0xff] %v4089_v58  ;;  %v4104_v2 = vld [vmem:[%s3837_s27 + $0x13] ss:$0 sm:$0xff]  ;;  %v4109_v17 = vmul.f32 %v3061_v63, %v1711_v50  ;;  %v4117_v49 = vmul.f32 %v3067_v16, %v1985_v13  ;;  %v1438_v58 = vld [vmem:[#allocation3 + $0x4a] sm:$0xff]  ;;  %v4120_v52 = vmul.f32 %v3840_v55, %v828_v22 }
 0x23d   : > { %6775 = vst [vmem:[#allocation37_spill] sm:$0xff] %v4092_v25  ;;  %6776 = vst [vmem:[#allocation38_spill] sm:$0xff] %v4095_v31  ;;  %v610_v53 = vpop.f32.mrb[30].mxu0  ;;  %v4101_v23 = vmul.f32 %v3948_v26, %v1711_v50  ;;  %v1042_v25 = vmul.f32 %v3909_v62, %v828_v22  ;;  %v4114_v31 = vld [vmem:[%s3837_s27 + $0x18] ss:$0 sm:$0xff]  ;;  %v4125_v10 = vmul.f32 %v3073_v29, %v2259_v24 }
 0x23e   : > { %6777 = vst [vmem:[#allocation39_spill] sm:$0xff] %v4098_v35  ;;  %v3256_v14 = vpop.f32.mrb[31].mxu0  ;;  %6779 = vst [vmem:[#allocation41_spill] sm:$0xff] %v4109_v17  ;;  %v942_v35 = vmul.f32 %v3840_v55, %v3986_v54  ;;  %v4129_v50 = vmul.f32 %v3895_v44, %v3977_v51  ;;  %v4133_v54 = vmul.f32 %v3895_v44, %v3988_v61  ;;  %v4148_v29 = vld [vmem:[%s3837_s27 + $0x14] ss:$0 sm:$0xff] }
 0x23f   : > { %6778 = vst [vmem:[#allocation40_spill] sm:$0xff] %v4101_v23  ;;  %v787_v23 = vadd.f32 %v3819_v34, %v738_v43  ;;  %6780 = vst [vmem:[#allocation42_spill] sm:$0xff] %v4117_v49  ;;  %v3487_v14 = vld [vmem:[%s6586_s8 + $0x20] sm:$0xff]   ;;  %v4136_v16 = vmul.f32 %v3879_v37, %v1164_v38  ;;  %v4139_v63 = vmul.f32 %v3927_v9, %v1164_v38 }
 0x240   : > { %6781 = vst [vmem:[#allocation43_spill] sm:$0xff] %v4125_v10  ;;  %6782 = vst [vmem:[#allocation44_spill] sm:$0xff] %v4129_v50  ;;  %v4142_v43 = vmul.f32 %v4012_v19, %v1164_v38  ;;  %v4145_v24 = vmul.f32 %v4104_v2, %v1164_v38  ;;  %v4150_v51 = vadd.f32 %v964_v1, %v941_v3  ;;  %3318 = vmatpush3.bf16.msra.mxu1 %v3487_v14  ;;  %v6788_v3 = vmov 0.0  }
 0x241   : > { %6783 = vst [vmem:[#allocation45_spill] sm:$0xff] %v4133_v54  ;;  %6784 = vst [vmem:[#allocation46_spill] sm:$0xff] %v4136_v16  ;;  %v4153_v13 = vadd.f32 %v1003_v7, %v3950_v27  ;;  %v4156_v44 = vadd.f32 %v1042_v25, %v3952_v28  ;;  %v1081_v61 = vmul.f32 %v4114_v31, %v828_v22  ;;  %v3488_v54 = vld [vmem:[%s6586_s8 + $0x28] sm:$0xff]   ;;  %v4165_v50 = vmax.f32 %v787_v23, 0.0  ;;  %v4176_v25 = vld [vmem:[#allocation3 + $0x4b] sm:$0xff] }
 0x242   : > { %6785 = vst [vmem:[#allocation47_spill] sm:$0xff] %v4139_v63  ;;  %6786 = vst [vmem:[#allocation48_spill] sm:$0xff] %v4142_v43  ;;  %v4163_v38 = vmul.f32 %v3887_v41, %v1438_v58  ;;  %v739_v1 = vmul.f32 %v3814_v32, %v607_v21  ;;  %v740_v7 = vmul.f32 %v3814_v32, %v610_v53  ;;  %3319 = vmatprep.subr.bf16.mxu1 %v6788_v3 }
 0x243   : > { %v615_v27 = vpop.f32.mrb[32].mxu0  ;;  %v4171_v28 = vmul.f32 %v3938_v20, %v1438_v58  ;;  %v4174_v22 = vmul.f32 %v4016_v33, %v1438_v58  ;;  %v4179_v14 = vadd.f32 %v1081_v61, %v3958_v36  ;;  %v4183_v21 = vmul.f32 %v4148_v29, %v1438_v58  ;;  %871 = vst [vmem:[#allocation3 + $0x68] sm:$0xff] %v4165_v50  ;;  %v1165_v36 = vld [vmem:[#allocation3 + $0x51] sm:$0xff] }
 0x244   : > { %6787 = vst [vmem:[#allocation49_spill] sm:$0xff] %v4163_v38  ;;  %v741_v23 = vmul.f32 %v3814_v32, %v615_v27  ;;  %v3259_v10 = vpop.f32.mrb[33].mxu0  ;;  %v965_v53 = vmul.f32 %v3843_v57, %v4165_v50  ;;  %v1043_v49 = vmul.f32 %v3909_v62, %v4165_v50  ;;  %v788_v58 = vadd.f32 %v3819_v34, %v739_v1 }
 0x245   : > { %6789 = vst [vmem:[#allocation50_spill] sm:$0xff] %v4171_v28  ;;  %6790 = vst [vmem:[#allocation51_spill] sm:$0xff] %v4174_v22  ;;  %v1004_v28 = vmul.f32 %v3858_v18, %v4165_v50  ;;  %v618_v22 = vpop.f32.mrb[34].mxu0  ;;  %v1082_v10 = vmul.f32 %v4114_v31, %v4165_v50  ;;  %v789_v61 = vadd.f32 %v3819_v34, %v740_v7  ;;  %3320 = vmatpush3.bf16.msra.mxu1 %v3488_v54 }
 0x246   : > { %6791 = vst [vmem:[#allocation52_spill] sm:$0xff] %v4183_v21  ;;  %v790_v27 = vadd.f32 %v3819_v34, %v741_v23  ;;  %v3260_v17 = vpop.f32.mrb[35].mxu0  ;;  %v4199_v21 = vmul.f32 %v3890_v42, %v4176_v25  ;;  %v983_v38 = vadd.f32 %v965_v53, %v942_v35  ;;  %v4205_v48 = vadd.f32 %v1043_v49, %v4058_v39  ;;  %v1439_v53 = vld [vmem:[#allocation3 + $0x52] sm:$0xff] }
 0x247   : > { %v4202_v16 = vadd.f32 %v1004_v28, %v4055_v11  ;;  %3321 = vmatprep.subr.bf16.mxu1 %v6788_v3  ;;  %v4209_v1 = vadd.f32 %v1082_v10, %v4068_v45  ;;  %v830_v7 = vmax.f32 %v788_v58, 0.0  ;;  %v4211_v23 = vmax.f32 %v789_v61, 0.0  ;;  %v4214_v17 = vld [vmem:[%s3837_s27 + $0x1e] ss:$0 sm:$0xff]  ;;  %v3489_v11 = vld [vmem:[%s6586_s8 + $0x30] sm:$0xff]  }
 0x248   : > { %6792 = vst [vmem:[#allocation53_spill] sm:$0xff] %v4199_v21  ;;  %v4216_v54 = vmax.f32 %v790_v27, 0.0  ;;  %v4223_v49 = vmul.f32 %v3948_v26, %v4176_v25  ;;  %v4226_v39 = vmul.f32 %v3879_v37, %v1165_v36  ;;  %v4229_v45 = vmul.f32 %v3927_v9, %v1165_v36 }
 0x249   : > { %v742_v35 = vmul.f32 %v3814_v32, %v618_v22  ;;  %v4233_v28 = vmul.f32 %v4012_v19, %v1165_v36  ;;  %872 = vst [vmem:[#allocation3 + $0x70] sm:$0xff] %v830_v7  ;;  %873 = vst [vmem:[#allocation3 + $0x78] sm:$0xff] %v4211_v23  ;;  %v966_v10 = vmul.f32 %v3843_v57, %v4211_v23  ;;  %3322 = vmatpush3.bf16.msra.mxu1 %v3489_v11  ;;  %v3490_v22 = vld [vmem:[%s6586_s8 + $0x38] sm:$0xff]   ;;  %v1713_v7 = vld [vmem:[#allocation3 + $0x53] sm:$0xff] }
 0x24a   : > { %6793 = vst [vmem:[#allocation54_spill] sm:$0xff] %v4223_v49  ;;  %6794 = vst [vmem:[#allocation55_spill] sm:$0xff] %v4226_v39  ;;  %v1005_v58 = vmul.f32 %v3858_v18, %v4211_v23  ;;  %v1044_v61 = vmul.f32 %v3909_v62, %v4211_v23  ;;  %v4247_v27 = vmul.f32 %v4104_v2, %v1165_v36  ;;  %3323 = vmatprep.subr.bf16.mxu1 %v6788_v3 }
 0x24b   : > { %6795 = vst [vmem:[#allocation56_spill] sm:$0xff] %v4229_v45  ;;  %6796 = vst [vmem:[#allocation57_spill] sm:$0xff] %v4233_v28  ;;  %v1083_v21 = vmul.f32 %v4114_v31, %v4211_v23  ;;  %v1122_v49 = vmul.f32 %v4214_v17, %v4211_v23  ;;  %v967_v39 = vmul.f32 %v3843_v57, %v4216_v54  ;;  %v4255_v45 = vpop.f32.mrb[36].mxu0  ;;  %v3062_v28 = vld [vmem:[%s3837_s27 + $0x15] ss:$0 sm:$0xff] }
 0x24c   : > { %874 = vst [vmem:[#allocation3 + $0x80] sm:$0xff] %v4216_v54  ;;  %v4259_v11 = vadd.f32 %v966_v10, %v4120_v52  ;;  %v4262_v36 = vadd.f32 %v1005_v58, %v4150_v51  ;;  %v4265_v6 = vadd.f32 %v1044_v61, %v4153_v13  ;;  %v1006_v63 = vmul.f32 %v3858_v18, %v4216_v54  ;;  %v3263_v59 = vpop.f32.mrb[37].mxu0  ;;  %v1987_v10 = vld [vmem:[#allocation3 + $0x54] sm:$0xff] }
 0x24d   : > { %v4272_v12 = vmul.f32 %v3887_v41, %v1439_v53  ;;  %v4275_v43 = vmul.f32 %v3938_v20, %v1439_v53  ;;  %v4278_v52 = vmul.f32 %v4016_v33, %v1439_v53  ;;  %v791_v51 = vadd.f32 %v3819_v34, %v742_v35  ;;  %v4281_v13 = vpop.f32.mrb[38].mxu0  ;;  %3324 = vmatpush3.bf16.msra.mxu1 %v3490_v22 }
 0x24e   : > { %v4284_v59 = vmul.f32 %v4148_v29, %v1439_v53  ;;  %v4287_v58 = vmul.f32 %v3890_v42, %v1713_v7  ;;  %v4290_v61 = vmul.f32 %v3948_v26, %v1713_v7  ;;  %v4295_v35 = vadd.f32 %v1083_v21, %v4156_v44  ;;  %v3074_v26 = vld [vmem:[%s3837_s27 + $0x17] ss:$0 sm:$0xff]  ;;  %3361 = vmatprep.subr.bf16.mxu1 %v6788_v3 }
 0x24f   : > { %6797 = vst [vmem:[#allocation58_spill] sm:$0xff] %v4272_v12  ;;  %6798 = vst [vmem:[#allocation59_spill] sm:$0xff] %v4275_v43  ;;  %v944_v43 = vmul.f32 %v3840_v55, %v4165_v50  ;;  %v4298_v12 = vmul.f32 %v3062_v28, %v4176_v25  ;;  %v4300_v53 = vmul.f32 %v3062_v28, %v1713_v7  ;;  %v4314_v25 = vld [vmem:[%s3837_s27 + $0x19] ss:$0 sm:$0xff] }
 0x250   : > { %6799 = vst [vmem:[#allocation60_spill] sm:$0xff] %v4278_v52  ;;  %6800 = vst [vmem:[#allocation61_spill] sm:$0xff] %v4284_v59  ;;  %v3264_v52 = vpop.f32.mrb[39].mxu0  ;;  %v4302_v59 = vmul.f32 %v3068_v0, %v1986_v15  ;;  %v1140_v50 = vadd.f32 %v1122_v49, %v4179_v14  ;;  %v4309_v22 = vadd.f32 %v1006_v63, %v983_v38  ;;  %v1440_v21 = vld [vmem:[#allocation3 + $0x62] sm:$0xff]  ;;  %v833_v14 = vmax.f32 %v791_v51, 0.0 }
 0x251   : > { %6801 = vst [vmem:[#allocation62_spill] sm:$0xff] %v4287_v58  ;;  %6802 = vst [vmem:[#allocation63_spill] sm:$0xff] %v4290_v61  ;;  %v2260_v58 = vld [vmem:[#allocation3 + $0x4d] sm:$0xff]  ;;  %v1166_v61 = vld [vmem:[#allocation3 + $0x61] sm:$0xff]  ;;  %v4307_v52 = vadd.f32 %v967_v39, %v944_v43  ;;  %v4311_v44 = vmul.f32 %v3068_v0, %v1987_v10  ;;  %v1045_v15 = vmul.f32 %v3909_v62, %v4216_v54 }
 0x252   : > { %6803 = vst [vmem:[#allocation64_spill] sm:$0xff] %v4298_v12  ;;  %6804 = vst [vmem:[#allocation65_spill] sm:$0xff] %v4300_v53  ;;  %v1084_v28 = vmul.f32 %v4114_v31, %v4216_v54  ;;  %v1123_v7 = vmul.f32 %v4214_v17, %v4216_v54  ;;  %v4324_v63 = vmul.f32 %v3840_v55, %v4211_v23  ;;  %v4347_v10 = vld [vmem:[%s3837_s27 + $0x1a] ss:$0 sm:$0xff] }
 0x253   : > { %6805 = vst [vmem:[#allocation66_spill] sm:$0xff] %v4302_v59  ;;  %6806 = vst [vmem:[#allocation67_spill] sm:$0xff] %v4311_v44  ;;  %v4328_v0 = vmul.f32 %v3840_v55, %v4216_v54  ;;  %v4330_v43 = vmul.f32 %v3074_v26, %v2260_v58  ;;  %v4332_v38 = vmul.f32 %v3074_v26, %v2261_v4  ;;  %v631_v54 = vpop.f32.mrb[40].mxu0  ;;  %v1714_v3 = vld [vmem:[#allocation3 + $0x63] sm:$0xff] }
 0x254   : > { %v4335_v49 = vmul.f32 %v3879_v37, %v1166_v61  ;;  %v4338_v39 = vmul.f32 %v3927_v9, %v1166_v61  ;;  %v4341_v51 = vmul.f32 %v4012_v19, %v1166_v61  ;;  %v4344_v23 = vmul.f32 %v4104_v2, %v1166_v61  ;;  %875 = vst [vmem:[#allocation3 + $0x88] sm:$0xff] %v833_v14  ;;  %v3267_v44 = vpop.f32.mrb[41].mxu0 }
 0x255   : > { %6807 = vst [vmem:[#allocation68_spill] sm:$0xff] %v4330_v43  ;;  %6808 = vst [vmem:[#allocation69_spill] sm:$0xff] %v4332_v38  ;;  %v4350_v58 = vmul.f32 %v4314_v25, %v1166_v61  ;;  %v4353_v4 = vmul.f32 %v3887_v41, %v1440_v21  ;;  %v4356_v26 = vmul.f32 %v3938_v20, %v1440_v21  ;;  %v1167_v38 = vld [vmem:[#allocation3 + $0x69] sm:$0xff]  ;;  %v634_v12 = vpop.f32.mrb[42].mxu0 }
 0x256   : > { %6809 = vst [vmem:[#allocation70_spill] sm:$0xff] %v4335_v49  ;;  %6810 = vst [vmem:[#allocation71_spill] sm:$0xff] %v4338_v39  ;;  %v1209_v43 = vadd.f32 %v3906_v60, %v1140_v50  ;;  %v4360_v59 = vmul.f32 %v4016_v33, %v1440_v21  ;;  %v4363_v14 = vadd.f32 %v1045_v15, %v4202_v16  ;;  %v1441_v60 = vld [vmem:[#allocation3 + $0x6a] sm:$0xff]  ;;  %v3268_v16 = vpop.f32.mrb[43].mxu0 }
 0x257   : > { %6811 = vst [vmem:[#allocation72_spill] sm:$0xff] %v4353_v4  ;;  %6812 = vst [vmem:[#allocation73_spill] sm:$0xff] %v4356_v26  ;;  %v4366_v61 = vadd.f32 %v1084_v28, %v4205_v48  ;;  %v1141_v53 = vadd.f32 %v1123_v7, %v4209_v1  ;;  %v4370_v4 = vmul.f32 %v4148_v29, %v1440_v21  ;;  %v1715_v28 = vld [vmem:[#allocation3 + $0x6b] sm:$0xff] }
 0x258   : > { %6813 = vst [vmem:[#allocation74_spill] sm:$0xff] %v4360_v59  ;;  %v4373_v26 = vmul.f32 %v4347_v10, %v1440_v21  ;;  %v1250_v50 = vadd.f32 %v3969_v30, %v1209_v43  ;;  %v743_v44 = vmul.f32 %v3814_v32, %v4255_v45  ;;  %v4379_v15 = vmul.f32 %v3890_v42, %v1714_v3  ;;  %v1168_v3 = vld [vmem:[#allocation3 + $0x79] sm:$0xff] }
 0x259   : > { %6814 = vst [vmem:[#allocation75_spill] sm:$0xff] %v4370_v4  ;;  %v4382_v48 = vmul.f32 %v3879_v37, %v1167_v38  ;;  %v4385_v1 = vmul.f32 %v3927_v9, %v1167_v38  ;;  %v1210_v21 = vadd.f32 %v3924_v8, %v1141_v53  ;;  %v4389_v7 = vmul.f32 %v4012_v19, %v1167_v38  ;;  %v1442_v4 = vld [vmem:[#allocation3 + $0x7a] sm:$0xff] }
 0x25a   : > { %6815 = vst [vmem:[#allocation76_spill] sm:$0xff] %v4373_v26  ;;  %6816 = vst [vmem:[#allocation77_spill] sm:$0xff] %v4379_v15  ;;  %v4392_v30 = vmul.f32 %v4104_v2, %v1167_v38  ;;  %v1356_v45 = vmul.f32 %v4314_v25, %v1167_v38  ;;  %v1291_v43 = vadd.f32 %v4039_v40, %v1250_v50  ;;  %v4416_v50 = vld [vmem:[%s3837_s27 + $0x1f] ss:$0 sm:$0xff] }
 0x25b   : > { %6817 = vst [vmem:[#allocation78_spill] sm:$0xff] %v4382_v48  ;;  %6818 = vst [vmem:[#allocation79_spill] sm:$0xff] %v4385_v1  ;;  %v4397_v16 = vmul.f32 %v3887_v41, %v1441_v60  ;;  %v4400_v15 = vmul.f32 %v3938_v20, %v1441_v60  ;;  %v4403_v59 = vmul.f32 %v4016_v33, %v1441_v60  ;;  %v4469_v49 = vld [vmem:[#allocation3 + $0x81] sm:$0xff] }
 0x25c   : > { %v1251_v8 = vadd.f32 %v3994_v5, %v1210_v21  ;;  %v4407_v53 = vmul.f32 %v4148_v29, %v1441_v60  ;;  %v4410_v38 = vmul.f32 %v4347_v10, %v1441_v60  ;;  %v4413_v40 = vmul.f32 %v3890_v42, %v1715_v28 }
 0x25d   : > { %6819 = vst [vmem:[#allocation80_spill] sm:$0xff] %v4397_v16  ;;  %6820 = vst [vmem:[#allocation81_spill] sm:$0xff] %v4400_v15  ;;  %v792_v15 = vadd.f32 %v3819_v34, %v743_v44  ;;  %v4420_v26 = vmul.f32 %v3879_v37, %v1168_v3  ;;  %v4423_v5 = vmul.f32 %v3927_v9, %v1168_v3 }
 0x25e   : > { %6821 = vst [vmem:[#allocation82_spill] sm:$0xff] %v4403_v59  ;;  %6822 = vst [vmem:[#allocation83_spill] sm:$0xff] %v4407_v53  ;;  %v744_v21 = vmul.f32 %v3814_v32, %v4281_v13  ;;  %v745_v60 = vmul.f32 %v3814_v32, %v631_v54  ;;  %v639_v59 = vpop.f32.mrb[44].mxu0  ;;  %v4429_v42 = vmul.f32 %v4012_v19, %v1168_v3 }
 0x25f   : > { %6823 = vst [vmem:[#allocation84_spill] sm:$0xff] %v4410_v38  ;;  %6824 = vst [vmem:[#allocation85_spill] sm:$0xff] %v4413_v40  ;;  %v4432_v28 = vmul.f32 %v4104_v2, %v1168_v3  ;;  %v1332_v44 = vadd.f32 %v4145_v24, %v1291_v43  ;;  %v1292_v40 = vadd.f32 %v4084_v47, %v1251_v8  ;;  %v3271_v53 = vpop.f32.mrb[45].mxu0  ;;  %v4437_v38 = vld [vmem:[%s3837_s27 + $0x20] ss:$0 sm:$0xff]  ;;  %v834_v8 = vmax.f32 %v792_v15, 0.0 }
 0x260   : > { %6825 = vst [vmem:[#allocation86_spill] sm:$0xff] %v4420_v26  ;;  %6826 = vst [vmem:[#allocation87_spill] sm:$0xff] %v4423_v5  ;;  %v4440_v16 = vmul.f32 %v4314_v25, %v1168_v3  ;;  %v4443_v13 = vmul.f32 %v4416_v50, %v1168_v3  ;;  %v4446_v54 = vmul.f32 %v3887_v41, %v1442_v4  ;;  %v4449_v48 = vpop.f32.mrb[46].mxu0 }
 0x261   : > { %6827 = vst [vmem:[#allocation88_spill] sm:$0xff] %v4429_v42  ;;  %6828 = vst [vmem:[#allocation89_spill] sm:$0xff] %v4437_v38  ;;  %v746_v26 = vmul.f32 %v3814_v32, %v634_v12  ;;  %v4452_v24 = vmul.f32 %v3938_v20, %v1442_v4  ;;  %v4455_v47 = vmul.f32 %v4016_v33, %v1442_v4  ;;  %v3272_v53 = vpop.f32.mrb[47].mxu0 }
 0x262   : > { %6829 = vst [vmem:[#allocation90_spill] sm:$0xff] %v4446_v54  ;;  %v4458_v43 = vmul.f32 %v4148_v29, %v1442_v4  ;;  %v4461_v3 = vmul.f32 %v4347_v10, %v1442_v4  ;;  %v793_v54 = vadd.f32 %v3819_v34, %v744_v21  ;;  %v794_v12 = vadd.f32 %v3819_v34, %v745_v60 }
 0x263   : > { %6830 = vst [vmem:[#allocation91_spill] sm:$0xff] %v4452_v24  ;;  %6831 = vst [vmem:[#allocation92_spill] sm:$0xff] %v4455_v47  ;;  %v4466_v5 = vmul.f32 %v4437_v38, %v1442_v4  ;;  %v1373_v24 = vadd.f32 %v4350_v58, %v1332_v44  ;;  %v1333_v47 = vadd.f32 %v4247_v27, %v1292_v40  ;;  %v4487_v1 = vpop.f32.mrb[48].mxu0 }
 0x264   : > { %6832 = vst [vmem:[#allocation93_spill] sm:$0xff] %v4458_v43  ;;  %6833 = vst [vmem:[#allocation94_spill] sm:$0xff] %v4461_v3  ;;  %v968_v15 = vmul.f32 %v3843_v57, %v834_v8  ;;  %v1007_v53 = vmul.f32 %v3858_v18, %v834_v8  ;;  %v1046_v43 = vmul.f32 %v3909_v62, %v834_v8  ;;  %v4480_v44 = vmax.f32 %v793_v54, 0.0 }
 0x265   : > { %6834 = vst [vmem:[#allocation95_spill] sm:$0xff] %v4466_v5  ;;  %876 = vst [vmem:[#allocation3 + $0x90] sm:$0xff] %v834_v8  ;;  %v1085_v21 = vmul.f32 %v4114_v31, %v834_v8  ;;  %v1124_v60 = vmul.f32 %v4214_v17, %v834_v8  ;;  %v795_v4 = vadd.f32 %v3819_v34, %v746_v26  ;;  %v836_v27 = vmax.f32 %v794_v12, 0.0 }
 0x266   : > { %v986_v3 = vadd.f32 %v968_v15, %v4324_v63  ;;  %v1025_v58 = vadd.f32 %v1007_v53, %v4259_v11  ;;  %v1397_v40 = vmul.f32 %v4416_v50, %v4469_v49  ;;  %v1064_v5 = vadd.f32 %v1046_v43, %v4262_v36  ;;  %877 = vst [vmem:[#allocation3 + $0x98] sm:$0xff] %v4480_v44  ;;  %v3275_v36 = vpop.f32.mrb[49].mxu0 }
 0x267   : > { %v1103_v38 = vadd.f32 %v1085_v21, %v4265_v6  ;;  %v1142_v42 = vadd.f32 %v1124_v60, %v4295_v35  ;;  %v1374_v39 = vadd.f32 %v1356_v45, %v1333_v47  ;;  %v969_v11 = vmul.f32 %v3843_v57, %v4480_v44  ;;  %878 = vst [vmem:[#allocation3 + $0xa0] sm:$0xff] %v836_v27  ;;  %v4501_v47 = vpop.f32.mrb[50].mxu0 }
 0x268   : > { %v1008_v63 = vmul.f32 %v3858_v18, %v4480_v44  ;;  %v1047_v26 = vmul.f32 %v3909_v62, %v4480_v44  ;;  %v1086_v35 = vmul.f32 %v4114_v31, %v4480_v44  ;;  %v1125_v45 = vmul.f32 %v4214_v17, %v4480_v44 }
 0x269   : > { %v1211_v6 = vadd.f32 %v3966_v46, %v1142_v42  ;;  %v837_v54 = vmax.f32 %v795_v4, 0.0  ;;  %v4504_v43 = vadd.f32 %v969_v11, %v4328_v0  ;;  %v747_v46 = vmul.f32 %v3814_v32, %v639_v59  ;;  %v3276_v42 = vpop.f32.mrb[51].mxu0  ;;  %v6835_v32 = vld [vmem:[#allocation16_spill] sm:$0xff] }
 0x26a   : > { %v4507_v12 = vadd.f32 %v1008_v63, %v4307_v52  ;;  %v4510_v15 = vadd.f32 %v1047_v26, %v4309_v22  ;;  %v947_v53 = vmul.f32 %v3840_v55, %v834_v8  ;;  %v4516_v60 = vadd.f32 %v1086_v35, %v4363_v14  ;;  %v6836_v11 = vld [vmem:[#allocation48_spill] sm:$0xff]  ;;  %v4527_v63 = vld [vmem:[#allocation3 + $0x82] sm:$0xff] }
 0x26b   : > { %v1252_v21 = vadd.f32 %v4032_v56, %v1211_v6  ;;  %v1143_v4 = vadd.f32 %v1125_v45, %v4366_v61  ;;  %879 = vst [vmem:[#allocation3 + $0xa8] sm:$0xff] %v837_v54  ;;  %v970_v0 = vmul.f32 %v3843_v57, %v837_v54  ;;  %v1009_v52 = vmul.f32 %v3858_v18, %v837_v54 }
 0x26c   : > { %v1048_v22 = vmul.f32 %v3909_v62, %v837_v54  ;;  %v1087_v27 = vmul.f32 %v4114_v31, %v837_v54  ;;  %v1126_v56 = vmul.f32 %v4214_v17, %v837_v54  ;;  %v796_v14 = vadd.f32 %v3819_v34, %v747_v46  ;;  %6837 = vst [vmem:[#allocation16_spill] sm:$0xff] %v4527_v63 }
 0x26d   : > { %v1212_v59 = vadd.f32 %v6835_v32, %v1143_v4  ;;  %v1293_v8 = vadd.f32 %v6836_v11, %v1252_v21  ;;  %v4529_v61 = vadd.f32 %v970_v0, %v947_v53  ;;  %v4531_v26 = vadd.f32 %v1009_v52, %v986_v3  ;;  %v4540_v21 = vpop.f32.mrb[52].mxu0  ;;  %v6848_v32 = vld [vmem:[#allocation8_spill] sm:$0xff] }
 0x26e   : > { %v4533_v36 = vadd.f32 %v1048_v22, %v1025_v58  ;;  %v4535_v6 = vadd.f32 %v1087_v27, %v1064_v5  ;;  %v1414_v35 = vadd.f32 %v4443_v13, %v1373_v24  ;;  %v1415_v45 = vadd.f32 %v1397_v40, %v1374_v39  ;;  %v6839_v58 = vld [vmem:[#allocation34_spill] sm:$0xff]  ;;  %v3279_v39 = vpop.f32.mrb[53].mxu0  ;;  %v4565_v40 = vld [vmem:[#allocation3 + $0x91] sm:$0xff] }
 0x26f   : > { %v1144_v42 = vadd.f32 %v1126_v56, %v1103_v38  ;;  %v4538_v4 = vmax.f32 %v796_v14, 0.0  ;;  %v4544_v34 = vmul.f32 %v3879_v37, %v4469_v49  ;;  %v4548_v3 = vmul.f32 %v3927_v9, %v4469_v49  ;;  %6841 = vst [vmem:[#allocation96_spill] sm:$0xff] %v4565_v40  ;;  %v658_v53 = vpop.f32.mrb[54].mxu0  ;;  %v6846_v22 = vld [vmem:[#allocation4_spill] sm:$0xff] }
 0x270   : > { %v4552_v5 = vmul.f32 %v4012_v19, %v4469_v49  ;;  %v1253_v13 = vadd.f32 %v6839_v58, %v1212_v59  ;;  %v4557_v38 = vmul.f32 %v4104_v2, %v4469_v49  ;;  %v1358_v24 = vmul.f32 %v4314_v25, %v4469_v49 }
 0x271   : > { %6838 = vst [vmem:[#allocation48_spill] sm:$0xff] %v4544_v34  ;;  %v4563_v37 = vmul.f32 %v3887_v41, %v4527_v63  ;;  %v1334_v46 = vadd.f32 %v4344_v23, %v1293_v8  ;;  %880 = vst [vmem:[#allocation3 + $0xb0] sm:$0xff] %v4538_v4  ;;  %v4571_v0 = vmul.f32 %v3938_v20, %v4527_v63  ;;  %v3280_v23 = vpop.f32.mrb[55].mxu0  ;;  %v4593_v8 = vld [vmem:[#allocation3 + $0x92] sm:$0xff] }
 0x272   : > { %v4575_v52 = vmul.f32 %v4016_v33, %v4527_v63  ;;  %v4579_v49 = vmul.f32 %v4148_v29, %v4527_v63  ;;  %v4583_v41 = vmul.f32 %v4347_v10, %v4527_v63  ;;  %v4586_v27 = vadd.f32 %v6846_v22, %v1414_v35  ;;  %6850 = vst [vmem:[#allocation101_spill] sm:$0xff] %v4593_v8  ;;  %v6853_v23 = vld [vmem:[#allocation25_spill] sm:$0xff] }
 0x273   : > { %6840 = vst [vmem:[#allocation34_spill] sm:$0xff] %v4563_v37  ;;  %6842 = vst [vmem:[#allocation97_spill] sm:$0xff] %v4571_v0  ;;  %v4589_v59 = vadd.f32 %v6848_v32, %v1415_v45  ;;  %v948_v11 = vmul.f32 %v3840_v55, %v4480_v44  ;;  %v4596_v56 = vmul.f32 %v3840_v55, %v837_v54  ;;  %v6852_v45 = vld [vmem:[#allocation57_spill] sm:$0xff] }
 0x274   : > { %6843 = vst [vmem:[#allocation98_spill] sm:$0xff] %v4575_v52  ;;  %6844 = vst [vmem:[#allocation99_spill] sm:$0xff] %v4579_v49  ;;  %v4600_v14 = vmul.f32 %v3927_v9, %v4565_v40  ;;  %v4604_v58 = vmul.f32 %v4012_v19, %v4565_v40  ;;  %v4608_v35 = vmul.f32 %v4104_v2, %v4565_v40 }
 0x275   : > { %6845 = vst [vmem:[#allocation100_spill] sm:$0xff] %v4583_v41  ;;  %6847 = vst [vmem:[#allocation4_spill] sm:$0xff] %v4586_v27  ;;  %v1294_v39 = vadd.f32 %v6852_v45, %v1253_v13  ;;  %v4613_v44 = vmul.f32 %v4314_v25, %v4565_v40  ;;  %v1375_v55 = vadd.f32 %v4440_v16, %v1334_v46  ;;  %v4633_v46 = vld [vmem:[#allocation3 + $0x99] sm:$0xff]  ;;  %v663_v41 = vpop.f32.mrb[56].mxu0 }
 0x276   : > { %6849 = vst [vmem:[#allocation8_spill] sm:$0xff] %v4589_v59  ;;  %6851 = vst [vmem:[#allocation102_spill] sm:$0xff] %v4600_v14  ;;  %v1398_v54 = vmul.f32 %v4416_v50, %v4565_v40  ;;  %v1213_v22 = vadd.f32 %v6853_v23, %v1144_v42  ;;  %v4621_v32 = vmul.f32 %v3938_v20, %v4593_v8  ;;  %v6857_v42 = vld [vmem:[#allocation47_spill] sm:$0xff]  ;;  %v3283_v59 = vpop.f32.mrb[57].mxu0 }
 0x277   : > { %v971_v52 = vmul.f32 %v3843_v57, %v4538_v4  ;;  %v1010_v13 = vmul.f32 %v3858_v18, %v4538_v4  ;;  %v1049_v45 = vmul.f32 %v3909_v62, %v4538_v4  ;;  %v4631_v16 = vmul.f32 %v4016_v33, %v4593_v8  ;;  %6856 = vst [vmem:[#allocation103_spill] sm:$0xff] %v4633_v46 }
 0x278   : > { %6854 = vst [vmem:[#allocation57_spill] sm:$0xff] %v4621_v32  ;;  %v1254_v23 = vadd.f32 %v6857_v42, %v1213_v22  ;;  %v1088_v49 = vmul.f32 %v4114_v31, %v4538_v4  ;;  %v1127_v57 = vmul.f32 %v4214_v17, %v4538_v4  ;;  %v1335_v18 = vadd.f32 %v4392_v30, %v1294_v39  ;;  %v4653_v42 = vld [vmem:[#allocation3 + $0x9a] sm:$0xff] }
 0x279   : > { %6855 = vst [vmem:[#allocation25_spill] sm:$0xff] %v4631_v16  ;;  %v4641_v63 = vadd.f32 %v971_v52, %v948_v11  ;;  %v4644_v37 = vadd.f32 %v1010_v13, %v4504_v43  ;;  %v4647_v16 = vadd.f32 %v1049_v45, %v4507_v12  ;;  %v4651_v22 = vmul.f32 %v4148_v29, %v4593_v8  ;;  %v4662_v43 = vld [vmem:[%s6584_s6] ss:$0 sm:$0xff]  ;;  %v4666_v52 = vpop.f32.mrb[58].mxu0  ;;  %v6864_v45 = vld [vmem:[#allocation33_spill] sm:$0xff] }
 0x27a   : > { %6861 = vst [vmem:[#allocation106_spill] sm:$0xff] %v4653_v42  ;;  %v4656_v27 = vadd.f32 %v1088_v49, %v4510_v15  ;;  %v1145_v30 = vadd.f32 %v1127_v57, %v4516_v60  ;;  %v748_v12 = vmul.f32 %v4662_v43, %v4449_v48  ;;  %v4670_v59 = vmul.f32 %v4347_v10, %v4593_v8  ;;  %v3284_v11 = vpop.f32.mrb[59].mxu0 }
 0x27b   : > { %6858 = vst [vmem:[#allocation47_spill] sm:$0xff] %v4641_v63  ;;  %6859 = vst [vmem:[#allocation104_spill] sm:$0xff] %v4644_v37  ;;  %v4674_v15 = vmul.f32 %v3927_v9, %v4633_v46  ;;  %v4678_v60 = vmul.f32 %v4012_v19, %v4633_v46  ;;  %v1295_v49 = vadd.f32 %v4341_v51, %v1254_v23  ;;  %v4722_v32 = vpop.f32.mrb[60].mxu0 }
 0x27c   : > { %6860 = vst [vmem:[#allocation105_spill] sm:$0xff] %v4651_v22  ;;  %6862 = vst [vmem:[#allocation107_spill] sm:$0xff] %v4670_v59  ;;  %v1416_v39 = vadd.f32 %v1398_v54, %v1375_v55  ;;  %v4683_v48 = vmul.f32 %v4104_v2, %v4633_v46  ;;  %v4687_v13 = vmul.f32 %v4314_v25, %v4633_v46  ;;  %v4700_v55 = vld [vmem:[#allocation3 + $0xa9] sm:$0xff] }
 0x27d   : > { %6863 = vst [vmem:[#allocation108_spill] sm:$0xff] %v4674_v15  ;;  %v1214_v57 = vadd.f32 %v6864_v45, %v1145_v30  ;;  %v1376_v22 = vadd.f32 %v1358_v24, %v1335_v18  ;;  %v1399_v59 = vmul.f32 %v4416_v50, %v4633_v46  ;;  %v4694_v8 = vmul.f32 %v3938_v20, %v4653_v42  ;;  %v6868_v54 = vld [vmem:[#allocation56_spill] sm:$0xff] }
 0x27e   : > { %v4698_v51 = vmul.f32 %v4016_v33, %v4653_v42  ;;  %6867 = vst [vmem:[#allocation110_spill] sm:$0xff] %v4700_v55  ;;  %v4706_v30 = vld [vmem:[%s6585_s7] ss:$0 sm:$0xff]  ;;  %v749_v18 = vmul.f32 %v4662_v43, %v4487_v1  ;;  %v750_v11 = vmul.f32 %v4662_v43, %v4501_v47  ;;  %v1336_v45 = vadd.f32 %v4432_v28, %v1295_v49 }
 0x27f   : > { %6865 = vst [vmem:[#allocation33_spill] sm:$0xff] %v4694_v8  ;;  %v1255_v23 = vadd.f32 %v6868_v54, %v1214_v57  ;;  %v797_v24 = vadd.f32 %v4706_v30, %v748_v12  ;;  %v752_v57 = vmul.f32 %v4662_v43, %v658_v53  ;;  %v753_v54 = vmul.f32 %v4662_v43, %v663_v41  ;;  %v3287_v41 = vpop.f32.mrb[61].mxu0  ;;  %v6870_v15 = vld [vmem:[#allocation12_spill] sm:$0xff] }
 0x280   : > { %6866 = vst [vmem:[#allocation109_spill] sm:$0xff] %v4698_v51  ;;  %v751_v51 = vmul.f32 %v4662_v43, %v4540_v21  ;;  %v1400_v8 = vmul.f32 %v4416_v50, %v4700_v55  ;;  %v798_v12 = vadd.f32 %v4706_v30, %v749_v18  ;;  %v799_v1 = vadd.f32 %v4706_v30, %v750_v11  ;;  %v4732_v46 = vpop.f32.mrb[62].mxu0 }
 0x281   : > { %v839_v0 = vmax.f32 %v797_v24, 0.0  ;;  %v1296_v47 = vadd.f32 %v4389_v7, %v1255_v23  ;;  %v801_v21 = vadd.f32 %v4706_v30, %v752_v57  ;;  %v802_v53 = vadd.f32 %v4706_v30, %v753_v54  ;;  %v3288_v57 = vpop.f32.mrb[63].mxu0 }
 0x282   : > { %v800_v28 = vadd.f32 %v4706_v30, %v751_v51  ;;  %v1417_v49 = vadd.f32 %v1399_v59, %v1376_v22  ;;  %v4730_v24 = vmul.f32 %v4148_v29, %v4653_v42  ;;  %v840_v18 = vmax.f32 %v798_v12, 0.0  ;;  %v3501_v59 = vld [vmem:[%s3837_s27] ss:$0 sm:$0xff] }
 0x283   : > { %881 = vst [vmem:[#allocation3 + $0xb8] sm:$0xff] %v839_v0  ;;  %v841_v11 = vmax.f32 %v799_v1, 0.0  ;;  %v1377_v7 = vadd.f32 %v4613_v44, %v1336_v45  ;;  %v843_v51 = vmax.f32 %v801_v21, 0.0  ;;  %v4735_v40 = vmax.f32 %v802_v53, 0.0  ;;  %v4752_v44 = vld [vmem:[#allocation3 + $0xaa] sm:$0xff] }
 0x284   : > { %6869 = vst [vmem:[#allocation56_spill] sm:$0xff] %v4730_v24  ;;  %v842_v23 = vmax.f32 %v800_v28, 0.0  ;;  %v4738_v54 = vadd.f32 %v6870_v15, %v1416_v39  ;;  %v4742_v22 = vmul.f32 %v4347_v10, %v4653_v42  ;;  %v4746_v0 = vmul.f32 %v3501_v59, %v4538_v4  ;;  %6874 = vst [vmem:[#allocation113_spill] sm:$0xff] %v4752_v44  ;;  %v6875_v4 = vld [vmem:[#allocation17_spill] sm:$0xff]  ;;  %v6883_v24 = vld [vmem:[#allocation26_spill] sm:$0xff] }
 0x285   : > { %v4750_v12 = vmul.f32 %v3927_v9, %v4700_v55  ;;  %882 = vst [vmem:[#allocation3 + $0xc0] sm:$0xff] %v840_v18  ;;  %883 = vst [vmem:[#allocation3 + $0xc8] sm:$0xff] %v841_v11  ;;  %v1418_v45 = vadd.f32 %v1400_v8, %v1377_v7  ;;  %v1337_v15 = vadd.f32 %v4557_v38, %v1296_v47 }
 0x286   : > { %6871 = vst [vmem:[#allocation12_spill] sm:$0xff] %v4738_v54  ;;  %6872 = vst [vmem:[#allocation111_spill] sm:$0xff] %v4742_v22  ;;  %v1089_v39 = vmul.f32 %v4114_v31, %v840_v18  ;;  %v1128_v1 = vmul.f32 %v4214_v17, %v840_v18  ;;  %v4759_v28 = vadd.f32 %v6875_v4, %v1417_v49  ;;  %v4794_v4 = vpop.f32.mrb[64].mxu0  ;;  %v6885_v22 = vld [vmem:[#allocation46_spill] sm:$0xff] }
 0x287   : > { %6873 = vst [vmem:[#allocation112_spill] sm:$0xff] %v4750_v12  ;;  %884 = vst [vmem:[#allocation3 + $0xd0] sm:$0xff] %v842_v23  ;;  %v4763_v9 = vmul.f32 %v4012_v19, %v4700_v55  ;;  %v4767_v8 = vmul.f32 %v4104_v2, %v4700_v55  ;;  %v1361_v38 = vmul.f32 %v4314_v25, %v4700_v55  ;;  %v3291_v54 = vpop.f32.mrb[65].mxu0 }
 0x288   : > { %885 = vst [vmem:[#allocation3 + $0xd8] sm:$0xff] %v843_v51  ;;  %886 = vst [vmem:[#allocation3 + $0xe0] sm:$0xff] %v4735_v40  ;;  %v4773_v47 = vmul.f32 %v3938_v20, %v4752_v44  ;;  %v4777_v21 = vmul.f32 %v4016_v33, %v4752_v44  ;;  %v1146_v53 = vadd.f32 %v1128_v1, %v4535_v6 }
 0x289   : > { %6876 = vst [vmem:[#allocation17_spill] sm:$0xff] %v4759_v28  ;;  %6877 = vst [vmem:[#allocation114_spill] sm:$0xff] %v4763_v9  ;;  %v1129_v41 = vmul.f32 %v4214_v17, %v841_v11  ;;  %v4783_v49 = vmul.f32 %v4148_v29, %v4752_v44  ;;  %v4787_v7 = vmul.f32 %v4347_v10, %v4752_v44  ;;  %v4860_v9 = vld [vmem:[%s3837_s27 + $0x7] ss:$0 sm:$0xff] }
 0x28a   : > { %6878 = vst [vmem:[#allocation115_spill] sm:$0xff] %v4773_v47  ;;  %6879 = vst [vmem:[#allocation116_spill] sm:$0xff] %v4777_v21  ;;  %v1107_v23 = vadd.f32 %v1089_v39, %v4533_v36  ;;  %v4792_v57 = vmul.f32 %v4662_v43, %v4666_v52  ;;  %v4797_v6 = vadd.f32 %v6883_v24, %v1418_v45  ;;  %v4808_v39 = vld [vmem:[%s3837_s27 + $0xc] ss:$0 sm:$0xff]  ;;  %v6891_v47 = vld [vmem:[#allocation55_spill] sm:$0xff] }
 0x28b   : > { %6880 = vst [vmem:[#allocation117_spill] sm:$0xff] %v4783_v49  ;;  %6881 = vst [vmem:[#allocation118_spill] sm:$0xff] %v4787_v7  ;;  %v1378_v1 = vadd.f32 %v4687_v13, %v1337_v15  ;;  %v1215_v28 = vadd.f32 %v6885_v22, %v1146_v53  ;;  %v1147_v49 = vadd.f32 %v1129_v41, %v4656_v27  ;;  %v3502_v7 = vld [vmem:[%s3837_s27 + $0x6] ss:$0 sm:$0xff]  ;;  %v4816_v13 = vpop.f32.mrb[66].mxu0  ;;  %v6890_v41 = vld [vmem:[#allocation71_spill] sm:$0xff] }
 0x28c   : > { %6882 = vst [vmem:[#allocation119_spill] sm:$0xff] %v4794_v4  ;;  %6884 = vst [vmem:[#allocation26_spill] sm:$0xff] %v4797_v6  ;;  %v4802_v44 = vmul.f32 %v3501_v59, %v840_v18  ;;  %v4805_v36 = vmul.f32 %v3502_v7, %v840_v18  ;;  %v4811_v52 = vmul.f32 %v4808_v39, %v840_v18  ;;  %v3292_v15 = vpop.f32.mrb[67].mxu0  ;;  %v4828_v53 = vld [vmem:[#allocation3 + $0xb1] sm:$0xff]  ;;  %v4841_v21 = vld [vmem:[%s3837_s27 + $0x12] ss:$0 sm:$0xff] }
 0x28d   : > { %v4814_v24 = vmul.f32 %v3909_v62, %v840_v18  ;;  %6886 = vst [vmem:[#allocation46_spill] sm:$0xff] %v4816_v13  ;;  %v4818_v22 = vmul.f32 %v3501_v59, %v841_v11  ;;  %v4820_v27 = vmul.f32 %v3502_v7, %v841_v11  ;;  %v4823_v54 = vmul.f32 %v4808_v39, %v841_v11  ;;  %v4835_v42 = vld [vmem:[#allocation3 + $0xb2] sm:$0xff]  ;;  %v4888_v4 = vpop.f32.mrb[68].mxu0 }
 0x28e   : > { %v4826_v45 = vmul.f32 %v3909_v62, %v841_v11  ;;  %6889 = vst [vmem:[#allocation122_spill] sm:$0xff] %v4828_v53  ;;  %v1256_v6 = vadd.f32 %v6890_v41, %v1215_v28  ;;  %v1090_v18 = vmul.f32 %v4114_v31, %v841_v11  ;;  %v1216_v55 = vadd.f32 %v6891_v47, %v1147_v49  ;;  %v6893_v11 = vld [vmem:[#allocation79_spill] sm:$0xff]  ;;  %v6894_v47 = vld [vmem:[#allocation88_spill] sm:$0xff] }
 0x28f   : > { %6887 = vst [vmem:[#allocation120_spill] sm:$0xff] %v4823_v54  ;;  %v4833_v59 = vmul.f32 %v3502_v7, %v843_v51  ;;  %6892 = vst [vmem:[#allocation71_spill] sm:$0xff] %v4835_v42  ;;  %v4838_v12 = vmul.f32 %v4808_v39, %v843_v51  ;;  %v4844_v62 = vmul.f32 %v4841_v21, %v843_v51  ;;  %v3295_v54 = vpop.f32.mrb[69].mxu0 }
 0x290   : > { %6888 = vst [vmem:[#allocation121_spill] sm:$0xff] %v4826_v45  ;;  %v4847_v15 = vmul.f32 %v4114_v31, %v843_v51  ;;  %v1130_v28 = vmul.f32 %v4214_v17, %v843_v51  ;;  %v1257_v41 = vadd.f32 %v6893_v11, %v1216_v55  ;;  %v1297_v49 = vadd.f32 %v6894_v47, %v1256_v6  ;;  %v4876_v6 = vld [vmem:[#allocation3 + $0xc1] sm:$0xff]  ;;  %v4878_v11 = vld [vmem:[#allocation3 + $0xc9] sm:$0xff] }
 0x291   : > { %v4853_v34 = vmul.f32 %v3502_v7, %v4735_v40  ;;  %v4857_v13 = vmul.f32 %v4808_v39, %v4735_v40  ;;  %6896 = vst [vmem:[#allocation79_spill] sm:$0xff] %v4860_v9  ;;  %v4864_v14 = vmul.f32 %v4860_v9, %v4828_v53  ;;  %v4868_v51 = vmul.f32 %v4012_v19, %v4828_v53 }
 0x292   : > { %v4872_v55 = vmul.f32 %v4104_v2, %v4828_v53  ;;  %v1401_v7 = vmul.f32 %v4416_v50, %v4828_v53  ;;  %6899 = vst [vmem:[#allocation124_spill] sm:$0xff] %v4878_v11  ;;  %v1362_v47 = vmul.f32 %v4314_v25, %v4828_v53  ;;  %v1298_v9 = vadd.f32 %v4552_v5, %v1257_v41  ;;  %v4905_v41 = vpop.f32.mrb[70].mxu0 }
 0x293   : > { %6895 = vst [vmem:[#allocation55_spill] sm:$0xff] %v4857_v13  ;;  %6897 = vst [vmem:[#allocation88_spill] sm:$0xff] %v4864_v14  ;;  %v4884_v14 = vmul.f32 %v3938_v20, %v4835_v42  ;;  %v4892_v37 = vmul.f32 %v4016_v33, %v4835_v42  ;;  %v4896_v13 = vmul.f32 %v4148_v29, %v4835_v42 }
 0x294   : > { %6898 = vst [vmem:[#allocation123_spill] sm:$0xff] %v4868_v51  ;;  %v1338_v51 = vadd.f32 %v4608_v35, %v1297_v49  ;;  %v1419_v45 = vadd.f32 %v1401_v7, %v1378_v1  ;;  %v1148_v53 = vadd.f32 %v1130_v28, %v1107_v23  ;;  %v1402_v20 = vmul.f32 %v4416_v50, %v4876_v6  ;;  %v4900_v35 = vld [vmem:[#allocation3 + $0xc2] sm:$0xff]  ;;  %v3296_v28 = vpop.f32.mrb[71].mxu0 }
 0x295   : > { %6900 = vst [vmem:[#allocation125_spill] sm:$0xff] %v4884_v14  ;;  %6901 = vst [vmem:[#allocation126_spill] sm:$0xff] %v4896_v13  ;;  %v1339_v5 = vadd.f32 %v4683_v48, %v1298_v9  ;;  %v1403_v1 = vmul.f32 %v4416_v50, %v4878_v11  ;;  %v4909_v49 = vmul.f32 %v4347_v10, %v4835_v42  ;;  %v6904_v7 = vld [vmem:[#allocation70_spill] sm:$0xff]  ;;  %v6908_v14 = vld [vmem:[#allocation49_spill] sm:$0xff] }
 0x296   : > { %v1379_v63 = vadd.f32 %v1361_v38, %v1338_v51  ;;  %6902 = vst [vmem:[#allocation127_spill] sm:$0xff] %v4900_v35  ;;  %v1217_v23 = vadd.f32 %v6904_v7, %v1148_v53  ;;  %v1108_v38 = vadd.f32 %v1090_v18, %v4647_v16  ;;  %v1131_v54 = vmul.f32 %v4214_v17, %v4735_v40  ;;  %v6905_v53 = vld [vmem:[#allocation87_spill] sm:$0xff]  ;;  %v4930_v28 = vld [vmem:[#allocation3 + $0xd9] sm:$0xff] }
 0x297   : > { %6903 = vst [vmem:[#allocation128_spill] sm:$0xff] %v4909_v49  ;;  %v4917_v48 = vmul.f32 %v4012_v19, %v4876_v6  ;;  %v4921_v9 = vmul.f32 %v4104_v2, %v4876_v6  ;;  %v1380_v13 = vadd.f32 %v1362_v47, %v1339_v5  ;;  %v1363_v49 = vmul.f32 %v4314_v25, %v4876_v6  ;;  %v6906_v19 = vld [vmem:[#allocation36_spill] sm:$0xff]  ;;  %v6911_v5 = vld [vmem:[#allocation78_spill] sm:$0xff] }
 0x298   : > { %v1420_v51 = vadd.f32 %v1402_v20, %v1379_v63  ;;  %v4927_v16 = vmul.f32 %v4016_v33, %v4900_v35  ;;  %v1258_v18 = vadd.f32 %v6905_v53, %v1217_v23  ;;  %v1149_v7 = vadd.f32 %v1131_v54, %v1108_v38  ;;  %v6912_v38 = vld [vmem:[#allocation58_spill] sm:$0xff] }
 0x299   : > { %v4933_v42 = vadd.f32 %v6906_v19, %v1419_v45  ;;  %v4940_v63 = vmul.f32 %v4148_v29, %v4900_v35  ;;  %v1421_v47 = vadd.f32 %v1403_v1, %v1380_v13  ;;  %v4944_v33 = vmul.f32 %v4347_v10, %v4900_v35 }
 0x29a   : > { %v4936_v2 = vadd.f32 %v6908_v14, %v1420_v51  ;;  %v1364_v20 = vmul.f32 %v4314_v25, %v4878_v11  ;;  %v1218_v23 = vadd.f32 %v6911_v5, %v1149_v7  ;;  %v1299_v45 = vadd.f32 %v4604_v58, %v1258_v18  ;;  %v4959_v51 = vpop.f32.mrb[72].mxu0 }
 0x29b   : > { %6907 = vst [vmem:[#allocation70_spill] sm:$0xff] %v4933_v42  ;;  %6910 = vst [vmem:[#allocation36_spill] sm:$0xff] %v4944_v33  ;;  %v4951_v54 = vadd.f32 %v6912_v38, %v1421_v47  ;;  %v1404_v14 = vmul.f32 %v4416_v50, %v4930_v28  ;;  %v803_v13 = vadd.f32 %v4706_v30, %v4792_v57  ;;  %v3299_v19 = vpop.f32.mrb[73].mxu0 }
 0x29c   : > { %6909 = vst [vmem:[#allocation87_spill] sm:$0xff] %v4936_v2  ;;  %v755_v1 = vmul.f32 %v4662_v43, %v4722_v32  ;;  %v1259_v53 = vadd.f32 %v4548_v3, %v1218_v23  ;;  %v1340_v7 = vadd.f32 %v4767_v8, %v1299_v45  ;;  %v990_v58 = vadd.f32 %v4805_v36, %v4596_v56  ;;  %v4972_v38 = vpop.f32.mrb[74].mxu0  ;;  %v6914_v45 = vld [vmem:[#allocation72_spill] sm:$0xff] }
 0x29d   : > { %6913 = vst [vmem:[#allocation49_spill] sm:$0xff] %v4951_v54  ;;  %v992_v18 = vadd.f32 %v4833_v59, %v4802_v44  ;;  %v845_v47 = vmax.f32 %v803_v13, 0.0  ;;  %v1029_v57 = vadd.f32 %v4811_v52, %v4529_v61  ;;  %v1068_v32 = vadd.f32 %v4814_v24, %v4531_v26  ;;  %v3300_v36 = vpop.f32.mrb[75].mxu0 }
 0x29e   : > { %v804_v5 = vadd.f32 %v4706_v30, %v755_v1  ;;  %v1381_v3 = vadd.f32 %v1363_v49, %v1340_v7  ;;  %v1300_v8 = vadd.f32 %v4678_v60, %v1259_v53  ;;  %v1031_v56 = vadd.f32 %v4838_v12, %v990_v58  ;;  %v6916_v1 = vld [vmem:[#allocation120_spill] sm:$0xff]  ;;  %v5001_v19 = vpop.f32.mrb[76].mxu0 }
 0x29f   : > { %v756_v44 = vmul.f32 %v4662_v43, %v4732_v46  ;;  %887 = vst [vmem:[#allocation3 + $0xe8] sm:$0xff] %v845_v47  ;;  %v1070_v23 = vadd.f32 %v4844_v62, %v1029_v57  ;;  %v1109_v61 = vadd.f32 %v4847_v15, %v1068_v32  ;;  %v991_v26 = vadd.f32 %v4820_v27, %v4746_v0  ;;  %v6917_v47 = vld [vmem:[#allocation91_spill] sm:$0xff] }
 0x2a0   : > { %v846_v59 = vmax.f32 %v804_v5, 0.0  ;;  %v1053_v52 = vmul.f32 %v4841_v21, %v4735_v40  ;;  %v1422_v24 = vadd.f32 %v1404_v14, %v1381_v3  ;;  %v993_v12 = vadd.f32 %v4853_v34, %v4818_v22  ;;  %v6915_v14 = vld [vmem:[#allocation47_spill] sm:$0xff] }
 0x2a1   : > { %v805_v60 = vadd.f32 %v4706_v30, %v756_v44  ;;  %v1341_v27 = vadd.f32 %v4872_v55, %v1300_v8  ;;  %v1030_v53 = vadd.f32 %v6916_v1, %v6915_v14  ;;  %v6919_v55 = vld [vmem:[#allocation55_spill] sm:$0xff]  ;;  %v6921_v44 = vld [vmem:[#allocation86_spill] sm:$0xff]  ;;  %v5041_v14 = vld [vmem:[%s3837_s27 + $0xe] ss:$0 sm:$0xff] }
 0x2a2   : > { %888 = vst [vmem:[#allocation3 + $0xf0] sm:$0xff] %v846_v59  ;;  %v1015_v46 = vmul.f32 %v4808_v39, %v846_v59  ;;  %v1054_v49 = vmul.f32 %v4841_v21, %v846_v59  ;;  %v1093_v62 = vmul.f32 %v4114_v31, %v846_v59  ;;  %v1132_v15 = vmul.f32 %v4214_v17, %v846_v59  ;;  %v5009_v8 = vld [vmem:[#allocation3 + $0xca] sm:$0xff] }
 0x2a3   : > { %v1491_v0 = vadd.f32 %v6914_v45, %v1422_v24  ;;  %v847_v13 = vmax.f32 %v805_v60, 0.0  ;;  %v1032_v32 = vadd.f32 %v6919_v55, %v991_v26  ;;  %6920 = vst [vmem:[#allocation58_spill] sm:$0xff] %v5009_v8  ;;  %v6922_v59 = vld [vmem:[#allocation104_spill] sm:$0xff]  ;;  %v1071_v24 = vadd.f32 %v1053_v52, %v1030_v53  ;;  %v5024_v45 = vld [vmem:[%s3837_s27 + $0xd] ss:$0 sm:$0xff]  ;;  %v6928_v55 = vld [vmem:[#allocation102_spill] sm:$0xff] }
 0x2a4   : > { %v4995_v7 = vadd.f32 %v1015_v46, %v992_v18  ;;  %v4997_v34 = vadd.f32 %v1054_v49, %v1031_v56  ;;  %v4999_v22 = vadd.f32 %v1093_v62, %v1070_v23  ;;  %v1150_v58 = vadd.f32 %v1132_v15, %v1109_v61  ;;  %v3303_v18 = vpop.f32.mrb[77].mxu0  ;;  %v6923_v23 = vld [vmem:[#allocation121_spill] sm:$0xff] }
 0x2a5   : > { %v5004_v5 = vadd.f32 %v6917_v47, %v1491_v0  ;;  %889 = vst [vmem:[#allocation3 + $0xf8] sm:$0xff] %v847_v13  ;;  %v1016_v57 = vmul.f32 %v4808_v39, %v847_v13  ;;  %v1055_v3 = vmul.f32 %v4841_v21, %v847_v13  ;;  %v1092_v56 = vmul.f32 %v4114_v31, %v4735_v40  ;;  %v5016_v39 = vpop.f32.mrb[78].mxu0  ;;  %v5031_v0 = vld [vmem:[%s3837_s27 + $0x13] ss:$0 sm:$0xff] }
 0x2a6   : > { %v1219_v36 = vadd.f32 %v6921_v44, %v1150_v58  ;;  %v1069_v61 = vadd.f32 %v6923_v23, %v6922_v59  ;;  %v1177_v60 = vld [vmem:[#allocation3 + $0xe1] sm:$0xff]  ;;  %v1382_v26 = vadd.f32 %v1364_v20, %v1341_v27  ;;  %v1094_v62 = vmul.f32 %v4114_v31, %v847_v13  ;;  %v3304_v15 = vpop.f32.mrb[79].mxu0 }
 0x2a7   : > { %6918 = vst [vmem:[#allocation78_spill] sm:$0xff] %v5004_v5  ;;  %v5018_v46 = vadd.f32 %v1016_v57, %v993_v12  ;;  %v5020_v49 = vadd.f32 %v1055_v3, %v1032_v32  ;;  %v5028_v40 = vmul.f32 %v5024_v45, %v4878_v11  ;;  %v5035_v52 = vmul.f32 %v5031_v0, %v4878_v11  ;;  %v6924_v12 = vld [vmem:[#allocation119_spill] sm:$0xff]  ;;  %v1450_v57 = vld [vmem:[#allocation3 + $0xda] sm:$0xff] }
 0x2a8   : > { %v1133_v20 = vmul.f32 %v4214_v17, %v847_v13  ;;  %v757_v27 = vmul.f32 %v4662_v43, %v6924_v12  ;;  %v5045_v31 = vmul.f32 %v5041_v14, %v5009_v8  ;;  %v5049_v1 = vmul.f32 %v4148_v29, %v5009_v8  ;;  %v6926_v17 = vld [vmem:[#allocation79_spill] sm:$0xff]  ;;  %v6929_v12 = vld [vmem:[#allocation114_spill] sm:$0xff] }
 0x2a9   : > { %v5053_v53 = vmul.f32 %v4347_v10, %v5009_v8  ;;  %v1405_v58 = vmul.f32 %v4416_v50, %v1177_v60  ;;  %v5058_v13 = vmul.f32 %v6926_v17, %v4930_v28  ;;  %v5062_v47 = vmul.f32 %v5024_v45, %v4930_v28  ;;  %v1451_v2 = vld [vmem:[#allocation3 + $0xe2] sm:$0xff] }
 0x2aa   : > { %v1260_v32 = vadd.f32 %v6928_v55, %v1219_v36  ;;  %v1110_v29 = vadd.f32 %v1092_v56, %v1069_v61  ;;  %v5067_v3 = vmul.f32 %v5031_v0, %v4930_v28  ;;  %v1365_v18 = vmul.f32 %v4314_v25, %v4930_v28  ;;  %v6930_v36 = vld [vmem:[#allocation46_spill] sm:$0xff]  ;;  %v5079_v61 = vpop.f32.mrb[80].mxu0  ;;  %v5082_v55 = vld [vmem:[%s3837_s27 + $0x8] ss:$0 sm:$0xff] }
 0x2ab   : > { %6925 = vst [vmem:[#allocation72_spill] sm:$0xff] %v5053_v53  ;;  %6927 = vst [vmem:[#allocation47_spill] sm:$0xff] %v5058_v13  ;;  %v1423_v44 = vadd.f32 %v1405_v58, %v1382_v26  ;;  %v5071_v59 = vadd.f32 %v1094_v62, %v1071_v24  ;;  %v806_v33 = vadd.f32 %v4706_v30, %v757_v27  ;;  %v6935_v24 = vld [vmem:[#allocation80_spill] sm:$0xff]  ;;  %v5096_v27 = vld [vmem:[%s3837_s27 + $0x14] ss:$0 sm:$0xff] }
 0x2ac   : > { %v1151_v23 = vadd.f32 %v1133_v20, %v1110_v29  ;;  %v5073_v15 = vld [vmem:[#allocation3 + $0xf1] sm:$0xff]  ;;  %v1301_v53 = vadd.f32 %v6929_v12, %v1260_v32  ;;  %v758_v56 = vmul.f32 %v4662_v43, %v6930_v36  ;;  %6931 = vst [vmem:[#allocation120_spill] sm:$0xff] %v5079_v61  ;;  %6932 = vst [vmem:[#allocation91_spill] sm:$0xff] %v5082_v55  ;;  %v3307_v20 = vpop.f32.mrb[81].mxu0  ;;  %v6947_v8 = vld [vmem:[#allocation90_spill] sm:$0xff] }
 0x2ad   : > { %v5085_v5 = vmul.f32 %v5082_v55, %v1450_v57  ;;  %v5088_v28 = vmul.f32 %v5041_v14, %v1450_v57  ;;  %v5091_v26 = vadd.f32 %v6935_v24, %v1423_v44  ;;  %v759_v62 = vmul.f32 %v4662_v43, %v4888_v4  ;;  %v6936_v29 = vld [vmem:[#allocation48_spill] sm:$0xff]  ;;  %v5106_v54 = vpop.f32.mrb[82].mxu0  ;;  %v6938_v44 = vld [vmem:[#allocation89_spill] sm:$0xff] }
 0x2ae   : > { %v5099_v58 = vmul.f32 %v5096_v27, %v1450_v57  ;;  %v5102_v32 = vmul.f32 %v4347_v10, %v1450_v57  ;;  %v1220_v12 = vadd.f32 %v6936_v29, %v1151_v23  ;;  %v1342_v36 = vadd.f32 %v4921_v9, %v1301_v53  ;;  %6937 = vst [vmem:[#allocation104_spill] sm:$0xff] %v5106_v54  ;;  %v3308_v42 = vpop.f32.mrb[83].mxu0  ;;  %v6942_v23 = vld [vmem:[#allocation108_spill] sm:$0xff] }
 0x2af   : > { %6933 = vst [vmem:[#allocation55_spill] sm:$0xff] %v5085_v5  ;;  %6934 = vst [vmem:[#allocation86_spill] sm:$0xff] %v5088_v28  ;;  %v5109_v24 = vmul.f32 %v6938_v44, %v1450_v57  ;;  %v5112_v4 = vmul.f32 %v6926_v17, %v1177_v60  ;;  %v5115_v20 = vmul.f32 %v5024_v45, %v1177_v60  ;;  %v848_v53 = vmax.f32 %v806_v33, 0.0  ;;  %v6944_v33 = vld [vmem:[#allocation123_spill] sm:$0xff]  ;;  %v1452_v35 = vld [vmem:[#allocation3 + $0xf2] sm:$0xff] }
 0x2b0   : > { %v1406_v5 = vmul.f32 %v4416_v50, %v5073_v15  ;;  %v1261_v29 = vadd.f32 %v6942_v23, %v1220_v12  ;;  %v1383_v9 = vadd.f32 %v1365_v18, %v1342_v36  ;;  %v807_v54 = vadd.f32 %v4706_v30, %v758_v56  ;;  %v5133_v12 = vld [vmem:[%s3837_s27 + $0x1] ss:$0 sm:$0xff]  ;;  %v6946_v28 = vld [vmem:[#allocation103_spill] sm:$0xff] }
 0x2b1   : > { %6939 = vst [vmem:[#allocation121_spill] sm:$0xff] %v5109_v24  ;;  %6940 = vst [vmem:[#allocation119_spill] sm:$0xff] %v5112_v4  ;;  %v5122_v57 = vmul.f32 %v5031_v0, %v1177_v60  ;;  %v1366_v24 = vmul.f32 %v4314_v25, %v1177_v60  ;;  %v808_v4 = vadd.f32 %v4706_v30, %v759_v62  ;;  %v6945_v36 = vld [vmem:[#allocation96_spill] sm:$0xff] }
 0x2b2   : > { %6941 = vst [vmem:[#allocation79_spill] sm:$0xff] %v5115_v20  ;;  %v760_v61 = vmul.f32 %v4662_v43, %v4905_v41  ;;  %v5129_v13 = vmul.f32 %v5082_v55, %v1451_v2  ;;  %v1424_v42 = vadd.f32 %v1406_v5, %v1383_v9  ;;  %890 = vst [vmem:[#allocation3 + $0x100] sm:$0xff] %v848_v53  ;;  %v849_v56 = vmax.f32 %v807_v54, 0.0  ;;  %v5143_v9 = vld [vmem:[%s3837_s27 + $0x18] ss:$0 sm:$0xff] }
 0x2b3   : > { %v1302_v18 = vadd.f32 %v6944_v33, %v1261_v29  ;;  %v1203_v60 = vmul.f32 %v5133_v12, %v6945_v36  ;;  %v850_v23 = vmax.f32 %v808_v4, 0.0  ;;  %v1204_v62 = vmul.f32 %v5133_v12, %v6946_v28  ;;  %v5149_v53 = vld [vmem:[%s3837_s27 + $0x1e] ss:$0 sm:$0xff] }
 0x2b4   : > { %6943 = vst [vmem:[#allocation102_spill] sm:$0xff] %v5129_v13  ;;  %v809_v41 = vadd.f32 %v4706_v30, %v760_v61  ;;  %v1493_v55 = vadd.f32 %v6947_v8, %v1424_v42  ;;  %891 = vst [vmem:[#allocation3 + $0x108] sm:$0xff] %v849_v56  ;;  %v1056_v5 = vmul.f32 %v4841_v21, %v849_v56  ;;  %v6949_v42 = vld [vmem:[#allocation57_spill] sm:$0xff] }
 0x2b5   : > { %v1095_v54 = vmul.f32 %v5143_v9, %v849_v56  ;;  %v761_v29 = vmul.f32 %v4662_v43, %v4959_v51  ;;  %6948 = vst [vmem:[#allocation114_spill] sm:$0xff] %v5149_v53  ;;  %v1134_v4 = vmul.f32 %v5149_v53, %v849_v56  ;;  %892 = vst [vmem:[#allocation3 + $0x110] sm:$0xff] %v850_v23 }
 0x2b6   : > { %v1057_v28 = vmul.f32 %v4841_v21, %v850_v23  ;;  %v1096_v61 = vmul.f32 %v5143_v9, %v850_v23  ;;  %v1135_v8 = vmul.f32 %v5149_v53, %v850_v23  ;;  %v1534_v33 = vadd.f32 %v6949_v42, %v1493_v55  ;;  %v6957_v42 = vld [vmem:[#allocation112_spill] sm:$0xff] }
 0x2b7   : > { %v1343_v36 = vadd.f32 %v5035_v52, %v1302_v18  ;;  %v5158_v13 = vadd.f32 %v1056_v5, %v4995_v7  ;;  %v5161_v51 = vadd.f32 %v1095_v54, %v4997_v34  ;;  %v1152_v56 = vadd.f32 %v1134_v4, %v4999_v22 }
 0x2b8   : > { %v5165_v20 = vadd.f32 %v1057_v28, %v5018_v46  ;;  %v5168_v21 = vadd.f32 %v1096_v61, %v5020_v49  ;;  %v1153_v23 = vadd.f32 %v1135_v8, %v5071_v59  ;;  %v5172_v55 = vmul.f32 %v5041_v14, %v1451_v2  ;;  %v6955_v28 = vld [vmem:[#allocation97_spill] sm:$0xff] }
 0x2b9   : > { %v5175_v7 = vmul.f32 %v5096_v27, %v1451_v2  ;;  %v5178_v34 = vmul.f32 %v4347_v10, %v1451_v2  ;;  %v851_v52 = vmax.f32 %v809_v41, 0.0  ;;  %v5181_v22 = vmul.f32 %v6938_v44, %v1451_v2  ;;  %v1179_v49 = vld [vmem:[#allocation3 + $0xf9] sm:$0xff]  ;;  %v6954_v41 = vld [vmem:[#allocation116_spill] sm:$0xff] }
 0x2ba   : > { %6950 = vst [vmem:[#allocation46_spill] sm:$0xff] %v5172_v55  ;;  %v5185_v46 = vmul.f32 %v5024_v45, %v5073_v15  ;;  %v1221_v18 = vadd.f32 %v1203_v60, %v1152_v56  ;;  %v1222_v59 = vadd.f32 %v1204_v62, %v1153_v23  ;;  %v5189_v5 = vmul.f32 %v5031_v0, %v5073_v15  ;;  %v6958_v23 = vld [vmem:[#allocation88_spill] sm:$0xff] }
 0x2bb   : > { %6951 = vst [vmem:[#allocation80_spill] sm:$0xff] %v5181_v22  ;;  %v1367_v54 = vmul.f32 %v4314_v25, %v5073_v15  ;;  %v5194_v4 = vmul.f32 %v5041_v14, %v1452_v35  ;;  %v1575_v2 = vadd.f32 %v6954_v41, %v1534_v33  ;;  %893 = vst [vmem:[#allocation3 + $0x118] sm:$0xff] %v851_v52  ;;  %v6959_v22 = vld [vmem:[#allocation4_spill] sm:$0xff]  ;;  %v6962_v33 = vld [vmem:[#allocation18_spill] sm:$0xff] }
 0x2bc   : > { %6952 = vst [vmem:[#allocation48_spill] sm:$0xff] %v5185_v46  ;;  %v5199_v61 = vadd.f32 %v6955_v28, %v5091_v26  ;;  %v1384_v60 = vadd.f32 %v1366_v24, %v1343_v36  ;;  %v1407_v62 = vmul.f32 %v4416_v50, %v1179_v49  ;;  %v810_v8 = vadd.f32 %v4706_v30, %v761_v29  ;;  %v6960_v46 = vld [vmem:[#allocation13_spill] sm:$0xff]  ;;  %v6961_v55 = vld [vmem:[#allocation8_spill] sm:$0xff] }
 0x2bd   : > { %6953 = vst [vmem:[#allocation89_spill] sm:$0xff] %v5194_v4  ;;  %v1262_v56 = vadd.f32 %v6957_v42, %v1221_v18  ;;  %v1263_v15 = vadd.f32 %v6958_v23, %v1222_v59  ;;  %v1524_v4 = vadd.f32 %v6960_v46, %v6959_v22  ;;  %v1525_v52 = vadd.f32 %v6962_v33, %v6961_v55  ;;  %v1180_v29 = vld [vmem:[#allocation3 + $0x109] sm:$0xff]  ;;  %v5219_v28 = vld [vmem:[%s3837_s27 + $0x2] ss:$0 sm:$0xff]  ;;  %v6965_v22 = vld [vmem:[#allocation101_spill] sm:$0xff] }
 0x2be   : > { %6956 = vst [vmem:[#allocation108_spill] sm:$0xff] %v5199_v61  ;;  %v5210_v41 = vmul.f32 %v5096_v27, %v1452_v35  ;;  %v5213_v26 = vmul.f32 %v4347_v10, %v1452_v35  ;;  %v1680_v24 = vmul.f32 %v6938_v44, %v1452_v35  ;;  %v1425_v36 = vadd.f32 %v1407_v62, %v1384_v60  ;;  %v6966_v55 = vld [vmem:[#allocation106_spill] sm:$0xff] }
 0x2bf   : > { %v1616_v18 = vadd.f32 %v4940_v63, %v1575_v2  ;;  %v1303_v59 = vadd.f32 %v4917_v48, %v1262_v56  ;;  %v1477_v46 = vmul.f32 %v5219_v28, %v6965_v22  ;;  %v1478_v42 = vmul.f32 %v5219_v28, %v6966_v55  ;;  %v6967_v10 = vld [vmem:[#allocation34_spill] sm:$0xff]  ;;  %v6968_v48 = vld [vmem:[#allocation28_spill] sm:$0xff] }
 0x2c0   : > { %6963 = vst [vmem:[#allocation123_spill] sm:$0xff] %v5210_v41  ;;  %6964 = vst [vmem:[#allocation96_spill] sm:$0xff] %v5213_v26  ;;  %v1368_v23 = vmul.f32 %v4314_v25, %v1179_v49  ;;  %v1494_v33 = vadd.f32 %v6967_v10, %v1425_v36  ;;  %v1304_v35 = vadd.f32 %v5028_v40, %v1263_v15  ;;  %v852_v60 = vmax.f32 %v810_v8, 0.0  ;;  %v6969_v56 = vld [vmem:[#allocation38_spill] sm:$0xff]  ;;  %v6970_v41 = vld [vmem:[#allocation33_spill] sm:$0xff] }
 0x2c1   : > { %v1344_v62 = vadd.f32 %v5067_v3, %v1303_v59  ;;  %v1408_v63 = vmul.f32 %v4416_v50, %v1180_v29  ;;  %v1565_v2 = vadd.f32 %v6968_v48, %v1524_v4  ;;  %v1566_v61 = vadd.f32 %v6969_v56, %v1525_v52  ;;  %v1453_v3 = vld [vmem:[#allocation3 + $0xfa] sm:$0xff]  ;;  %v6974_v48 = vld [vmem:[#allocation52_spill] sm:$0xff] }
 0x2c2   : > { %v1535_v26 = vadd.f32 %v6970_v41, %v1494_v33  ;;  %v1181_v22 = vld [vmem:[#allocation3 + $0x111] sm:$0xff]  ;;  %v1345_v55 = vadd.f32 %v5122_v57, %v1304_v35  ;;  %894 = vst [vmem:[#allocation3 + $0x120] sm:$0xff] %v852_v60  ;;  %v1097_v25 = vmul.f32 %v5143_v9, %v852_v60  ;;  %v1136_v36 = vmul.f32 %v5149_v53, %v852_v60  ;;  %v6972_v15 = vld [vmem:[#allocation110_spill] sm:$0xff] }
 0x2c3   : > { %v5237_v40 = vmul.f32 %v5024_v45, %v1179_v49  ;;  %v1385_v8 = vadd.f32 %v1367_v54, %v1344_v62  ;;  %v1205_v4 = vmul.f32 %v5133_v12, %v6972_v15  ;;  %v1246_v52 = vmul.f32 %v6926_v17, %v4876_v6  ;;  %v6975_v56 = vld [vmem:[#allocation61_spill] sm:$0xff] }
 0x2c4   : > { %v5244_v41 = vmul.f32 %v5031_v0, %v1179_v49  ;;  %v1576_v57 = vadd.f32 %v4892_v37, %v1535_v26  ;;  %v1386_v59 = vadd.f32 %v1368_v23, %v1345_v55  ;;  %v1409_v10 = vmul.f32 %v4416_v50, %v1181_v22  ;;  %v5262_v50 = vld [vmem:[%s3837_s27 + $0x1a] ss:$0 sm:$0xff]  ;;  %v6976_v55 = vld [vmem:[#allocation76_spill] sm:$0xff] }
 0x2c5   : > { %6971 = vst [vmem:[#allocation103_spill] sm:$0xff] %v5237_v40  ;;  %v1657_v45 = vadd.f32 %v5102_v32, %v1616_v18  ;;  %v1426_v33 = vadd.f32 %v1408_v63, %v1385_v8  ;;  %v5250_v54 = vadd.f32 %v1097_v25, %v5158_v13  ;;  %v1154_v35 = vadd.f32 %v1136_v36, %v5161_v51  ;;  %v1454_v13 = vld [vmem:[#allocation3 + $0x10a] sm:$0xff] }
 0x2c6   : > { %v5254_v60 = vmul.f32 %v5041_v14, %v1453_v3  ;;  %v1427_v62 = vadd.f32 %v1409_v10, %v1386_v59  ;;  %v1606_v49 = vadd.f32 %v6974_v48, %v1565_v2  ;;  %v1607_v37 = vadd.f32 %v6975_v56, %v1566_v61  ;;  %v6977_v63 = vld [vmem:[#allocation84_spill] sm:$0xff]  ;;  %v5279_v59 = vld [vmem:[%s3837_s27 + $0x19] ss:$0 sm:$0xff]  ;;  %v5301_v56 = vld [vmem:[#allocation3 + $0x7b] sm:$0xff] }
 0x2c7   : > { %v5259_v26 = vmul.f32 %v5096_v27, %v1453_v3  ;;  %v5265_v32 = vmul.f32 %v5262_v50, %v1453_v3  ;;  %v1495_v18 = vadd.f32 %v1477_v46, %v1426_v33  ;;  %v1223_v51 = vadd.f32 %v1205_v4, %v1154_v35  ;;  %v6978_v2 = vld [vmem:[#allocation16_spill] sm:$0xff]  ;;  %v6982_v10 = vld [vmem:[#allocation95_spill] sm:$0xff] }
 0x2c8   : > { %6973 = vst [vmem:[#allocation90_spill] sm:$0xff] %v5254_v60  ;;  %v1617_v14 = vadd.f32 %v5049_v1, %v1576_v57  ;;  %v1647_v23 = vadd.f32 %v6976_v55, %v1606_v49  ;;  %v1648_v25 = vadd.f32 %v6977_v63, %v1607_v37  ;;  %v1671_v61 = vmul.f32 %v6938_v44, %v6978_v2  ;;  %v1455_v4 = vld [vmem:[#allocation3 + $0x112] sm:$0xff]  ;;  %v5299_v49 = vld [vmem:[%s3837_s27 + $0x1b] ss:$0 sm:$0xff]  ;;  %v5310_v63 = vld [vmem:[%s3837_s27 + $0x21] ss:$0 sm:$0xff] }
 0x2c9   : > { %v5272_v36 = vadd.f32 %v1680_v24, %v1657_v45  ;;  %v1681_v8 = vmul.f32 %v6938_v44, %v1453_v3  ;;  %v5276_v15 = vmul.f32 %v5031_v0, %v1180_v29  ;;  %v5282_v46 = vmul.f32 %v5279_v59, %v1180_v29  ;;  %v6983_v45 = vld [vmem:[#allocation115_spill] sm:$0xff]  ;;  %v6985_v37 = vld [vmem:[#allocation5_spill] sm:$0xff] }
 0x2ca   : > { %v5285_v1 = vmul.f32 %v5096_v27, %v1454_v13  ;;  %v1496_v57 = vadd.f32 %v1478_v42, %v1427_v62  ;;  %v1688_v33 = vadd.f32 %v6982_v10, %v1647_v23  ;;  %v1689_v24 = vadd.f32 %v1671_v61, %v1648_v25  ;;  %v6986_v55 = vld [vmem:[#allocation9_spill] sm:$0xff]  ;;  %v6990_v61 = vld [vmem:[#allocation15_spill] sm:$0xff] }
 0x2cb   : > { %6979 = vst [vmem:[#allocation57_spill] sm:$0xff] %v5272_v36  ;;  %6980 = vst [vmem:[#allocation116_spill] sm:$0xff] %v5276_v15  ;;  %v1536_v35 = vadd.f32 %v6983_v45, %v1495_v18  ;;  %v5290_v3 = vmul.f32 %v5262_v50, %v1454_v13  ;;  %v5293_v48 = vmul.f32 %v6938_v44, %v1454_v13  ;;  %v5312_v13 = vld [vmem:[#allocation3 + $0x83] sm:$0xff]  ;;  %v5335_v36 = vld [vmem:[%s3837_s27 + $0x1c] ss:$0 sm:$0xff] }
 0x2cc   : > { %6981 = vst [vmem:[#allocation97_spill] sm:$0xff] %v5285_v1  ;;  %v5296_v29 = vmul.f32 %v5031_v0, %v1181_v22  ;;  %v1658_v42 = vadd.f32 %v5178_v34, %v1617_v14  ;;  %v5305_v62 = vmul.f32 %v5279_v59, %v1181_v22  ;;  %v1757_v18 = vadd.f32 %v6985_v37, %v1688_v33  ;;  %v6989_v14 = vld [vmem:[#allocation125_spill] sm:$0xff]  ;;  %v6991_v33 = vld [vmem:[#allocation20_spill] sm:$0xff]  ;;  %v5326_v45 = vld [vmem:[#allocation3 + $0x63] sm:$0xff] }
 0x2cd   : > { %v1758_v23 = vadd.f32 %v6986_v55, %v1689_v24  ;;  %v5315_v0 = vmul.f32 %v5096_v27, %v1455_v4  ;;  %v5318_v25 = vmul.f32 %v5262_v50, %v1455_v4  ;;  %v5321_v34 = vmul.f32 %v6938_v44, %v1455_v4  ;;  %v5330_v37 = vld [vmem:[#allocation3 + $0x64] sm:$0xff]  ;;  %v5332_v55 = vld [vmem:[#allocation3 + $0x6c] sm:$0xff]  ;;  %6994 = vst [vmem:[#allocation18_spill] sm:$0xff] %v5335_v36 }
 0x2ce   : > { %6984 = vst [vmem:[#allocation112_spill] sm:$0xff] %v5296_v29  ;;  %v1264_v22 = vadd.f32 %v1246_v52, %v1223_v51  ;;  %v1537_v2 = vadd.f32 %v6989_v14, %v1496_v57  ;;  %v1798_v10 = vadd.f32 %v6990_v61, %v1757_v18  ;;  %v1903_v27 = vmul.f32 %v5326_v45, %v5299_v49  ;;  %v5338_v52 = vld [vmem:[#allocation3 + $0x6b] sm:$0xff]  ;;  %v5344_v57 = vld [vmem:[#allocation3 + $0x7c] sm:$0xff] }
 0x2cf   : > { %6987 = vst [vmem:[#allocation88_spill] sm:$0xff] %v5315_v0  ;;  %6988 = vst [vmem:[#allocation4_spill] sm:$0xff] %v5318_v25  ;;  %v1799_v24 = vadd.f32 %v6991_v33, %v1758_v23  ;;  %v1577_v44 = vadd.f32 %v4927_v16, %v1536_v35  ;;  %v1904_v51 = vmul.f32 %v5338_v52, %v5299_v49  ;;  %v5347_v18 = vld [vmem:[%s3837_s27 + $0x22] ss:$0 sm:$0xff]  ;;  %v6998_v61 = vld [vmem:[#allocation31_spill] sm:$0xff] }
 0x2d0   : > { %6992 = vst [vmem:[#allocation13_spill] sm:$0xff] %v5330_v37  ;;  %6993 = vst [vmem:[#allocation8_spill] sm:$0xff] %v5332_v55  ;;  %v1944_v4 = vmul.f32 %v5310_v63, %v5301_v56  ;;  %v762_v23 = vmul.f32 %v4662_v43, %v4972_v38  ;;  %v5351_v14 = vadd.f32 %v1681_v8, %v1658_v42  ;;  %v6999_v16 = vld [vmem:[#allocation41_spill] sm:$0xff]  ;;  %v5357_v60 = vld [vmem:[#allocation3 + $0x84] sm:$0xff] }
 0x2d1   : > { %6995 = vst [vmem:[#allocation34_spill] sm:$0xff] %v5344_v57  ;;  %6996 = vst [vmem:[#allocation28_spill] sm:$0xff] %v5347_v18  ;;  %v1839_v33 = vadd.f32 %v6998_v61, %v1798_v10  ;;  %v1840_v35 = vadd.f32 %v6999_v16, %v1799_v24  ;;  %v1945_v0 = vmul.f32 %v5310_v63, %v5312_v13  ;;  %v7001_v10 = vld [vmem:[#allocation64_spill] sm:$0xff]  ;;  %v7002_v61 = vld [vmem:[#allocation65_spill] sm:$0xff] }
 0x2d2   : > { %6997 = vst [vmem:[#allocation38_spill] sm:$0xff] %v5351_v14  ;;  %7000 = vst [vmem:[#allocation33_spill] sm:$0xff] %v5357_v60  ;;  %v5361_v1 = vmul.f32 %v5335_v36, %v5330_v37  ;;  %v5365_v25 = vmul.f32 %v5335_v36, %v5332_v55  ;;  %v811_v38 = vadd.f32 %v4706_v30, %v762_v23 }
 0x2d3   : > { %v1305_v8 = vadd.f32 %v5062_v47, %v1264_v22  ;;  %v1578_v42 = vadd.f32 %v5045_v31, %v1537_v2  ;;  %v1880_v24 = vadd.f32 %v7001_v10, %v1839_v33  ;;  %v1881_v16 = vadd.f32 %v7002_v61, %v1840_v35  ;;  %v7003_v2 = vld [vmem:[#allocation122_spill] sm:$0xff] }
 0x2d4   : > { %v5374_v14 = vmul.f32 %v5347_v18, %v5344_v57  ;;  %v1618_v29 = vadd.f32 %v5099_v58, %v1577_v44  ;;  %v5379_v40 = vmul.f32 %v5347_v18, %v5357_v60  ;;  %v853_v23 = vmax.f32 %v811_v38, 0.0 }
 0x2d5   : > { %v763_v47 = vmul.f32 %v4662_v43, %v5001_v19  ;;  %v1921_v31 = vadd.f32 %v1903_v27, %v1880_v24  ;;  %v1922_v22 = vadd.f32 %v1904_v51, %v1881_v16  ;;  %v1206_v33 = vmul.f32 %v5133_v12, %v7003_v2  ;;  %v5391_v19 = vld [vmem:[#allocation3 + $0x65] sm:$0xff]  ;;  %v5394_v27 = vld [vmem:[%s3837_s27 + $0x1d] ss:$0 sm:$0xff]  ;;  %v7006_v24 = vld [vmem:[#allocation12_spill] sm:$0xff] }
 0x2d6   : > { %v764_v35 = vmul.f32 %v4662_v43, %v5016_v39  ;;  %895 = vst [vmem:[#allocation3 + $0x128] sm:$0xff] %v853_v23  ;;  %v1098_v58 = vmul.f32 %v5143_v9, %v853_v23  ;;  %v1137_v44 = vmul.f32 %v5149_v53, %v853_v23  ;;  %v1346_v10 = vadd.f32 %v5189_v5, %v1305_v8  ;;  %v7007_v16 = vld [vmem:[#allocation27_spill] sm:$0xff]  ;;  %v7009_v8 = vld [vmem:[#allocation17_spill] sm:$0xff] }
 0x2d7   : > { %v812_v38 = vadd.f32 %v4706_v30, %v763_v47  ;;  %v1962_v61 = vadd.f32 %v1944_v4, %v1921_v31  ;;  %v1963_v15 = vadd.f32 %v1945_v0, %v1922_v22  ;;  %7004 = vst [vmem:[#allocation110_spill] sm:$0xff] %v5391_v19  ;;  %7005 = vst [vmem:[#allocation52_spill] sm:$0xff] %v5394_v27  ;;  %v7010_v23 = vld [vmem:[#allocation37_spill] sm:$0xff]  ;;  %v7011_v0 = vld [vmem:[#allocation6_spill] sm:$0xff] }
 0x2d8   : > { %v813_v51 = vadd.f32 %v4706_v30, %v764_v35  ;;  %v1526_v43 = vadd.f32 %v7007_v16, %v7006_v24  ;;  %v5400_v39 = vadd.f32 %v1098_v58, %v5165_v20  ;;  %v1155_v9 = vadd.f32 %v1137_v44, %v5168_v21  ;;  %v7012_v31 = vld [vmem:[#allocation10_spill] sm:$0xff]  ;;  %v5407_v2 = vld [vmem:[#allocation3 + $0x6d] sm:$0xff]  ;;  %v7016_v24 = vld [vmem:[#allocation21_spill] sm:$0xff] }
 0x2d9   : > { %v854_v5 = vmax.f32 %v812_v38, 0.0  ;;  %v1527_v4 = vadd.f32 %v7010_v23, %v7009_v8  ;;  %v2031_v47 = vadd.f32 %v7011_v0, %v1962_v61  ;;  %v2032_v22 = vadd.f32 %v7012_v31, %v1963_v15  ;;  %7013 = vst [vmem:[#allocation76_spill] sm:$0xff] %v5407_v2  ;;  %v7014_v35 = vld [vmem:[#allocation51_spill] sm:$0xff]  ;;  %v7015_v44 = vld [vmem:[#allocation60_spill] sm:$0xff]  ;;  %v7017_v16 = vld [vmem:[#allocation22_spill] sm:$0xff] }
 0x2da   : > { %7008 = vst [vmem:[#allocation61_spill] sm:$0xff] %v5400_v39  ;;  %v855_v30 = vmax.f32 %v813_v51, 0.0  ;;  %v1567_v18 = vadd.f32 %v7014_v35, %v1526_v43  ;;  %v5412_v20 = vmul.f32 %v5394_v27, %v5391_v19  ;;  %v1224_v58 = vadd.f32 %v1206_v33, %v1155_v9  ;;  %v5419_v8 = vld [vmem:[#allocation3 + $0x7d] sm:$0xff]  ;;  %v5422_v51 = vld [vmem:[%s3837_s27 + $0x23] ss:$0 sm:$0xff]  ;;  %v7020_v23 = vld [vmem:[#allocation75_spill] sm:$0xff] }
 0x2db   : > { %v1247_v21 = vmul.f32 %v6926_v17, %v4878_v11  ;;  %896 = vst [vmem:[#allocation3 + $0x130] sm:$0xff] %v854_v5  ;;  %v1568_v38 = vadd.f32 %v7015_v44, %v1527_v4  ;;  %v2072_v61 = vadd.f32 %v7016_v24, %v2031_v47  ;;  %v2073_v15 = vadd.f32 %v7017_v16, %v2032_v22  ;;  %v7021_v4 = vld [vmem:[#allocation83_spill] sm:$0xff]  ;;  %v7022_v47 = vld [vmem:[#allocation32_spill] sm:$0xff]  ;;  %v7023_v22 = vld [vmem:[#allocation42_spill] sm:$0xff] }
 0x2dc   : > { %7018 = vst [vmem:[#allocation84_spill] sm:$0xff] %v5419_v8  ;;  %7019 = vst [vmem:[#allocation16_spill] sm:$0xff] %v5422_v51  ;;  %v1138_v43 = vmul.f32 %v5149_v53, %v855_v30  ;;  %v1608_v33 = vadd.f32 %v7020_v23, %v1567_v18  ;;  %v5428_v17 = vmul.f32 %v5394_v27, %v5407_v2  ;;  %v7024_v24 = vld [vmem:[#allocation94_spill] sm:$0xff] }
 0x2dd   : > { %897 = vst [vmem:[#allocation3 + $0x138] sm:$0xff] %v855_v30  ;;  %v1265_v9 = vadd.f32 %v1247_v21, %v1224_v58  ;;  %v1387_v5 = vadd.f32 %v5282_v46, %v1346_v10  ;;  %v1609_v0 = vadd.f32 %v7021_v4, %v1568_v38  ;;  %v2113_v31 = vadd.f32 %v7022_v47, %v2072_v61  ;;  %v5434_v44 = vld [vmem:[#allocation3 + $0x121] sm:$0xff]  ;;  %v5448_v10 = vld [vmem:[%s3837_s27 + $0x1f] ss:$0 sm:$0xff]  ;;  %v5453_v21 = vld [vmem:[%s3837_s27 + $0x20] ss:$0 sm:$0xff] }
 0x2de   : > { %v2114_v35 = vadd.f32 %v7023_v22, %v2073_v15  ;;  %v5437_v30 = vadd.f32 %v1138_v43, %v5250_v54  ;;  %v1649_v18 = vadd.f32 %v7024_v24, %v1608_v33  ;;  %v1619_v16 = vadd.f32 %v5175_v7, %v1578_v42  ;;  %v5441_v23 = vld [vmem:[#allocation3 + $0x85] sm:$0xff]  ;;  %v7026_v38 = vld [vmem:[#allocation101_spill] sm:$0xff]  ;;  %v7027_v61 = vld [vmem:[#allocation96_spill] sm:$0xff] }
 0x2df   : > { %7025 = vst [vmem:[#allocation95_spill] sm:$0xff] %v5441_v23  ;;  %v5445_v46 = vmul.f32 %v5422_v51, %v5419_v8  ;;  %v1410_v58 = vmul.f32 %v5448_v10, %v5434_v44  ;;  %v1672_v54 = vmul.f32 %v5453_v21, %v7026_v38  ;;  %v1659_v15 = vadd.f32 %v7027_v61, %v1618_v29  ;;  %v7028_v43 = vld [vmem:[#allocation66_spill] sm:$0xff]  ;;  %v7029_v42 = vld [vmem:[#allocation67_spill] sm:$0xff]  ;;  %v7031_v24 = vld [vmem:[#allocation113_spill] sm:$0xff] }
 0x2e0   : > { %v2154_v7 = vadd.f32 %v7028_v43, %v2113_v31  ;;  %v2155_v33 = vadd.f32 %v7029_v42, %v2114_v35  ;;  %v7030_v4 = vld [vmem:[#allocation79_spill] sm:$0xff]  ;;  %v1479_v27 = vmul.f32 %v5219_v28, %v7031_v24  ;;  %v7032_v8 = vld [vmem:[#allocation100_spill] sm:$0xff]  ;;  %v5468_v29 = vmul.f32 %v5422_v51, %v5441_v23  ;;  %v7038_v43 = vld [vmem:[#allocation14_spill] sm:$0xff] }
 0x2e1   : > { %v1306_v47 = vadd.f32 %v7030_v4, %v1265_v9  ;;  %v1428_v22 = vadd.f32 %v1410_v58, %v1387_v5  ;;  %v1650_v39 = vadd.f32 %v7032_v8, %v1609_v0  ;;  %v1690_v11 = vadd.f32 %v1672_v54, %v1649_v18  ;;  %v7033_v8 = vld [vmem:[#allocation106_spill] sm:$0xff]  ;;  %v7034_v18 = vld [vmem:[#allocation127_spill] sm:$0xff] }
 0x2e2   : > { %v2195_v53 = vadd.f32 %v5361_v1, %v2154_v7  ;;  %v2196_v2 = vadd.f32 %v5365_v25, %v2155_v33  ;;  %v5470_v31 = vld [vmem:[#allocation3 + $0x129] sm:$0xff]  ;;  %v1660_v9 = vadd.f32 %v5265_v32, %v1619_v16  ;;  %v1673_v0 = vmul.f32 %v5453_v21, %v7033_v8 }
 0x2e3   : > { %v1347_v35 = vadd.f32 %v5244_v41, %v1306_v47  ;;  %v1497_v5 = vadd.f32 %v1479_v27, %v1428_v22  ;;  %v1411_v58 = vmul.f32 %v5448_v10, %v5470_v31  ;;  %v7035_v38 = vld [vmem:[#allocation91_spill] sm:$0xff]  ;;  %v5484_v41 = vadd.f32 %v5293_v48, %v1659_v15  ;;  %v7043_v48 = vld [vmem:[#allocation30_spill] sm:$0xff]  ;;  %v5497_v22 = vld [vmem:[%s3837_s27 + $0xf] ss:$0 sm:$0xff] }
 0x2e4   : > { %v2236_v1 = vadd.f32 %v5374_v14, %v2195_v53  ;;  %v2237_v25 = vadd.f32 %v5379_v40, %v2196_v2  ;;  %v1520_v54 = vmul.f32 %v7035_v38, %v7034_v18  ;;  %v7037_v32 = vld [vmem:[#allocation71_spill] sm:$0xff]  ;;  %v1691_v16 = vadd.f32 %v1673_v0, %v1650_v39  ;;  %v7045_v8 = vld [vmem:[#allocation24_spill] sm:$0xff] }
 0x2e5   : > { %v1388_v61 = vadd.f32 %v5305_v62, %v1347_v35  ;;  %7036 = vst [vmem:[#allocation115_spill] sm:$0xff] %v5484_v41  ;;  %v1480_v27 = vmul.f32 %v5219_v28, %v7037_v32  ;;  %v1759_v7 = vadd.f32 %v7038_v43, %v1690_v11  ;;  %v7039_v42 = vld [vmem:[#allocation7_spill] sm:$0xff]  ;;  %v5492_v2 = vadd.f32 %v5321_v34, %v1660_v9  ;;  %v3523_v9 = vld [vmem:[#allocation3 + $0x53] sm:$0xff]  ;;  %v5615_v41 = vld [vmem:[%s3837_s27 + $0xb] ss:$0 sm:$0xff] }
 0x2e6   : > { %v2305_v33 = vadd.f32 %v7039_v42, %v2236_v1  ;;  %v7040_v4 = vld [vmem:[#allocation11_spill] sm:$0xff]  ;;  %v1538_v14 = vadd.f32 %v1520_v54, %v1497_v5  ;;  %v7046_v5 = vld [vmem:[#allocation58_spill] sm:$0xff]  ;;  %v1824_v54 = vmul.f32 %v3523_v9, %v5497_v22  ;;  %7070 = vst [vmem:[#allocation12_spill] sm:$0xff] %v5615_v41 }
 0x2e7   : > { %v2306_v53 = vadd.f32 %v7040_v4, %v2237_v25  ;;  %v1429_v40 = vadd.f32 %v1411_v58, %v1388_v61  ;;  %7041 = vst [vmem:[#allocation5_spill] sm:$0xff] %v5492_v2  ;;  %v7042_v62 = vld [vmem:[#allocation19_spill] sm:$0xff]  ;;  %v1800_v15 = vadd.f32 %v7043_v48, %v1759_v7  ;;  %v1521_v58 = vmul.f32 %v7035_v38, %v7046_v5  ;;  %v7047_v25 = vld [vmem:[#allocation40_spill] sm:$0xff] }
 0x2e8   : > { %v1760_v47 = vadd.f32 %v7042_v62, %v1691_v16  ;;  %v3522_v24 = vld [vmem:[#allocation3 + $0x4b] sm:$0xff]  ;;  %v5507_v16 = vld [vmem:[%s3837_s27 + $0x15] ss:$0 sm:$0xff]  ;;  %v5511_v7 = vld [vmem:[#allocation3 + $0x93] sm:$0xff]  ;;  %v1207_v38 = vmul.f32 %v5133_v12, %v4876_v6  ;;  %v1906_v6 = vmul.f32 %v5299_v49, %v5312_v13 }
 0x2e9   : > { %v1823_v39 = vmul.f32 %v3522_v24, %v5497_v22  ;;  %v7044_v11 = vld [vmem:[#allocation23_spill] sm:$0xff]  ;;  %v2347_v0 = vadd.f32 %v7045_v8, %v2306_v53  ;;  %v1498_v1 = vadd.f32 %v1480_v27, %v1429_v40  ;;  %v1864_v43 = vmul.f32 %v5507_v16, %v5326_v45  ;;  %v7050_v53 = vld [vmem:[#allocation86_spill] sm:$0xff] }
 0x2ea   : > { %v2346_v35 = vadd.f32 %v7044_v11, %v2305_v33  ;;  %v1801_v34 = vadd.f32 %v7047_v25, %v1760_v47  ;;  %v7048_v42 = vld [vmem:[#allocation35_spill] sm:$0xff]  ;;  %v1579_v40 = vadd.f32 %v7050_v53, %v1538_v14  ;;  %v1865_v47 = vmul.f32 %v5507_v16, %v5338_v52  ;;  %v5522_v24 = vld [vmem:[#allocation3 + $0x9b] sm:$0xff] }
 0x2eb   : > { %v1841_v61 = vadd.f32 %v1823_v39, %v1800_v15  ;;  %v7049_v4 = vld [vmem:[#allocation43_spill] sm:$0xff]  ;;  %v1905_v15 = vmul.f32 %v5299_v49, %v5301_v56  ;;  %v7051_v39 = vld [vmem:[#allocation68_spill] sm:$0xff]  ;;  %v1539_v25 = vadd.f32 %v1521_v58, %v1498_v1  ;;  %v1225_v14 = vadd.f32 %v1207_v38, %v5437_v30  ;;  %v7055_v38 = vld [vmem:[#allocation46_spill] sm:$0xff] }
 0x2ec   : > { %v2387_v33 = vadd.f32 %v7048_v42, %v2346_v35  ;;  %v2388_v27 = vadd.f32 %v7049_v4, %v2347_v0  ;;  %v1842_v62 = vadd.f32 %v1824_v54, %v1801_v34  ;;  %v7052_v35 = vld [vmem:[#allocation69_spill] sm:$0xff]  ;;  %v1456_v0 = vld [vmem:[#allocation3 + $0x122] sm:$0xff]  ;;  %v1946_v54 = vmul.f32 %v5310_v63, %v5511_v7 }
 0x2ed   : > { %v1882_v48 = vadd.f32 %v1864_v43, %v1841_v61  ;;  %v5535_v42 = vmul.f32 %v5279_v59, %v5434_v44  ;;  %v7053_v1 = vld [vmem:[#allocation123_spill] sm:$0xff]  ;;  %v5539_v30 = vmul.f32 %v5262_v50, %v1456_v0  ;;  %v1947_v4 = vmul.f32 %v5310_v63, %v5522_v24 }
 0x2ee   : > { %v2428_v11 = vadd.f32 %v7051_v39, %v2387_v33  ;;  %v2429_v8 = vadd.f32 %v7052_v35, %v2388_v27  ;;  %v1883_v9 = vadd.f32 %v1865_v47, %v1842_v62  ;;  %v1620_v58 = vadd.f32 %v7053_v1, %v1579_v40  ;;  %v7056_v62 = vld [vmem:[#allocation47_spill] sm:$0xff]  ;;  %v5552_v39 = vld [vmem:[%s3837_s27 + $0xa] ss:$0 sm:$0xff] }
 0x2ef   : > { %v1923_v34 = vadd.f32 %v1905_v15, %v1882_v48  ;;  %7054 = vst [vmem:[#allocation9_spill] sm:$0xff] %v5539_v30  ;;  %v1580_v44 = vadd.f32 %v7055_v38, %v1539_v25  ;;  %v1266_v40 = vadd.f32 %v7056_v62, %v1225_v14  ;;  %v7057_v48 = vld [vmem:[#allocation44_spill] sm:$0xff]  ;;  %7058 = vst [vmem:[#allocation125_spill] sm:$0xff] %v5552_v39  ;;  %v5567_v25 = vld [vmem:[#allocation3 + $0x3c] sm:$0xff] }
 0x2f0   : > { %v2469_v61 = vadd.f32 %v5412_v20, %v2428_v11  ;;  %v2470_v43 = vadd.f32 %v5428_v17, %v2429_v8  ;;  %v1924_v33 = vadd.f32 %v1906_v6, %v1883_v9  ;;  %v5546_v17 = vmul.f32 %v5453_v21, %v1456_v0  ;;  %v5554_v11 = vld [vmem:[#allocation3 + $0x34] sm:$0xff]  ;;  %v5571_v9 = vld [vmem:[#allocation3 + $0x9c] sm:$0xff] }
 0x2f1   : > { %v1964_v27 = vadd.f32 %v1946_v54, %v1923_v34  ;;  %v5563_v8 = vmul.f32 %v5279_v59, %v5470_v31  ;;  %v5565_v0 = vld [vmem:[#allocation3 + $0x94] sm:$0xff]  ;;  %v2057_v14 = vmul.f32 %v5567_v25, %v5552_v39  ;;  %7060 = vst [vmem:[#allocation20_spill] sm:$0xff] %v5571_v9  ;;  %v5586_v1 = vadd.f32 %v5259_v26, %v1580_v44 }
 0x2f2   : > { %v2510_v53 = vadd.f32 %v5445_v46, %v2469_v61  ;;  %v2511_v20 = vadd.f32 %v5468_v29, %v2470_v43  ;;  %v1965_v47 = vadd.f32 %v1947_v4, %v1924_v33  ;;  %v2056_v46 = vmul.f32 %v5554_v11, %v5552_v39  ;;  %7059 = vst [vmem:[#allocation15_spill] sm:$0xff] %v5565_v0  ;;  %v7061_v6 = vld [vmem:[#allocation45_spill] sm:$0xff]  ;;  %v5575_v61 = vld [vmem:[%s3837_s27 + $0x10] ss:$0 sm:$0xff]  ;;  %v7067_v44 = vld [vmem:[#allocation28_spill] sm:$0xff] }
 0x2f3   : > { %v2033_v15 = vadd.f32 %v7057_v48, %v1964_v27  ;;  %v5559_v29 = vadd.f32 %v5290_v3, %v1620_v58  ;;  %7062 = vst [vmem:[#allocation31_spill] sm:$0xff] %v5575_v61  ;;  %v5577_v3 = vld [vmem:[#allocation3 + $0x4c] sm:$0xff]  ;;  %v5581_v31 = vld [vmem:[#allocation3 + $0x54] sm:$0xff]  ;;  %v5589_v58 = vld [vmem:[%s3837_s27 + $0x16] ss:$0 sm:$0xff]  ;;  %v2179_v27 = vmul.f32 %v5335_v36, %v5344_v57  ;;  %v2180_v26 = vmul.f32 %v5335_v36, %v5357_v60 }
 0x2f4   : > { %v2528_v35 = vpack.c.bf16 %v2511_v20, %v2510_v53  ;;  %v2034_v34 = vadd.f32 %v7061_v6, %v1965_v47  ;;  %7063 = vst [vmem:[#allocation41_spill] sm:$0xff] %v5577_v3  ;;  %v2097_v59 = vmul.f32 %v5577_v3, %v5575_v61  ;;  %7064 = vst [vmem:[#allocation64_spill] sm:$0xff] %v5581_v31  ;;  %v7066_v53 = vmov 0.0   ;;  %v5606_v48 = vld [vmem:[%s3837_s27 + $0x5] ss:$0 sm:$0xff]  ;;  %v7077_v36 = vld [vmem:[#allocation50_spill] sm:$0xff] }
 0x2f5   : > { %v2074_v54 = vadd.f32 %v2056_v46, %v2033_v15  ;;  %v2098_v43 = vmul.f32 %v5581_v31, %v5575_v61  ;;  %7065 = vst [vmem:[#allocation65_spill] sm:$0xff] %v5589_v58  ;;  %v2138_v33 = vmul.f32 %v5589_v58, %v5330_v37  ;;  %v2139_v4 = vmul.f32 %v5589_v58, %v5332_v55  ;;  %v3533_v15 = vld [vmem:[#allocation3 + $0x1d] sm:$0xff]  ;;  %v5617_v30 = vld [vmem:[#allocation3 + $0x35] sm:$0xff] }
 0x2f6   : > { %3326 = vmatmul.mubr.bf16.vlgmr.msra.gmra.mrb[0].mxu1 %v2528_v35  ;;  %v2075_v20 = vadd.f32 %v2057_v14, %v2034_v34  ;;  %v2220_v62 = vmul.f32 %v7067_v44, %v5565_v0  ;;  %v2221_v47 = vmul.f32 %v7067_v44, %v5571_v9  ;;  %7068 = vst [vmem:[#allocation122_spill] sm:$0xff] %v5606_v48  ;;  %v3534_v35 = vld [vmem:[#allocation3 + $0x25] sm:$0xff]  ;;  %v3535_v14 = vld [vmem:[%s6584_s6] ss:$0 sm:$0xff]  ;;  %7071 = vst [vmem:[#allocation27_spill] sm:$0xff] %v5617_v30 }
 0x2f7   : > { %3329 = vmatprep.mubr.msk.bf16.mxu1 %vm3581_vm1, %v7066_v53  ;;  %v2115_v38 = vadd.f32 %v2097_v59, %v2074_v54  ;;  %v2289_v46 = vmul.f32 %v3533_v15, %v5606_v48  ;;  %v2290_v6 = vmul.f32 %v3534_v35, %v5606_v48  ;;  %v7069_v34 = vld [vmem:[#allocation120_spill] sm:$0xff]  ;;  %v2330_v44 = vmul.f32 %v5617_v30, %v5615_v41  ;;  %v5621_v9 = vld [vmem:[#allocation3 + $0x3d] sm:$0xff]  ;;  %v5647_v53 = vld [vmem:[%s3837_s27 + $0x17] ss:$0 sm:$0xff] }
 0x2f8   : > { %v765_v54 = vmul.f32 %v3535_v14, %v7069_v34  ;;  %v2116_v59 = vadd.f32 %v2098_v43, %v2075_v20  ;;  %7072 = vst [vmem:[#allocation17_spill] sm:$0xff] %v5621_v9  ;;  %v2331_v15 = vmul.f32 %v5621_v9, %v5615_v41  ;;  %v5626_v35 = vld [vmem:[%s3837_s27 + $0x11] ss:$0 sm:$0xff]  ;;  %v5628_v48 = vld [vmem:[#allocation3 + $0x4d] sm:$0xff]  ;;  %v5638_v9 = vld [vmem:[#allocation3 + $0x55] sm:$0xff] }
 0x2f9   : > { %v2156_v2 = vadd.f32 %v2138_v33, %v2115_v38  ;;  %7073 = vst [vmem:[#allocation37_spill] sm:$0xff] %v5626_v35  ;;  %7074 = vst [vmem:[#allocation6_spill] sm:$0xff] %v5628_v48  ;;  %v2371_v43 = vmul.f32 %v5628_v48, %v5626_v35  ;;  %v3541_v33 = vld [vmem:[%s6585_s7] ss:$0 sm:$0xff]  ;;  %v7076_v30 = vld [vmem:[#allocation26_spill] sm:$0xff]  ;;  %v2372_v58 = vmul.f32 %v5638_v9, %v5626_v35 }
 0x2fa   : > { %v814_v20 = vadd.f32 %v3541_v33, %v765_v54  ;;  %v7075_v38 = vld [vmem:[#allocation104_spill] sm:$0xff]  ;;  %v1528_v0 = vadd.f32 %v7077_v36, %v7076_v30  ;;  %v2157_v60 = vadd.f32 %v2139_v4, %v2116_v59  ;;  %7078 = vst [vmem:[#allocation10_spill] sm:$0xff] %v5638_v9  ;;  %v7079_v57 = vld [vmem:[#allocation70_spill] sm:$0xff]  ;;  %v7080_v48 = vld [vmem:[#allocation59_spill] sm:$0xff]  ;;  %v2412_v36 = vmul.f32 %v5647_v53, %v5391_v19 }
 0x2fb   : > { %v766_v34 = vmul.f32 %v3535_v14, %v7075_v38  ;;  %v2197_v41 = vadd.f32 %v2179_v27, %v2156_v2  ;;  %v1529_v55 = vadd.f32 %v7080_v48, %v7079_v57  ;;  %v7081_v37 = vld [vmem:[#allocation48_spill] sm:$0xff]  ;;  %v7082_v54 = vld [vmem:[#allocation74_spill] sm:$0xff]  ;;  %7083 = vst [vmem:[#allocation51_spill] sm:$0xff] %v5647_v53 }
 0x2fc   : > { %v856_v61 = vmax.f32 %v814_v20, 0.0  ;;  %v1307_v31 = vadd.f32 %v7081_v37, %v1266_v40  ;;  %v1569_v39 = vadd.f32 %v7082_v54, %v1528_v0  ;;  %v2198_v14 = vadd.f32 %v2180_v26, %v2157_v60  ;;  %v7084_v2 = vld [vmem:[#allocation82_spill] sm:$0xff]  ;;  %v7085_v4 = vld [vmem:[#allocation76_spill] sm:$0xff]  ;;  %v7087_v37 = vld [vmem:[#allocation93_spill] sm:$0xff] }
 0x2fd   : > { %v815_v3 = vadd.f32 %v3541_v33, %v766_v34  ;;  %v2238_v38 = vadd.f32 %v2220_v62, %v2197_v41  ;;  %v1570_v30 = vadd.f32 %v7084_v2, %v1529_v55  ;;  %v2413_v27 = vmul.f32 %v5647_v53, %v7085_v4  ;;  %v7086_v57 = vld [vmem:[#allocation114_spill] sm:$0xff]  ;;  %v7088_v60 = vld [vmem:[#allocation124_spill] sm:$0xff]  ;;  %v7089_v26 = vld [vmem:[#allocation99_spill] sm:$0xff] }
 0x2fe   : > { %898 = vst [vmem:[#allocation3 + $0x140] sm:$0xff] %v856_v61  ;;  %v1139_v48 = vmul.f32 %v7086_v57, %v856_v61  ;;  %v1610_v40 = vadd.f32 %v7087_v37, %v1569_v39  ;;  %v2239_v33 = vadd.f32 %v2221_v47, %v2198_v14  ;;  %v1208_v41 = vmul.f32 %v5133_v12, %v7088_v60  ;;  %v5659_v20 = vld [vmem:[#allocation3 + $0x95] sm:$0xff]  ;;  %v7093_v53 = vld [vmem:[#allocation107_spill] sm:$0xff]  ;;  %v5665_v39 = vld [vmem:[#allocation3 + $0x9d] sm:$0xff] }
 0x2ff   : > { %v857_v59 = vmax.f32 %v815_v3, 0.0  ;;  %v2307_v0 = vadd.f32 %v2289_v46, %v2238_v38  ;;  %v1611_v62 = vadd.f32 %v7089_v26, %v1570_v30  ;;  %7090 = vst [vmem:[#allocation60_spill] sm:$0xff] %v5659_v20  ;;  %v7091_v34 = vld [vmem:[#allocation61_spill] sm:$0xff]  ;;  %v7092_v54 = vld [vmem:[#allocation116_spill] sm:$0xff]  ;;  %7094 = vst [vmem:[#allocation21_spill] sm:$0xff] %v5665_v39  ;;  %v1675_v38 = vmul.f32 %v5453_v21, %v7037_v32 }
 0x300   : > { %v1157_v55 = vadd.f32 %v1139_v48, %v7091_v34  ;;  %v1348_v2 = vadd.f32 %v7092_v54, %v1307_v31  ;;  %v1651_v4 = vadd.f32 %v7093_v53, %v1610_v40  ;;  %v3544_v61 = vld [vmem:[#allocation3 + $0xaa] sm:$0xff]  ;;  %v2308_v47 = vadd.f32 %v2290_v6, %v2239_v33  ;;  %v7099_v26 = vld [vmem:[#allocation29_spill] sm:$0xff] }
 0x301   : > { %899 = vst [vmem:[#allocation3 + $0x148] sm:$0xff] %v857_v59  ;;  %v1674_v3 = vmul.f32 %v3544_v61, %v5453_v21  ;;  %v2348_v46 = vadd.f32 %v2330_v44, %v2307_v0  ;;  %v7095_v14 = vld [vmem:[#allocation111_spill] sm:$0xff]  ;;  %v7096_v30 = vld [vmem:[#allocation84_spill] sm:$0xff]  ;;  %v2494_v60 = vmul.f32 %v5422_v51, %v5659_v20  ;;  %v2495_v44 = vmul.f32 %v5422_v51, %v5665_v39 }
 0x302   : > { %v1652_v12 = vadd.f32 %v7095_v14, %v1611_v62  ;;  %v7097_v57 = vld [vmem:[#allocation52_spill] sm:$0xff]  ;;  %v1226_v59 = vadd.f32 %v1208_v41, %v1157_v55  ;;  %v2349_v37 = vadd.f32 %v2331_v15, %v2308_v47  ;;  %v7098_v33 = vld [vmem:[#allocation119_spill] sm:$0xff]  ;;  %v1481_v32 = vmul.f32 %v5219_v28, %v7034_v18  ;;  %v7102_v47 = vld [vmem:[#allocation54_spill] sm:$0xff] }
 0x303   : > { %v2453_v48 = vmul.f32 %v7097_v57, %v7096_v30  ;;  %v2454_v31 = vmul.f32 %v7097_v57, %v5441_v23  ;;  %v1692_v53 = vadd.f32 %v1674_v3, %v1651_v4  ;;  %v2389_v40 = vadd.f32 %v2371_v43, %v2348_v46  ;;  %v7100_v43 = vld [vmem:[#allocation39_spill] sm:$0xff] }
 0x304   : > { %v1693_v6 = vadd.f32 %v1675_v38, %v1652_v12  ;;  %v1267_v0 = vadd.f32 %v7098_v33, %v1226_v59  ;;  %v2390_v34 = vadd.f32 %v2372_v58, %v2349_v37  ;;  %v1389_v15 = vadd.f32 %v5535_v42, %v1348_v2  ;;  %v7101_v61 = vld [vmem:[#allocation103_spill] sm:$0xff]  ;;  %v7104_v2 = vld [vmem:[#allocation112_spill] sm:$0xff] }
 0x305   : > { %v1761_v62 = vadd.f32 %v7099_v26, %v1692_v53  ;;  %v2430_v54 = vadd.f32 %v2412_v36, %v2389_v40  ;;  %v1184_v41 = vld [vmem:[#allocation3 + $0x139] sm:$0xff]  ;;  %v1825_v14 = vmul.f32 %v5497_v22, %v5326_v45  ;;  %v7103_v59 = vld [vmem:[#allocation63_spill] sm:$0xff]  ;;  %v1826_v36 = vmul.f32 %v5497_v22, %v5338_v52 }
 0x306   : > { %v1762_v4 = vadd.f32 %v7100_v43, %v1693_v6  ;;  %v1412_v55 = vmul.f32 %v5448_v10, %v1184_v41  ;;  %v1308_v3 = vadd.f32 %v7101_v61, %v1267_v0  ;;  %v2431_v12 = vadd.f32 %v2413_v27, %v2390_v34  ;;  %v5697_v6 = vld [vmem:[#allocation3 + $0xab] sm:$0xff]  ;;  %v5701_v26 = vld [vmem:[#allocation3 + $0xb3] sm:$0xff] }
 0x307   : > { %v1802_v46 = vadd.f32 %v7102_v47, %v1761_v62  ;;  %v2471_v18 = vadd.f32 %v2453_v48, %v2430_v54  ;;  %v1866_v37 = vmul.f32 %v5507_v16, %v5301_v56  ;;  %v1867_v40 = vmul.f32 %v5507_v16, %v5312_v13  ;;  %v7105_v61 = vld [vmem:[#allocation55_spill] sm:$0xff] }
 0x308   : > { %v1185_v38 = vld [vmem:[#allocation3 + $0x141] sm:$0xff]  ;;  %v1803_v58 = vadd.f32 %v7103_v59, %v1762_v4  ;;  %v1430_v42 = vadd.f32 %v1412_v55, %v1389_v15  ;;  %v1349_v53 = vadd.f32 %v7104_v2, %v1308_v3  ;;  %v2472_v33 = vadd.f32 %v2454_v31, %v2431_v12  ;;  %v1457_v15 = vld [vmem:[#allocation3 + $0x12a] sm:$0xff] }
 0x309   : > { %v1843_v27 = vadd.f32 %v1825_v14, %v1802_v46  ;;  %v1907_v0 = vmul.f32 %v5299_v49, %v5511_v7  ;;  %v1413_v54 = vmul.f32 %v5448_v10, %v1185_v38  ;;  %v1908_v41 = vmul.f32 %v5299_v49, %v5522_v24  ;;  %v5721_v38 = vld [vmem:[%s3837_s27 + $0x4] ss:$0 sm:$0xff] }
 0x30a   : > { %v1844_v48 = vadd.f32 %v1826_v36, %v1803_v58  ;;  %v1499_v62 = vadd.f32 %v1481_v32, %v1430_v42  ;;  %v1390_v34 = vadd.f32 %v5563_v8, %v1349_v53  ;;  %v2512_v43 = vadd.f32 %v2494_v60, %v2471_v18  ;;  %7108 = vst [vmem:[#allocation83_spill] sm:$0xff] %v5721_v38  ;;  %v7111_v2 = vld [vmem:[#allocation4_spill] sm:$0xff] }
 0x30b   : > { %v2513_v4 = vadd.f32 %v2495_v44, %v2472_v33  ;;  %v1884_v31 = vadd.f32 %v1866_v37, %v1843_v27  ;;  %v1482_v46 = vmul.f32 %v5219_v28, %v7046_v5  ;;  %v1948_v8 = vmul.f32 %v5310_v63, %v5697_v6  ;;  %v7109_v5 = vld [vmem:[#allocation89_spill] sm:$0xff]  ;;  %v7116_v27 = vld [vmem:[#allocation64_spill] sm:$0xff] }
 0x30c   : > { %v1885_v55 = vadd.f32 %v1867_v40, %v1844_v48  ;;  %v1540_v3 = vadd.f32 %v7105_v61, %v1499_v62  ;;  %v1431_v47 = vadd.f32 %v1413_v54, %v1390_v34  ;;  %v1949_v12 = vmul.f32 %v5310_v63, %v5701_v26  ;;  %v7115_v40 = vld [vmem:[#allocation41_spill] sm:$0xff]  ;;  %v7120_v34 = vld [vmem:[#allocation31_spill] sm:$0xff] }
 0x30d   : > { %v2529_v32 = vpack.c.bf16 %v2513_v4, %v2512_v43  ;;  %v1925_v10 = vadd.f32 %v1907_v0, %v1884_v31  ;;  %v5715_v60 = vmul.f32 %v5262_v50, %v1457_v15  ;;  %v5718_v44 = vmul.f32 %v5453_v21, %v1457_v15  ;;  %v5742_v0 = vld [vmem:[#allocation3 + $0xac] sm:$0xff]  ;;  %v7122_v15 = vld [vmem:[#allocation102_spill] sm:$0xff]  ;;  %v7124_v31 = vld [vmem:[#allocation65_spill] sm:$0xff] }
 0x30e   : > { %v1926_v14 = vadd.f32 %v1908_v41, %v1885_v55  ;;  %v1500_v18 = vadd.f32 %v1482_v46, %v1431_v47  ;;  %v2017_v28 = vmul.f32 %v5721_v38, %v5554_v11  ;;  %v1581_v59 = vadd.f32 %v7109_v5, %v1540_v3  ;;  %v7114_v11 = vld [vmem:[#allocation125_spill] sm:$0xff]  ;;  %7117 = vst [vmem:[#allocation94_spill] sm:$0xff] %v5742_v0  ;;  %v7123_v4 = vld [vmem:[#allocation34_spill] sm:$0xff]  ;;  %v7126_v47 = vld [vmem:[#allocation15_spill] sm:$0xff] }
 0x30f   : > { %7106 = vst [vmem:[#allocation22_spill] sm:$0xff] %v5715_v60  ;;  %7107 = vst [vmem:[#allocation75_spill] sm:$0xff] %v5718_v44  ;;  %3330 = vmatmul.mubr.bf16.gmra.mrb[4].mxu1 %v2529_v32  ;;  %v1966_v58 = vadd.f32 %v1948_v8, %v1925_v10  ;;  %v2018_v42 = vmul.f32 %v5721_v38, %v5567_v25  ;;  %v5730_v50 = vadd.f32 %v5546_v17, %v5559_v29  ;;  %v7113_v37 = vmov 0.0   ;;  %v5744_v25 = vld [vmem:[#allocation3 + $0xb4] sm:$0xff]  ;;  %v7127_v46 = vld [vmem:[#allocation18_spill] sm:$0xff] }
 0x310   : > { %v1967_v36 = vadd.f32 %v1949_v12, %v1926_v14  ;;  %v5734_v53 = vadd.f32 %v7111_v2, %v5586_v1  ;;  %3333 = vmatprep.mubr.msk.bf16.mxu1 %vm3581_vm1, %v7113_v37  ;;  %v2058_v33 = vmul.f32 %v7115_v40, %v7114_v11  ;;  %v2059_v48 = vmul.f32 %v7116_v27, %v7114_v11  ;;  %v7119_v29 = vld [vmem:[#allocation13_spill] sm:$0xff]  ;;  %v7121_v1 = vld [vmem:[#allocation8_spill] sm:$0xff]  ;;  %v7132_v2 = vld [vmem:[#allocation27_spill] sm:$0xff] }
 0x311   : > { %7110 = vst [vmem:[#allocation32_spill] sm:$0xff] %v5730_v50  ;;  %7118 = vst [vmem:[#allocation101_spill] sm:$0xff] %v5744_v25  ;;  %v2035_v62 = vadd.f32 %v2017_v28, %v1966_v58  ;;  %v2099_v54 = vmul.f32 %v7120_v34, %v7119_v29  ;;  %v2100_v41 = vmul.f32 %v7120_v34, %v7121_v1  ;;  %v7125_v61 = vld [vmem:[#allocation33_spill] sm:$0xff]  ;;  %v7129_v28 = vld [vmem:[#allocation20_spill] sm:$0xff] }
 0x312   : > { %7112 = vst [vmem:[#allocation42_spill] sm:$0xff] %v5734_v53  ;;  %v2036_v17 = vadd.f32 %v2018_v42, %v1967_v36  ;;  %v1541_v43 = vadd.f32 %v7122_v15, %v1500_v18  ;;  %v2140_v55 = vmul.f32 %v7124_v31, %v7123_v4  ;;  %v2141_v3 = vmul.f32 %v7124_v31, %v7125_v61  ;;  %v7128_v32 = vld [vmem:[#allocation97_spill] sm:$0xff]  ;;  %v7130_v58 = vld [vmem:[#allocation28_spill] sm:$0xff]  ;;  %v7131_v42 = vld [vmem:[#allocation122_spill] sm:$0xff] }
 0x313   : > { %v2181_v8 = vmul.f32 %v7127_v46, %v7126_v47  ;;  %v1622_v10 = vadd.f32 %v7128_v32, %v1581_v59  ;;  %v2076_v14 = vadd.f32 %v2058_v33, %v2035_v62  ;;  %v2182_v5 = vmul.f32 %v7127_v46, %v7129_v28  ;;  %v7133_v50 = vld [vmem:[#allocation17_spill] sm:$0xff]  ;;  %v7134_v59 = vld [vmem:[#allocation12_spill] sm:$0xff]  ;;  %v7135_v33 = vld [vmem:[#allocation6_spill] sm:$0xff] }
 0x314   : > { %v2077_v12 = vadd.f32 %v2059_v48, %v2036_v17  ;;  %v2222_v36 = vmul.f32 %v7130_v58, %v5742_v0  ;;  %v2223_v18 = vmul.f32 %v7130_v58, %v5744_v25  ;;  %v2291_v15 = vmul.f32 %v7132_v2, %v7131_v42  ;;  %v7136_v62 = vld [vmem:[#allocation87_spill] sm:$0xff]  ;;  %v7137_v17 = vld [vmem:[#allocation73_spill] sm:$0xff]  ;;  %v7138_v46 = vld [vmem:[#allocation90_spill] sm:$0xff] }
 0x315   : > { %v2292_v44 = vmul.f32 %v7133_v50, %v7131_v42  ;;  %v2117_v53 = vadd.f32 %v2099_v54, %v2076_v14  ;;  %v2332_v48 = vmul.f32 %v7135_v33, %v7134_v59  ;;  %v1530_v32 = vadd.f32 %v7137_v17, %v7136_v62  ;;  %v7139_v2 = vld [vmem:[#allocation49_spill] sm:$0xff]  ;;  %v7144_v33 = vld [vmem:[#allocation92_spill] sm:$0xff] }
 0x316   : > { %v2118_v60 = vadd.f32 %v2100_v41, %v2077_v12  ;;  %v1582_v28 = vadd.f32 %v7138_v46, %v1541_v43  ;;  %v2333_v0 = vmul.f32 %v5638_v9, %v7134_v59  ;;  %v2373_v58 = vmul.f32 %v5626_v35, %v5391_v19  ;;  %v7140_v25 = vld [vmem:[#allocation81_spill] sm:$0xff]  ;;  %v5782_v12 = vld [vmem:[#allocation3 + $0xad] sm:$0xff]  ;;  %v7147_v9 = vld [vmem:[#allocation98_spill] sm:$0xff] }
 0x317   : > { %v1531_v31 = vadd.f32 %v7140_v25, %v7139_v2  ;;  %v7141_v50 = vld [vmem:[#allocation9_spill] sm:$0xff]  ;;  %v2158_v41 = vadd.f32 %v2140_v55, %v2117_v53  ;;  %7143 = vst [vmem:[#allocation66_spill] sm:$0xff] %v5782_v12  ;;  %v1571_v62 = vadd.f32 %v7144_v33, %v1530_v32  ;;  %v7145_v17 = vld [vmem:[#allocation76_spill] sm:$0xff]  ;;  %v7146_v46 = vld [vmem:[#allocation51_spill] sm:$0xff]  ;;  %v2456_v32 = vmul.f32 %v7097_v57, %v5665_v39 }
 0x318   : > { %v5780_v54 = vadd.f32 %v7141_v50, %v1622_v10  ;;  %v2159_v14 = vadd.f32 %v2141_v3, %v2118_v60  ;;  %v2374_v43 = vmul.f32 %v5626_v35, %v7145_v17  ;;  %v2414_v59 = vmul.f32 %v7146_v46, %v7096_v30  ;;  %v5792_v50 = vld [vmem:[#allocation3 + $0xb5] sm:$0xff] }
 0x319   : > { %v2415_v19 = vmul.f32 %v7146_v46, %v5441_v23  ;;  %v1572_v25 = vadd.f32 %v7147_v9, %v1531_v31  ;;  %v2199_v2 = vadd.f32 %v2181_v8, %v2158_v41  ;;  %7148 = vst [vmem:[#allocation67_spill] sm:$0xff] %v5792_v50  ;;  %v2455_v60 = vmul.f32 %v7097_v57, %v5659_v20  ;;  %v7149_v53 = vld [vmem:[#allocation105_spill] sm:$0xff]  ;;  %v7150_v3 = vld [vmem:[#allocation88_spill] sm:$0xff]  ;;  %v7153_v41 = vld [vmem:[#allocation118_spill] sm:$0xff] }
 0x31a   : > { %7142 = vst [vmem:[#allocation96_spill] sm:$0xff] %v5780_v54  ;;  %v2200_v10 = vadd.f32 %v2182_v5, %v2159_v14  ;;  %v1612_v55 = vadd.f32 %v7149_v53, %v1571_v62  ;;  %v5798_v33 = vadd.f32 %v7150_v3, %v1582_v28  ;;  %v5804_v54 = vmul.f32 %v5422_v51, %v5782_v12  ;;  %v7152_v9 = vld [vmem:[#allocation56_spill] sm:$0xff]  ;;  %v3546_v46 = vld [vmem:[#allocation3 + $0xc2] sm:$0xff]  ;;  %v5814_v57 = vld [vmem:[%s3837_s27 + $0x9] ss:$0 sm:$0xff] }
 0x31b   : > { %v1613_v31 = vadd.f32 %v7152_v9, %v1572_v25  ;;  %v2240_v8 = vadd.f32 %v2222_v36, %v2199_v2  ;;  %v1676_v20 = vmul.f32 %v3546_v46, %v5453_v21  ;;  %v2497_v28 = vmul.f32 %v5422_v51, %v5792_v50  ;;  %v7154_v62 = vld [vmem:[#allocation128_spill] sm:$0xff] }
 0x31c   : > { %7151 = vst [vmem:[#allocation79_spill] sm:$0xff] %v5798_v33  ;;  %v2241_v5 = vadd.f32 %v2223_v18, %v2200_v10  ;;  %v1653_v14 = vadd.f32 %v7153_v41, %v1612_v55  ;;  %v3547_v3 = vld [vmem:[#allocation3 + $0xca] sm:$0xff]  ;;  %v1786_v25 = vmul.f32 %v5814_v57, %v5326_v45  ;;  %v1787_v55 = vmul.f32 %v5814_v57, %v5338_v52  ;;  %v7155_v52 = vld [vmem:[#allocation53_spill] sm:$0xff] }
 0x31d   : > { %v1654_v53 = vadd.f32 %v7154_v62, %v1613_v31  ;;  %v1677_v33 = vmul.f32 %v3547_v3, %v5453_v21  ;;  %v3491_v36 = vld [vmem:[%s6589_s11] sm:$0xff]   ;;  %v5821_v18 = vld [vmem:[#allocation3 + $0xc3] sm:$0xff]  ;;  %v2309_v46 = vadd.f32 %v2291_v15, %v2240_v8  ;;  %v1827_v31 = vmul.f32 %v5497_v22, %v5301_v56 }
 0x31e   : > { %v2310_v2 = vadd.f32 %v2292_v44, %v2241_v5  ;;  %v1694_v10 = vadd.f32 %v1676_v20, %v1653_v14  ;;  %v5825_v9 = vld [vmem:[#allocation3 + $0xcb] sm:$0xff]  ;;  %v1828_v45 = vmul.f32 %v5497_v22, %v5312_v13  ;;  %v1868_v41 = vmul.f32 %v5507_v16, %v5511_v7  ;;  %3362 = vmatpush3.bf16.msra.mxu1 %v3491_v36  ;;  %v3492_v20 = vld [vmem:[%s6589_s11 + $0x8] sm:$0xff]   ;;  %v7156_v5 = vld [vmem:[#allocation62_spill] sm:$0xff] }
 0x31f   : > { %v1695_v21 = vadd.f32 %v1677_v33, %v1654_v53  ;;  %v2350_v44 = vadd.f32 %v2332_v48, %v2309_v46  ;;  %v1869_v33 = vmul.f32 %v5507_v16, %v5522_v24  ;;  %3363 = vmatprep.subr.bf16.mxu1 %v7113_v37  ;;  %v1909_v62 = vmul.f32 %v5299_v49, %v5697_v6 }
 0x320   : > { %v2351_v15 = vadd.f32 %v2333_v0, %v2310_v2  ;;  %v1763_v8 = vadd.f32 %v7155_v52, %v1694_v10  ;;  %v1910_v53 = vmul.f32 %v5299_v49, %v5701_v26  ;;  %v1950_v3 = vmul.f32 %v5310_v63, %v5821_v18 }
 0x321   : > { %v1764_v14 = vadd.f32 %v7156_v5, %v1695_v21  ;;  %v2391_v48 = vadd.f32 %v2373_v58, %v2350_v44  ;;  %v1951_v46 = vmul.f32 %v5310_v63, %v5825_v9  ;;  %v2019_v10 = vmul.f32 %v5721_v38, %v7115_v40  ;;  %v3493_v58 = vld [vmem:[%s6589_s11 + $0x10] sm:$0xff]  }
 0x322   : > { %v2392_v0 = vadd.f32 %v2374_v43, %v2351_v15  ;;  %v1804_v36 = vadd.f32 %v1786_v25, %v1763_v8  ;;  %v2020_v21 = vmul.f32 %v5721_v38, %v7116_v27  ;;  %v2060_v52 = vmul.f32 %v7114_v11, %v7119_v29  ;;  %3364 = vmatpush3.bf16.msra.mxu1 %v3492_v20  ;;  %v5858_v15 = vld [vmem:[#allocation3 + $0xc4] sm:$0xff]  ;;  %v5863_v27 = vld [vmem:[#allocation3 + $0xcc] sm:$0xff] }
 0x323   : > { %v1805_v2 = vadd.f32 %v1787_v55, %v1764_v14  ;;  %v2432_v43 = vadd.f32 %v2414_v59, %v2391_v48  ;;  %7157 = vst [vmem:[#allocation113_spill] sm:$0xff] %v5858_v15  ;;  %v2061_v55 = vmul.f32 %v7114_v11, %v7121_v1  ;;  %3365 = vmatprep.subr.bf16.mxu1 %v7113_v37  ;;  %7158 = vst [vmem:[#allocation100_spill] sm:$0xff] %v5863_v27  ;;  %v7159_v59 = vld [vmem:[#allocation65_spill] sm:$0xff]  ;;  %v7160_v48 = vld [vmem:[#allocation20_spill] sm:$0xff] }
 0x324   : > { %v2433_v25 = vadd.f32 %v2415_v19, %v2392_v0  ;;  %v1845_v44 = vadd.f32 %v1827_v31, %v1804_v36  ;;  %v2101_v20 = vmul.f32 %v7120_v34, %v7123_v4  ;;  %v2102_v8 = vmul.f32 %v7120_v34, %v7125_v61  ;;  %v7161_v36 = vld [vmem:[#allocation94_spill] sm:$0xff]  ;;  %v7163_v4 = vld [vmem:[#allocation101_spill] sm:$0xff]  ;;  %v7164_v34 = vld [vmem:[#allocation28_spill] sm:$0xff] }
 0x325   : > { %v1846_v40 = vadd.f32 %v1828_v45, %v1805_v2  ;;  %v5871_v19 = vmul.f32 %v7159_v59, %v7126_v47  ;;  %v2473_v31 = vadd.f32 %v2455_v60, %v2432_v43  ;;  %v5875_v0 = vmul.f32 %v7159_v59, %v7160_v48  ;;  %v7162_v2 = vld [vmem:[#allocation18_spill] sm:$0xff]  ;;  %v3494_v60 = vld [vmem:[%s6589_s11 + $0x18] sm:$0xff]  }
 0x326   : > { %v2474_v5 = vadd.f32 %v2456_v32, %v2433_v25  ;;  %v1886_v14 = vadd.f32 %v1868_v41, %v1845_v44  ;;  %v5879_v11 = vmul.f32 %v7162_v2, %v7161_v36  ;;  %v5883_v1 = vmul.f32 %v7162_v2, %v7163_v4  ;;  %3366 = vmatpush3.bf16.msra.mxu1 %v3493_v58  ;;  %v7165_v44 = vld [vmem:[#allocation6_spill] sm:$0xff]  ;;  %v7168_v4 = vld [vmem:[#allocation25_spill] sm:$0xff] }
 0x327   : > { %v1887_v45 = vadd.f32 %v1869_v33, %v1846_v40  ;;  %v5887_v47 = vmul.f32 %v7164_v34, %v5858_v15  ;;  %v2514_v32 = vadd.f32 %v5804_v54, %v2473_v31  ;;  %v5895_v43 = vmul.f32 %v7164_v34, %v5863_v27  ;;  %3367 = vmatprep.subr.bf16.mxu1 %v7113_v37  ;;  %v7166_v58 = vld [vmem:[#allocation10_spill] sm:$0xff]  ;;  %v7171_v34 = vld [vmem:[#allocation108_spill] sm:$0xff]  ;;  %v7172_v27 = vld [vmem:[#allocation109_spill] sm:$0xff] }
 0x328   : > { %v2515_v41 = vadd.f32 %v2497_v28, %v2474_v5  ;;  %v1927_v33 = vadd.f32 %v1909_v62, %v1886_v14  ;;  %v5900_v40 = vmul.f32 %v7165_v44, %v7131_v42  ;;  %v5904_v2 = vmul.f32 %v7166_v58, %v7131_v42  ;;  %v7167_v15 = vld [vmem:[#allocation78_spill] sm:$0xff]  ;;  %v7170_v5 = vld [vmem:[#allocation12_spill] sm:$0xff] }
 0x329   : > { %v1928_v25 = vadd.f32 %v1910_v53, %v1887_v45  ;;  %v1573_v54 = vadd.f32 %v7168_v4, %v7167_v15  ;;  %v7169_v31 = vld [vmem:[#allocation110_spill] sm:$0xff]  ;;  %v1574_v53 = vadd.f32 %v7172_v27, %v7171_v34  ;;  %v5918_v44 = vmul.f32 %v7170_v5, %v7145_v17  ;;  %v7174_v4 = vld [vmem:[#allocation117_spill] sm:$0xff]  ;;  %v3495_v15 = vld [vmem:[%s6589_s11 + $0x20] sm:$0xff]  }
 0x32a   : > { %v2530_v28 = vpack.c.bf16 %v2515_v41, %v2514_v32  ;;  %v1968_v62 = vadd.f32 %v1950_v3, %v1927_v33  ;;  %v5910_v14 = vmul.f32 %v7170_v5, %v7169_v31  ;;  %v5914_v59 = vld [vmem:[#allocation3 + $0xc5] sm:$0xff]  ;;  %v5922_v58 = vmul.f32 %v5626_v35, %v7096_v30  ;;  %3368 = vmatpush3.bf16.msra.mxu1 %v3494_v60  ;;  %v7176_v32 = vld [vmem:[#allocation60_spill] sm:$0xff] }
 0x32b   : > { %v1969_v45 = vadd.f32 %v1951_v46, %v1928_v25  ;;  %7173 = vst [vmem:[#allocation106_spill] sm:$0xff] %v5914_v59  ;;  %v1614_v3 = vadd.f32 %v7174_v4, %v1573_v54  ;;  %v5928_v46 = vld [vmem:[#allocation3 + $0xcd] sm:$0xff]  ;;  %v5932_v27 = vmul.f32 %v5626_v35, %v5441_v23  ;;  %v7178_v25 = vld [vmem:[#allocation126_spill] sm:$0xff]  ;;  %3369 = vmatprep.subr.bf16.mxu1 %v7113_v37 }
 0x32c   : > { %3334 = vmatmul.mubr.bf16.gmra.mrb[8].mxu1 %v2530_v28  ;;  %v2037_v34 = vadd.f32 %v2019_v10, %v1968_v62  ;;  %7175 = vst [vmem:[#allocation127_spill] sm:$0xff] %v5928_v46  ;;  %v7177_v41 = vld [vmem:[#allocation51_spill] sm:$0xff]  ;;  %v1615_v5 = vadd.f32 %v7178_v25, %v1574_v53  ;;  %v7179_v10 = vld [vmem:[#allocation52_spill] sm:$0xff]  ;;  %v5956_v53 = vmul.f32 %v5422_v51, %v5914_v59 }
 0x32d   : > { %v5936_v33 = vmul.f32 %v7177_v41, %v7176_v32  ;;  %3337 = vmatprep.mubr.msk.bf16.mxu1 %vm3581_vm1, %v7113_v37  ;;  %v2038_v60 = vadd.f32 %v2020_v21, %v1969_v45  ;;  %v5943_v54 = vmul.f32 %v7177_v41, %v5665_v39  ;;  %v5947_v28 = vmul.f32 %v7179_v10, %v5782_v12  ;;  %v7180_v62 = vld [vmem:[#allocation36_spill] sm:$0xff]  ;;  %v7182_v12 = vld [vmem:[#allocation121_spill] sm:$0xff] }
 0x32e   : > { %v1655_v4 = vadd.f32 %v7180_v62, %v1614_v3  ;;  %v2078_v35 = vadd.f32 %v2060_v52, %v2037_v34  ;;  %v5952_v32 = vmul.f32 %v7179_v10, %v5792_v50  ;;  %v7181_v21 = vld [vmem:[#allocation72_spill] sm:$0xff]  ;;  %v5962_v41 = vmul.f32 %v5422_v51, %v5928_v46  ;;  %3370 = vmatpush3.bf16.msra.mxu1 %v3495_v15  ;;  %v5967_v34 = vld [vmem:[#allocation3 + $0xdb] sm:$0xff] }
 0x32f   : > { %v1656_v45 = vadd.f32 %v7181_v21, %v1615_v5  ;;  %v2079_v25 = vadd.f32 %v2061_v55, %v2038_v60  ;;  %v1788_v52 = vmul.f32 %v5814_v57, %v5301_v56  ;;  %v7183_v10 = vld [vmem:[#allocation80_spill] sm:$0xff]  ;;  %v1789_v5 = vmul.f32 %v5814_v57, %v5312_v13  ;;  %3371 = vmatprep.subr.bf16.mxu1 %v7113_v37  ;;  %v5975_v60 = vld [vmem:[#allocation3 + $0xe3] sm:$0xff] }
 0x330   : > { %v1696_v3 = vadd.f32 %v7182_v12, %v1655_v4  ;;  %v2119_v62 = vadd.f32 %v2101_v20, %v2078_v35  ;;  %v1829_v55 = vmul.f32 %v5497_v22, %v5511_v7  ;;  %v7184_v4 = vld [vmem:[#allocation77_spill] sm:$0xff]  ;;  %v1830_v15 = vmul.f32 %v5497_v22, %v5522_v24 }
 0x331   : > { %v1697_v59 = vadd.f32 %v7183_v10, %v1656_v45  ;;  %v2120_v12 = vadd.f32 %v2102_v8, %v2079_v25  ;;  %v1870_v35 = vmul.f32 %v5507_v16, %v5697_v6  ;;  %v7185_v10 = vld [vmem:[#allocation85_spill] sm:$0xff]  ;;  %v1871_v51 = vmul.f32 %v5507_v16, %v5701_v26 }
 0x332   : > { %v1765_v21 = vadd.f32 %v7184_v4, %v1696_v3  ;;  %v2160_v20 = vadd.f32 %v5871_v19, %v2119_v62  ;;  %v1911_v46 = vmul.f32 %v5299_v49, %v5821_v18  ;;  %v1912_v3 = vmul.f32 %v5299_v49, %v5825_v9  ;;  %v7188_v49 = vld [vmem:[#allocation125_spill] sm:$0xff] }
 0x333   : > { %v1766_v45 = vadd.f32 %v7185_v10, %v1697_v59  ;;  %v2161_v8 = vadd.f32 %v5875_v0, %v2120_v12  ;;  %v1952_v4 = vmul.f32 %v5310_v63, %v5967_v34  ;;  %v1953_v59 = vmul.f32 %v5310_v63, %v5975_v60  ;;  %v7186_v0 = vld [vmem:[#allocation8_spill] sm:$0xff]  ;;  %v7187_v12 = vld [vmem:[#allocation34_spill] sm:$0xff] }
 0x334   : > { %v1806_v25 = vadd.f32 %v1788_v52, %v1765_v21  ;;  %v2201_v50 = vadd.f32 %v5879_v11, %v2160_v20  ;;  %v2021_v62 = vmul.f32 %v5721_v38, %v7119_v29  ;;  %v2022_v52 = vmul.f32 %v5721_v38, %v7186_v0  ;;  %v6004_v11 = vld [vmem:[#allocation3 + $0xdc] sm:$0xff]  ;;  %v7190_v20 = vld [vmem:[#allocation31_spill] sm:$0xff] }
 0x335   : > { %v1807_v19 = vadd.f32 %v1789_v5, %v1766_v45  ;;  %v2202_v10 = vadd.f32 %v5883_v1, %v2161_v8  ;;  %v2062_v21 = vmul.f32 %v7188_v49, %v7187_v12  ;;  %v2063_v63 = vmul.f32 %v7188_v49, %v7125_v61  ;;  %v7189_v5 = vld [vmem:[#allocation15_spill] sm:$0xff]  ;;  %v7194_v0 = vld [vmem:[#allocation113_spill] sm:$0xff]  ;;  %v7195_v12 = vld [vmem:[#allocation18_spill] sm:$0xff] }
 0x336   : > { %v1847_v37 = vadd.f32 %v1829_v55, %v1806_v25  ;;  %v2242_v39 = vadd.f32 %v5887_v47, %v2201_v50  ;;  %v2103_v29 = vmul.f32 %v7190_v20, %v7189_v5  ;;  %v6011_v45 = vld [vmem:[#allocation3 + $0xe4] sm:$0xff]  ;;  %v2104_v8 = vmul.f32 %v7190_v20, %v7160_v48  ;;  %v7192_v25 = vld [vmem:[#allocation65_spill] sm:$0xff]  ;;  %v7197_v20 = vld [vmem:[#allocation28_spill] sm:$0xff] }
 0x337   : > { %v1848_v23 = vadd.f32 %v1830_v15, %v1807_v19  ;;  %v2243_v1 = vadd.f32 %v5895_v43, %v2202_v10  ;;  %7191 = vst [vmem:[#allocation91_spill] sm:$0xff] %v6011_v45  ;;  %v2144_v47 = vmul.f32 %v7192_v25, %v7161_v36  ;;  %v7193_v19 = vld [vmem:[#allocation101_spill] sm:$0xff]  ;;  %v2185_v49 = vmul.f32 %v7195_v12, %v7194_v0 }
 0x338   : > { %v1888_v55 = vadd.f32 %v1870_v35, %v1847_v37  ;;  %v2311_v50 = vadd.f32 %v5900_v40, %v2242_v39  ;;  %v2145_v61 = vmul.f32 %v7192_v25, %v7193_v19  ;;  %v7196_v35 = vld [vmem:[#allocation100_spill] sm:$0xff]  ;;  %v2226_v48 = vmul.f32 %v7197_v20, %v6004_v11 }
 0x339   : > { %v1889_v15 = vadd.f32 %v1871_v51, %v1848_v23  ;;  %v2312_v37 = vadd.f32 %v5904_v2, %v2243_v1  ;;  %v2186_v10 = vmul.f32 %v7195_v12, %v7196_v35  ;;  %v2227_v51 = vmul.f32 %v7197_v20, %v6011_v45  ;;  %v7198_v20 = vld [vmem:[#allocation12_spill] sm:$0xff] }
 0x33a   : > { %v1929_v43 = vadd.f32 %v1911_v46, %v1888_v55  ;;  %v2352_v36 = vadd.f32 %v5910_v14, %v2311_v50  ;;  %v6032_v23 = vmul.f32 %v7131_v42, %v7169_v31  ;;  %v6037_v40 = vmul.f32 %v7131_v42, %v7145_v17  ;;  %v6040_v46 = vld [vmem:[%s3837_s27 + $0x3] ss:$0 sm:$0xff]  ;;  %v7199_v17 = vld [vmem:[#allocation57_spill] sm:$0xff] }
 0x33b   : > { %v1930_v5 = vadd.f32 %v1912_v3, %v1889_v15  ;;  %v2353_v39 = vadd.f32 %v5918_v44, %v2312_v37  ;;  %v1749_v14 = vmul.f32 %v6040_v46, %v5301_v56  ;;  %v6047_v55 = vmul.f32 %v7198_v20, %v7096_v30 }
 0x33c   : > { %v1970_v2 = vadd.f32 %v1952_v4, %v1929_v43  ;;  %v2393_v3 = vadd.f32 %v5922_v58, %v2352_v36  ;;  %v1750_v31 = vmul.f32 %v6040_v46, %v5312_v13  ;;  %v1790_v15 = vmul.f32 %v5814_v57, %v5511_v7  ;;  %v7200_v36 = vld [vmem:[#allocation38_spill] sm:$0xff] }
 0x33d   : > { %v1971_v1 = vadd.f32 %v1953_v59, %v1930_v5  ;;  %v2394_v44 = vadd.f32 %v5932_v27, %v2353_v39  ;;  %v1767_v50 = vadd.f32 %v1749_v14, %v7199_v17  ;;  %v1791_v30 = vmul.f32 %v5814_v57, %v5522_v24 }
 0x33e   : > { %v2039_v4 = vadd.f32 %v2021_v62, %v1970_v2  ;;  %v2434_v56 = vadd.f32 %v5936_v33, %v2393_v3  ;;  %v1768_v58 = vadd.f32 %v1750_v31, %v7200_v36  ;;  %v1831_v27 = vmul.f32 %v5497_v22, %v5697_v6 }
 0x33f   : > { %v2040_v12 = vadd.f32 %v2022_v52, %v1971_v1  ;;  %v2435_v59 = vadd.f32 %v5943_v54, %v2394_v44  ;;  %v1808_v13 = vadd.f32 %v1790_v15, %v1767_v50  ;;  %v1832_v33 = vmul.f32 %v5497_v22, %v5701_v26  ;;  %v6073_v1 = vld [vmem:[#allocation3 + $0xfb] sm:$0xff]  ;;  %v6077_v44 = vld [vmem:[%s3837_s27 + $0x1b] ss:$0 sm:$0xff] }
 0x340   : > { %v2080_v5 = vadd.f32 %v2062_v21, %v2039_v4  ;;  %v2475_v62 = vadd.f32 %v5947_v28, %v2434_v56  ;;  %v1809_v43 = vadd.f32 %v1791_v30, %v1768_v58  ;;  %v1872_v54 = vmul.f32 %v5507_v16, %v5821_v18  ;;  %v6068_v21 = vld [vmem:[#allocation3 + $0xf3] sm:$0xff]  ;;  %v7201_v50 = vld [vmem:[#allocation95_spill] sm:$0xff]  ;;  %v6086_v58 = vld [vmem:[%s3837_s27 + $0x21] ss:$0 sm:$0xff] }
 0x341   : > { %v2081_v37 = vadd.f32 %v2063_v63, %v2040_v12  ;;  %v2476_v52 = vadd.f32 %v5952_v32, %v2435_v59  ;;  %v1849_v2 = vadd.f32 %v1831_v27, %v1808_v13  ;;  %v1873_v63 = vmul.f32 %v5507_v16, %v5825_v9  ;;  %v7202_v30 = vld [vmem:[#allocation60_spill] sm:$0xff]  ;;  %v7203_v59 = vld [vmem:[#allocation37_spill] sm:$0xff] }
 0x342   : > { %v2121_v39 = vadd.f32 %v2103_v29, %v2080_v5  ;;  %v2516_v14 = vadd.f32 %v5956_v53, %v2475_v62  ;;  %v1850_v28 = vadd.f32 %v1832_v33, %v1809_v43  ;;  %v1913_v4 = vmul.f32 %v6077_v44, %v5967_v34  ;;  %v7204_v62 = vld [vmem:[#allocation21_spill] sm:$0xff] }
 0x343   : > { %v2122_v3 = vadd.f32 %v2104_v8, %v2081_v37  ;;  %v2517_v31 = vadd.f32 %v5962_v41, %v2476_v52  ;;  %v1890_v29 = vadd.f32 %v1872_v54, %v1849_v2  ;;  %v2337_v53 = vmul.f32 %v7198_v20, %v7201_v50  ;;  %v3552_v43 = vld [vmem:[#allocation3 + $0x7c] sm:$0xff]  ;;  %v7207_v2 = vld [vmem:[#allocation51_spill] sm:$0xff] }
 0x344   : > { %v2162_v32 = vadd.f32 %v2144_v47, %v2121_v39  ;;  %v1891_v8 = vadd.f32 %v1873_v63, %v1850_v28  ;;  %v1914_v15 = vmul.f32 %v6077_v44, %v5975_v60  ;;  %v1954_v41 = vmul.f32 %v6086_v58, %v6068_v21  ;;  %v7206_v39 = vld [vmem:[#allocation66_spill] sm:$0xff] }
 0x345   : > { %v2163_v17 = vadd.f32 %v2145_v61, %v2122_v3  ;;  %v2531_v56 = vpack.c.bf16 %v2517_v31, %v2516_v14  ;;  %v1931_v36 = vadd.f32 %v1913_v4, %v1890_v29  ;;  %v2377_v5 = vmul.f32 %v7203_v59, %v7202_v30  ;;  %v3553_v3 = vld [vmem:[#allocation3 + $0x84] sm:$0xff] }
 0x346   : > { %v2203_v12 = vadd.f32 %v2185_v49, %v2162_v32  ;;  %v1932_v61 = vadd.f32 %v1914_v15, %v1891_v8  ;;  %v1955_v13 = vmul.f32 %v6086_v58, %v6073_v1  ;;  %v2378_v37 = vmul.f32 %v7203_v59, %v7204_v62  ;;  %v6102_v63 = vld [vmem:[#allocation3 + $0xdd] sm:$0xff]  ;;  %v7208_v31 = vld [vmem:[#allocation67_spill] sm:$0xff] }
 0x347   : > { %v2204_v47 = vadd.f32 %v2186_v10, %v2163_v17  ;;  %3338 = vmatmul.mubr.bf16.gmra.mrb[12].mxu1 %v2531_v56  ;;  %v1972_v49 = vadd.f32 %v1954_v41, %v1931_v36  ;;  %v2023_v33 = vmul.f32 %v3552_v43, %v5721_v38  ;;  %v7205_v52 = vmov 0.0   ;;  %v7209_v4 = vld [vmem:[#allocation15_spill] sm:$0xff]  ;;  %v7210_v17 = vld [vmem:[#allocation125_spill] sm:$0xff]  ;;  %v7212_v56 = vld [vmem:[#allocation106_spill] sm:$0xff] }
 0x348   : > { %v2244_v27 = vadd.f32 %v2226_v48, %v2203_v12  ;;  %3341 = vmatprep.mubr.msk.bf16.mxu1 %vm3581_vm1, %v7205_v52  ;;  %v2418_v54 = vmul.f32 %v7207_v2, %v7206_v39  ;;  %v1973_v14 = vadd.f32 %v1955_v13, %v1932_v61  ;;  %v2024_v28 = vmul.f32 %v3553_v3, %v5721_v38  ;;  %v6109_v15 = vld [vmem:[#allocation3 + $0xe5] sm:$0xff]  ;;  %v7213_v12 = vld [vmem:[#allocation52_spill] sm:$0xff] }
 0x349   : > { %v2245_v10 = vadd.f32 %v2227_v51, %v2204_v47  ;;  %v2419_v32 = vmul.f32 %v7207_v2, %v7208_v31  ;;  %v2041_v29 = vadd.f32 %v2023_v33, %v1972_v49  ;;  %v2064_v8 = vmul.f32 %v7210_v17, %v7209_v4  ;;  %7211 = vst [vmem:[#allocation71_spill] sm:$0xff] %v6109_v15  ;;  %v7214_v47 = vld [vmem:[#allocation20_spill] sm:$0xff]  ;;  %v7215_v13 = vld [vmem:[#allocation127_spill] sm:$0xff]  ;;  %v7216_v43 = vld [vmem:[#allocation94_spill] sm:$0xff] }
 0x34a   : > { %v2313_v48 = vadd.f32 %v6032_v23, %v2244_v27  ;;  %v2459_v36 = vmul.f32 %v7213_v12, %v7212_v56  ;;  %v2042_v41 = vadd.f32 %v2024_v28, %v1973_v14  ;;  %v2065_v61 = vmul.f32 %v7210_v17, %v7214_v47  ;;  %v7217_v33 = vld [vmem:[#allocation31_spill] sm:$0xff]  ;;  %v6123_v4 = vld [vmem:[#allocation3 + $0xf4] sm:$0xff] }
 0x34b   : > { %v2314_v51 = vadd.f32 %v6037_v40, %v2245_v10  ;;  %v2460_v27 = vmul.f32 %v7213_v12, %v7215_v13  ;;  %v2082_v49 = vadd.f32 %v2064_v8, %v2041_v29  ;;  %v2105_v3 = vmul.f32 %v7217_v33, %v7216_v43  ;;  %v7218_v40 = vld [vmem:[#allocation16_spill] sm:$0xff]  ;;  %7219 = vst [vmem:[#allocation14_spill] sm:$0xff] %v6123_v4  ;;  %v6129_v12 = vld [vmem:[#allocation3 + $0xfc] sm:$0xff]  ;;  %v6136_v43 = vld [vmem:[%s3837_s27 + $0x1c] ss:$0 sm:$0xff] }
 0x34c   : > { %v2354_v23 = vadd.f32 %v6047_v55, %v2313_v48  ;;  %v2500_v10 = vmul.f32 %v7218_v40, %v6102_v63  ;;  %v2083_v14 = vadd.f32 %v2065_v61, %v2042_v41  ;;  %v2106_v28 = vmul.f32 %v7217_v33, %v7193_v19  ;;  %7220 = vst [vmem:[#allocation7_spill] sm:$0xff] %v6136_v43 }
 0x34d   : > { %v2355_v38 = vadd.f32 %v2337_v53, %v2314_v51  ;;  %v2501_v48 = vmul.f32 %v7218_v40, %v6109_v15  ;;  %v2123_v29 = vadd.f32 %v2105_v3, %v2082_v49  ;;  %v2146_v53 = vmul.f32 %v7192_v25, %v7194_v0  ;;  %v6143_v40 = vld [vmem:[%s3837_s27 + $0x22] ss:$0 sm:$0xff] }
 0x34e   : > { %v2395_v55 = vadd.f32 %v2377_v5, %v2354_v23  ;;  %v2124_v51 = vadd.f32 %v2106_v28, %v2083_v14  ;;  %v2147_v17 = vmul.f32 %v7192_v25, %v7196_v35  ;;  %v2187_v41 = vmul.f32 %v6136_v43, %v6004_v11  ;;  %v3556_v28 = vld [vmem:[#allocation3 + $0x7d] sm:$0xff] }
 0x34f   : > { %v2396_v8 = vadd.f32 %v2378_v37, %v2355_v38  ;;  %v2164_v61 = vadd.f32 %v2146_v53, %v2123_v29  ;;  %v2188_v23 = vmul.f32 %v6136_v43, %v6011_v45  ;;  %v2228_v49 = vmul.f32 %v6143_v40, %v6123_v4  ;;  %v3496_v38 = vld [vmem:[%s6589_s11 + $0x28] sm:$0xff]  }
 0x350   : > { %v2436_v5 = vadd.f32 %v2418_v54, %v2395_v55  ;;  %v2165_v3 = vadd.f32 %v2147_v17, %v2124_v51  ;;  %v2229_v14 = vmul.f32 %v6143_v40, %v6129_v12  ;;  %v2297_v54 = vmul.f32 %v3556_v28, %v7131_v42  ;;  %3372 = vmatpush3.bf16.msra.mxu1 %v3496_v38  ;;  %v7221_v51 = vld [vmem:[#allocation115_spill] sm:$0xff] }
 0x351   : > { %v2437_v37 = vadd.f32 %v2419_v32, %v2396_v8  ;;  %v2205_v29 = vadd.f32 %v2187_v41, %v2164_v61  ;;  %v2298_v53 = vmul.f32 %v7131_v42, %v7201_v50  ;;  %v1751_v43 = vmul.f32 %v6040_v46, %v5511_v7  ;;  %3373 = vmatprep.subr.bf16.mxu1 %v7205_v52  ;;  %v3497_v7 = vld [vmem:[%s6589_s11 + $0x30] sm:$0xff]   ;;  %v7222_v61 = vld [vmem:[#allocation5_spill] sm:$0xff] }
 0x352   : > { %v2477_v55 = vadd.f32 %v2459_v36, %v2436_v5  ;;  %v2206_v45 = vadd.f32 %v2188_v23, %v2165_v3  ;;  %v2338_v32 = vmul.f32 %v7198_v20, %v7202_v30  ;;  %v1752_v17 = vmul.f32 %v6040_v46, %v5522_v24 }
 0x353   : > { %v2478_v4 = vadd.f32 %v2460_v27, %v2437_v37  ;;  %v2246_v36 = vadd.f32 %v2228_v49, %v2205_v29  ;;  %v1769_v41 = vadd.f32 %v1751_v43, %v7221_v51  ;;  %v1792_v50 = vmul.f32 %v5814_v57, %v5697_v6 }
 0x354   : > { %v2518_v8 = vadd.f32 %v2500_v10, %v2477_v55  ;;  %v2247_v5 = vadd.f32 %v2229_v14, %v2206_v45  ;;  %v1770_v23 = vadd.f32 %v1752_v17, %v7222_v61  ;;  %v1793_v24 = vmul.f32 %v5814_v57, %v5701_v26  ;;  %3374 = vmatpush3.bf16.msra.mxu1 %v3497_v7 }
 0x355   : > { %v2519_v27 = vadd.f32 %v2501_v48, %v2478_v4  ;;  %v2315_v38 = vadd.f32 %v2297_v54, %v2246_v36  ;;  %v2339_v10 = vmul.f32 %v7198_v20, %v7204_v62  ;;  %v1810_v49 = vadd.f32 %v1792_v50, %v1769_v41  ;;  %3375 = vmatprep.subr.bf16.mxu1 %v7205_v52  ;;  %v3498_v4 = vld [vmem:[%s6589_s11 + $0x38] sm:$0xff]   ;;  %v6195_v36 = vld [vmem:[#allocation3 + $0x113] sm:$0xff] }
 0x356   : > { %v1833_v43 = vmul.f32 %v5497_v22, %v5821_v18  ;;  %v2316_v3 = vadd.f32 %v2298_v53, %v2247_v5  ;;  %v1811_v28 = vadd.f32 %v1793_v24, %v1770_v23  ;;  %v1834_v45 = vmul.f32 %v5497_v22, %v5825_v9  ;;  %v6187_v22 = vld [vmem:[#allocation3 + $0x10b] sm:$0xff]  ;;  %v6199_v41 = vld [vmem:[#allocation3 + $0xf5] sm:$0xff]  ;;  %v6205_v5 = vld [vmem:[#allocation3 + $0xfd] sm:$0xff] }
 0x357   : > { %v2532_v37 = vpack.c.bf16 %v2519_v27, %v2518_v8  ;;  %v2356_v48 = vadd.f32 %v2338_v32, %v2315_v38  ;;  %v2379_v20 = vmul.f32 %v7203_v59, %v7206_v39  ;;  %v1874_v54 = vmul.f32 %v5507_v16, %v5967_v34  ;;  %7223 = vst [vmem:[#allocation11_spill] sm:$0xff] %v6199_v41  ;;  %v6208_v23 = vld [vmem:[%s3837_s27 + $0x1d] ss:$0 sm:$0xff] }
 0x358   : > { %v1851_v14 = vadd.f32 %v1833_v43, %v1810_v49  ;;  %v2357_v55 = vadd.f32 %v2339_v10, %v2316_v3  ;;  %v2380_v29 = vmul.f32 %v7203_v59, %v7208_v31  ;;  %v1852_v53 = vadd.f32 %v1834_v45, %v1811_v28  ;;  %3376 = vmatpush3.bf16.msra.mxu1 %v3498_v4  ;;  %v6219_v45 = vld [vmem:[%s3837_s27 + $0x23] ss:$0 sm:$0xff] }
 0x359   : > { %3342 = vmatmul.mubr.bf16.gmra.mrb[16].mxu1 %v2532_v37  ;;  %v1875_v17 = vmul.f32 %v5507_v16, %v5975_v60  ;;  %v2397_v32 = vadd.f32 %v2379_v20, %v2356_v48  ;;  %v2420_v8 = vmul.f32 %v7207_v2, %v7212_v56  ;;  %v1915_v59 = vmul.f32 %v6077_v44, %v6068_v21  ;;  %v7226_v20 = vld [vmem:[#allocation15_spill] sm:$0xff] }
 0x35a   : > { %3345 = vmatprep.mubr.msk.bf16.mxu1 %vm3581_vm1, %v7205_v52  ;;  %v1892_v51 = vadd.f32 %v1874_v54, %v1851_v14  ;;  %v2398_v50 = vadd.f32 %v2380_v29, %v2357_v55  ;;  %v2421_v7 = vmul.f32 %v7207_v2, %v7215_v13  ;;  %v1916_v27 = vmul.f32 %v6077_v44, %v6073_v1  ;;  %v1458_v2 = vld [vmem:[#allocation3 + $0x13a] sm:$0xff]  ;;  %v7227_v14 = vld [vmem:[#allocation83_spill] sm:$0xff] }
 0x35b   : > { %v1893_v16 = vadd.f32 %v1875_v17, %v1852_v53  ;;  %7224 = vst [vmem:[#allocation19_spill] sm:$0xff] %v6205_v5  ;;  %v2438_v61 = vadd.f32 %v2420_v8, %v2397_v32  ;;  %v2461_v24 = vmul.f32 %v6208_v23, %v6102_v63  ;;  %v1956_v10 = vmul.f32 %v6086_v58, %v6187_v22  ;;  %v1459_v55 = vld [vmem:[#allocation3 + $0x142] sm:$0xff]  ;;  %v3559_v8 = vld [vmem:[%s3837_s27 + $0x20] ss:$0 sm:$0xff] }
 0x35c   : > { %v1933_v38 = vadd.f32 %v1915_v59, %v1892_v51  ;;  %v2439_v49 = vadd.f32 %v2421_v7, %v2398_v50  ;;  %v2462_v43 = vmul.f32 %v6208_v23, %v6109_v15  ;;  %v1957_v3 = vmul.f32 %v6086_v58, %v6195_v36  ;;  %7225 = vst [vmem:[#allocation30_spill] sm:$0xff] %v6219_v45  ;;  %v7228_v59 = vld [vmem:[#allocation79_spill] sm:$0xff]  ;;  %v7229_v50 = vld [vmem:[#allocation22_spill] sm:$0xff] }
 0x35d   : > { %v1934_v37 = vadd.f32 %v1916_v27, %v1893_v16  ;;  %v2479_v28 = vadd.f32 %v2461_v24, %v2438_v61  ;;  %v2502_v4 = vmul.f32 %v6219_v45, %v6199_v41  ;;  %v2025_v54 = vmul.f32 %v7227_v14, %v7226_v20  ;;  %v7230_v27 = vld [vmem:[#allocation94_spill] sm:$0xff]  ;;  %v7231_v61 = vld [vmem:[#allocation125_spill] sm:$0xff] }
 0x35e   : > { %v1974_v48 = vadd.f32 %v1956_v10, %v1933_v38  ;;  %v2480_v29 = vadd.f32 %v2462_v43, %v2439_v49  ;;  %v2503_v53 = vmul.f32 %v6219_v45, %v6205_v5  ;;  %v2026_v32 = vmul.f32 %v7227_v14, %v7214_v47  ;;  %v7232_v43 = vld [vmem:[#allocation42_spill] sm:$0xff]  ;;  %v7234_v5 = vld [vmem:[#allocation96_spill] sm:$0xff] }
 0x35f   : > { %v1975_v17 = vadd.f32 %v1957_v3, %v1934_v37  ;;  %v1686_v51 = vmul.f32 %v3559_v8, %v1458_v2  ;;  %v1664_v7 = vadd.f32 %v7229_v50, %v7228_v59  ;;  %v2066_v24 = vmul.f32 %v7231_v61, %v7230_v27  ;;  %v7233_v37 = vld [vmem:[#allocation75_spill] sm:$0xff] }
 0x360   : > { %v2043_v16 = vadd.f32 %v2025_v54, %v1974_v48  ;;  %v2520_v38 = vadd.f32 %v2502_v4, %v2479_v28  ;;  %v2521_v10 = vadd.f32 %v2503_v53, %v2480_v29  ;;  %v2067_v49 = vmul.f32 %v7231_v61, %v7193_v19  ;;  %v6243_v54 = vld [vmem:[#allocation3 + $0x10c] sm:$0xff] }
 0x361   : > { %v2044_v20 = vadd.f32 %v2026_v32, %v1975_v17  ;;  %v1703_v3 = vadd.f32 %v7233_v37, %v7232_v43  ;;  %v1687_v45 = vmul.f32 %v3559_v8, %v1459_v55  ;;  %v2107_v2 = vmul.f32 %v7217_v33, %v7194_v0  ;;  %7235 = vst [vmem:[#allocation23_spill] sm:$0xff] %v6243_v54  ;;  %v7236_v17 = vld [vmem:[#allocation91_spill] sm:$0xff]  ;;  %v6253_v8 = vld [vmem:[#allocation3 + $0x114] sm:$0xff] }
 0x362   : > { %v2084_v47 = vadd.f32 %v2066_v24, %v2043_v16  ;;  %v6241_v59 = vadd.f32 %v1686_v51, %v7234_v5  ;;  %v2533_v48 = vpack.c.bf16 %v2521_v10, %v2520_v38  ;;  %v2108_v4 = vmul.f32 %v7217_v33, %v7196_v35  ;;  %v7237_v51 = vld [vmem:[#allocation14_spill] sm:$0xff]  ;;  %v7238_v50 = vld [vmem:[#allocation7_spill] sm:$0xff]  ;;  %v7239_v10 = vld [vmem:[#allocation32_spill] sm:$0xff] }
 0x363   : > { %v2085_v28 = vadd.f32 %v2067_v49, %v2044_v20  ;;  %v6247_v29 = vadd.f32 %v1687_v45, %v1664_v7  ;;  %v2148_v55 = vmul.f32 %v7192_v25, %v6004_v11  ;;  %v2149_v32 = vmul.f32 %v7192_v25, %v7236_v17 }
 0x364   : > { %v2125_v53 = vadd.f32 %v2107_v2, %v2084_v47  ;;  %3346 = vmatmul.mubr.bf16.gmra.mrb[20].mxu1 %v2533_v48  ;;  %v2189_v16 = vmul.f32 %v7238_v50, %v7237_v51  ;;  %v1753_v33 = vmul.f32 %v6040_v46, %v5697_v6  ;;  %v1754_v45 = vmul.f32 %v6040_v46, %v5701_v26  ;;  %v6277_v47 = vld [vmem:[%s3837_s27 + $0xf] ss:$0 sm:$0xff] }
 0x365   : > { %v2126_v5 = vadd.f32 %v2108_v4, %v2085_v28  ;;  %3349 = vmatprep.mubr.msk.bf16.mxu1 %vm3581_vm1, %v7205_v52  ;;  %v2190_v25 = vmul.f32 %v7238_v50, %v6129_v12  ;;  %v2230_v61 = vmul.f32 %v6143_v40, %v6243_v54  ;;  %v1794_v24 = vmul.f32 %v5814_v57, %v5821_v18 }
 0x366   : > { %v2166_v7 = vadd.f32 %v2148_v55, %v2125_v53  ;;  %v1771_v6 = vadd.f32 %v1753_v33, %v7239_v10  ;;  %v1772_v20 = vadd.f32 %v1754_v45, %v1703_v3  ;;  %v1795_v26 = vmul.f32 %v5814_v57, %v5825_v9  ;;  %v6284_v55 = vld [vmem:[%s3837_s27 + $0x5] ss:$0 sm:$0xff]  ;;  %v6298_v45 = vld [vmem:[#allocation3 + $0x123] sm:$0xff] }
 0x367   : > { %v2167_v38 = vadd.f32 %v2149_v32, %v2126_v5  ;;  %v2231_v43 = vmul.f32 %v6143_v40, %v6253_v8  ;;  %v2299_v37 = vmul.f32 %v7131_v42, %v7202_v30  ;;  %v1835_v2 = vmul.f32 %v6277_v47, %v5967_v34  ;;  %v6289_v5 = vld [vmem:[%s3837_s27 + $0xb] ss:$0 sm:$0xff]  ;;  %v6294_v30 = vld [vmem:[%s3837_s27 + $0x15] ss:$0 sm:$0xff] }
 0x368   : > { %v2207_v49 = vadd.f32 %v2189_v16, %v2166_v7  ;;  %v1812_v28 = vadd.f32 %v1794_v24, %v1771_v6  ;;  %v1813_v4 = vadd.f32 %v1795_v26, %v1772_v20  ;;  %v1836_v3 = vmul.f32 %v6277_v47, %v5975_v60  ;;  %v6309_v6 = vld [vmem:[#allocation3 + $0x12b] sm:$0xff] }
 0x369   : > { %v2208_v48 = vadd.f32 %v2190_v25, %v2167_v38  ;;  %v2300_v32 = vmul.f32 %v6284_v55, %v7204_v62  ;;  %v2340_v42 = vmul.f32 %v6289_v5, %v7206_v39  ;;  %v1876_v16 = vmul.f32 %v6294_v30, %v6068_v21  ;;  %v6305_v38 = vld [vmem:[%s3837_s27 + $0x11] ss:$0 sm:$0xff] }
 0x36a   : > { %v2248_v53 = vadd.f32 %v2230_v61, %v2207_v49  ;;  %v1853_v7 = vadd.f32 %v1835_v2, %v1812_v28  ;;  %v1854_v25 = vadd.f32 %v1836_v3, %v1813_v4  ;;  %v1877_v61 = vmul.f32 %v6294_v30, %v6073_v1  ;;  %7240 = vst [vmem:[#allocation24_spill] sm:$0xff] %v6305_v38  ;;  %v6318_v28 = vld [vmem:[%s3837_s27 + $0x17] ss:$0 sm:$0xff] }
 0x36b   : > { %v2249_v33 = vadd.f32 %v2231_v43, %v2208_v48  ;;  %v2341_v24 = vmul.f32 %v6289_v5, %v7208_v31  ;;  %v2381_v10 = vmul.f32 %v6305_v38, %v7212_v56  ;;  %v1917_v20 = vmul.f32 %v6077_v44, %v6187_v22  ;;  %7241 = vst [vmem:[#allocation58_spill] sm:$0xff] %v6318_v28 }
 0x36c   : > { %v2317_v62 = vadd.f32 %v2299_v37, %v2248_v53  ;;  %v1894_v49 = vadd.f32 %v1876_v16, %v1853_v7  ;;  %v1895_v43 = vadd.f32 %v1877_v61, %v1854_v25  ;;  %v1918_v2 = vmul.f32 %v6077_v44, %v6195_v36  ;;  %v6324_v53 = vld [vmem:[#allocation3 + $0x10d] sm:$0xff] }
 0x36d   : > { %v2318_v26 = vadd.f32 %v2300_v32, %v2249_v33  ;;  %v2382_v48 = vmul.f32 %v6305_v38, %v7215_v13  ;;  %v2422_v4 = vmul.f32 %v6318_v28, %v6102_v63  ;;  %v1958_v3 = vmul.f32 %v6086_v58, %v6298_v45  ;;  %v6334_v38 = vld [vmem:[#allocation3 + $0x115] sm:$0xff] }
 0x36e   : > { %v2358_v37 = vadd.f32 %v2340_v42, %v2317_v62  ;;  %v1935_v16 = vadd.f32 %v1917_v20, %v1894_v49  ;;  %v1936_v33 = vadd.f32 %v1918_v2, %v1895_v43  ;;  %v1959_v42 = vmul.f32 %v6086_v58, %v6309_v6 }
 0x36f   : > { %v2359_v32 = vadd.f32 %v2341_v24, %v2318_v26  ;;  %v2423_v25 = vmul.f32 %v6318_v28, %v6109_v15  ;;  %v2463_v61 = vmul.f32 %v6208_v23, %v6199_v41  ;;  %v2027_v62 = vmul.f32 %v7227_v14, %v7230_v27  ;;  %v6343_v41 = vld [vmem:[%s3837_s27 + $0xa] ss:$0 sm:$0xff] }
 0x370   : > { %v2399_v7 = vadd.f32 %v2381_v10, %v2358_v37  ;;  %v1976_v26 = vadd.f32 %v1958_v3, %v1935_v16  ;;  %v1977_v20 = vadd.f32 %v1959_v42, %v1936_v33  ;;  %v2028_v49 = vmul.f32 %v7227_v14, %v7193_v19  ;;  %v7242_v10 = vld [vmem:[#allocation19_spill] sm:$0xff]  ;;  %v7243_v37 = vld [vmem:[#allocation30_spill] sm:$0xff] }
 0x371   : > { %v2400_v24 = vadd.f32 %v2382_v48, %v2359_v32  ;;  %v2464_v2 = vmul.f32 %v6208_v23, %v7242_v10  ;;  %v2504_v28 = vmul.f32 %v7243_v37, %v6324_v53  ;;  %v2068_v27 = vmul.f32 %v6343_v41, %v7194_v0 }
 0x372   : > { %v2440_v43 = vadd.f32 %v2422_v4, %v2399_v7  ;;  %v2045_v48 = vadd.f32 %v2027_v62, %v1976_v26  ;;  %v2046_v3 = vadd.f32 %v2028_v49, %v1977_v20  ;;  %v2069_v32 = vmul.f32 %v6343_v41, %v7196_v35  ;;  %v6352_v4 = vld [vmem:[%s3837_s27 + $0x10] ss:$0 sm:$0xff]  ;;  %v6359_v62 = vld [vmem:[%s3837_s27 + $0x16] ss:$0 sm:$0xff] }
 0x373   : > { %v2441_v15 = vadd.f32 %v2423_v25, %v2400_v24  ;;  %v2505_v14 = vmul.f32 %v7243_v37, %v6334_v38  ;;  %v2109_v16 = vmul.f32 %v6352_v4, %v6004_v11  ;;  %v2110_v33 = vmul.f32 %v6352_v4, %v7236_v17  ;;  %7244 = vst [vmem:[#allocation40_spill] sm:$0xff] %v6359_v62 }
 0x374   : > { %v2481_v19 = vadd.f32 %v2463_v61, %v2440_v43  ;;  %v2086_v7 = vadd.f32 %v2068_v27, %v2045_v48  ;;  %v2087_v25 = vadd.f32 %v2069_v32, %v2046_v3  ;;  %v2150_v24 = vmul.f32 %v6359_v62, %v7237_v51  ;;  %v6371_v48 = vld [vmem:[#allocation3 + $0x124] sm:$0xff]  ;;  %v6373_v3 = vld [vmem:[#allocation3 + $0x12c] sm:$0xff] }
 0x375   : > { %v2482_v42 = vadd.f32 %v2464_v2, %v2441_v15  ;;  %v2151_v61 = vmul.f32 %v6359_v62, %v6129_v12  ;;  %v2191_v26 = vmul.f32 %v7238_v50, %v6243_v54  ;;  %v1755_v20 = vmul.f32 %v6040_v46, %v5821_v18 }
 0x376   : > { %v1756_v49 = vmul.f32 %v6040_v46, %v5825_v9  ;;  %v2522_v15 = vadd.f32 %v2504_v28, %v2481_v19  ;;  %v2127_v2 = vadd.f32 %v2109_v16, %v2086_v7  ;;  %v2128_v27 = vadd.f32 %v2110_v33, %v2087_v25  ;;  %v1732_v25 = vld [vmem:[#allocation3 + $0x13b] sm:$0xff] }
 0x377   : > { %v2523_v43 = vadd.f32 %v2505_v14, %v2482_v42  ;;  %v1773_v32 = vadd.f32 %v1755_v20, %v6241_v59  ;;  %v1796_v54 = vmul.f32 %v5814_v57, %v5967_v34  ;;  %v1797_v18 = vmul.f32 %v5814_v57, %v5975_v60 }
 0x378   : > { %v1774_v62 = vadd.f32 %v1756_v49, %v6247_v29  ;;  %v2168_v9 = vadd.f32 %v2150_v24, %v2127_v2  ;;  %v2169_v46 = vadd.f32 %v2151_v61, %v2128_v27  ;;  %v2192_v28 = vmul.f32 %v7238_v50, %v6253_v8  ;;  %v7245_v27 = vld [vmem:[#allocation24_spill] sm:$0xff] }
 0x379   : > { %v2534_v37 = vpack.c.bf16 %v2523_v43, %v2522_v15  ;;  %v1814_v19 = vadd.f32 %v1796_v54, %v1773_v32  ;;  %v1837_v16 = vmul.f32 %v6277_v47, %v6068_v21  ;;  %v1838_v59 = vmul.f32 %v6277_v47, %v6073_v1 }
 0x37a   : > { %v1815_v14 = vadd.f32 %v1797_v18, %v1774_v62  ;;  %v2209_v29 = vadd.f32 %v2191_v26, %v2168_v9  ;;  %v2210_v34 = vadd.f32 %v2192_v28, %v2169_v46  ;;  %v2232_v57 = vmul.f32 %v6143_v40, %v6371_v48  ;;  %v1733_v62 = vld [vmem:[#allocation3 + $0x143] sm:$0xff]  ;;  %v3569_v46 = vld [vmem:[%s3837_s27 + $0x4] ss:$0 sm:$0xff] }
 0x37b   : > { %3350 = vmatmul.mubr.bf16.gmra.mrb[24].mxu1 %v2534_v37  ;;  %v2233_v60 = vmul.f32 %v6143_v40, %v6373_v3  ;;  %v1855_v54 = vadd.f32 %v1837_v16, %v1814_v19  ;;  %v1878_v21 = vmul.f32 %v6294_v30, %v6187_v22  ;;  %v1879_v1 = vmul.f32 %v6294_v30, %v6195_v36 }
 0x37c   : > { %3353 = vmatprep.mubr.msk.bf16.mxu1 %vm3581_vm1, %v7205_v52  ;;  %v1856_v33 = vadd.f32 %v1838_v59, %v1815_v14  ;;  %v2250_v47 = vadd.f32 %v2232_v57, %v2209_v29  ;;  %v2301_v42 = vmul.f32 %v6284_v55, %v7206_v39  ;;  %v2302_v7 = vmul.f32 %v6284_v55, %v7208_v31  ;;  %v7247_v59 = vld [vmem:[#allocation11_spill] sm:$0xff]  ;;  %v7248_v29 = vld [vmem:[#allocation58_spill] sm:$0xff] }
 0x37d   : > { %v2251_v37 = vadd.f32 %v2233_v60, %v2210_v34  ;;  %v1896_v24 = vadd.f32 %v1878_v21, %v1855_v54  ;;  %v1919_v26 = vmul.f32 %v6077_v44, %v6298_v45  ;;  %v1920_v22 = vmul.f32 %v6077_v44, %v6309_v6  ;;  %v7246_v44 = vld [vmem:[#allocation71_spill] sm:$0xff] }
 0x37e   : > { %v1897_v61 = vadd.f32 %v1879_v1, %v1856_v33  ;;  %v2319_v36 = vadd.f32 %v2301_v42, %v2250_v47  ;;  %v2342_v20 = vmul.f32 %v6289_v5, %v7212_v56  ;;  %v2343_v39 = vmul.f32 %v6289_v5, %v7215_v13  ;;  %v2278_v57 = vld [vmem:[#allocation3 + $0x125] sm:$0xff]  ;;  %v2279_v60 = vld [vmem:[#allocation3 + $0x12d] sm:$0xff] }
 0x37f   : > { %v2320_v30 = vadd.f32 %v2302_v7, %v2251_v37  ;;  %v1937_v31 = vadd.f32 %v1919_v26, %v1896_v24  ;;  %v1960_v15 = vmul.f32 %v6086_v58, %v1732_v25  ;;  %v1961_v43 = vmul.f32 %v6086_v58, %v1733_v62 }
 0x380   : > { %v1938_v49 = vadd.f32 %v1920_v22, %v1897_v61  ;;  %v2360_v2 = vadd.f32 %v2342_v20, %v2319_v36  ;;  %v2383_v32 = vmul.f32 %v7245_v27, %v6102_v63  ;;  %v2384_v6 = vmul.f32 %v7245_v27, %v7246_v44  ;;  %v7249_v61 = vld [vmem:[#allocation30_spill] sm:$0xff]  ;;  %v7250_v36 = vld [vmem:[#allocation23_spill] sm:$0xff] }
 0x381   : > { %v2361_v45 = vadd.f32 %v2343_v39, %v2320_v30  ;;  %v1978_v18 = vadd.f32 %v1960_v15, %v1937_v31  ;;  %v2029_v28 = vmul.f32 %v3569_v46, %v7194_v0  ;;  %v2030_v19 = vmul.f32 %v3569_v46, %v7196_v35  ;;  %v7251_v30 = vld [vmem:[#allocation40_spill] sm:$0xff]  ;;  %v2007_v15 = vld [vmem:[#allocation3 + $0x144] sm:$0xff] }
 0x382   : > { %v1979_v9 = vadd.f32 %v1961_v43, %v1938_v49  ;;  %v2401_v14 = vadd.f32 %v2383_v32, %v2360_v2  ;;  %v2424_v58 = vmul.f32 %v7248_v29, %v7247_v59  ;;  %v2425_v34 = vmul.f32 %v7248_v29, %v7242_v10 }
 0x383   : > { %v2402_v16 = vadd.f32 %v2384_v6, %v2361_v45  ;;  %v2047_v54 = vadd.f32 %v2029_v28, %v1978_v18  ;;  %v2070_v21 = vmul.f32 %v6343_v41, %v6004_v11  ;;  %v2071_v0 = vmul.f32 %v6343_v41, %v7236_v17 }
 0x384   : > { %v2048_v33 = vadd.f32 %v2030_v19, %v1979_v9  ;;  %v2442_v1 = vadd.f32 %v2424_v58, %v2401_v14  ;;  %v2465_v47 = vmul.f32 %v6208_v23, %v6324_v53  ;;  %v2466_v37 = vmul.f32 %v6208_v23, %v6334_v38 }
 0x385   : > { %v2443_v35 = vadd.f32 %v2425_v34, %v2402_v16  ;;  %v2088_v42 = vadd.f32 %v2070_v21, %v2047_v54  ;;  %v2111_v25 = vmul.f32 %v6352_v4, %v7237_v51  ;;  %v2112_v62 = vmul.f32 %v6352_v4, %v6129_v12  ;;  %v2006_v51 = vld [vmem:[#allocation3 + $0x13c] sm:$0xff] }
 0x386   : > { %v2089_v7 = vadd.f32 %v2071_v0, %v2048_v33  ;;  %v2483_v11 = vadd.f32 %v2465_v47, %v2442_v1  ;;  %v2506_v41 = vmul.f32 %v7249_v61, %v2278_v57  ;;  %v2507_v17 = vmul.f32 %v7249_v61, %v2279_v60  ;;  %v2281_v33 = vld [vmem:[#allocation3 + $0x145] sm:$0xff] }
 0x387   : > { %v2484_v24 = vadd.f32 %v2466_v37, %v2443_v35  ;;  %v2129_v26 = vadd.f32 %v2111_v25, %v2088_v42  ;;  %v2152_v20 = vmul.f32 %v7251_v30, %v7250_v36  ;;  %v2153_v39 = vmul.f32 %v7251_v30, %v6253_v8 }
 0x388   : > { %v2130_v22 = vadd.f32 %v2112_v62, %v2089_v7  ;;  %v2524_v31 = vadd.f32 %v2506_v41, %v2483_v11  ;;  %v2193_v4 = vmul.f32 %v7238_v50, %v6371_v48  ;;  %v2194_v2 = vmul.f32 %v7238_v50, %v6373_v3 }
 0x389   : > { %v2525_v49 = vadd.f32 %v2507_v17, %v2484_v24  ;;  %v2170_v43 = vadd.f32 %v2152_v20, %v2129_v26  ;;  %v2234_v18 = vmul.f32 %v6143_v40, %v2006_v51  ;;  %v2235_v9 = vmul.f32 %v6143_v40, %v2007_v15 }
 0x38a   : > { %v2171_v12 = vadd.f32 %v2153_v39, %v2130_v22  ;;  %v2303_v28 = vmul.f32 %v6284_v55, %v7212_v56  ;;  %v2304_v48 = vmul.f32 %v6284_v55, %v7215_v13  ;;  %v2344_v19 = vmul.f32 %v6289_v5, %v6102_v63  ;;  %v2280_v63 = vld [vmem:[#allocation3 + $0x13d] sm:$0xff] }
 0x38b   : > { %v2535_v45 = vpack.c.bf16 %v2525_v49, %v2524_v31  ;;  %v2211_v32 = vadd.f32 %v2193_v4, %v2170_v43  ;;  %v2345_v40 = vmul.f32 %v6289_v5, %v7246_v44  ;;  %v2385_v58 = vmul.f32 %v7245_v27, %v7247_v59 }
 0x38c   : > { %v2212_v6 = vadd.f32 %v2194_v2, %v2171_v12  ;;  %v2386_v34 = vmul.f32 %v7245_v27, %v7242_v10  ;;  %v2426_v13 = vmul.f32 %v7248_v29, %v6324_v53  ;;  %v2427_v55 = vmul.f32 %v7248_v29, %v6334_v38  ;;  %v6473_v38 = vld [vmem:[%s6587_s9] ss:$0 sm:$0xff] }
 0x38d   : > { %3354 = vmatmul.mubr.bf16.gmra.mrb[28].mxu1 %v2535_v45  ;;  %v2252_v8 = vadd.f32 %v2234_v18, %v2211_v32  ;;  %v2467_v44 = vmul.f32 %v6208_v23, %v2278_v57  ;;  %v2468_v0 = vmul.f32 %v6208_v23, %v2279_v60  ;;  %v2508_v10 = vmul.f32 %v7249_v61, %v2280_v63  ;;  %v6478_v23 = vld [vmem:[%s6588_s10] ss:$0 sm:$0xff] }
 0x38e   : > { %3357 = vmatprep.mubr.msk.bf16.mxu1 %vm3581_vm1, %v7205_v52  ;;  %v2253_v46 = vadd.f32 %v2235_v9, %v2212_v6  ;;  %v2509_v27 = vmul.f32 %v7249_v61, %v2281_v33 }
 0x38f   : > { %v2321_v50 = vadd.f32 %v2303_v28, %v2252_v8 }
 0x390   : > { %v2322_v3 = vadd.f32 %v2304_v48, %v2253_v46 }
 0x391   : > { %v2362_v14 = vadd.f32 %v2344_v19, %v2321_v50 }
 0x392   : > { %v2363_v16 = vadd.f32 %v2345_v40, %v2322_v3 }
 0x393   : > { %v2403_v56 = vadd.f32 %v2385_v58, %v2362_v14 }
 0x394   : > { %v2404_v54 = vadd.f32 %v2386_v34, %v2363_v16 }
 0x395   : > { %v2444_v21 = vadd.f32 %v2426_v13, %v2403_v56 }
 0x396   : > { %v2445_v5 = vadd.f32 %v2427_v55, %v2404_v54 }
 0x397   : > { %v2485_v59 = vadd.f32 %v2467_v44, %v2444_v21 }
 0x398   : > { %v2486_v1 = vadd.f32 %v2468_v0, %v2445_v5 }
 0x399   : > { %v2526_v35 = vadd.f32 %v2508_v10, %v2485_v59 }
 0x39a   : > { %v2527_v47 = vadd.f32 %v2509_v27, %v2486_v1 }
 0x39c   : > { %v2536_v53 = vpack.c.bf16 %v2527_v47, %v2526_v35 }
 0x39e   : > { %3358 = vmatmul.mubr.bf16.gmra.mrb[32].mxu1 %v2536_v53 }
 0x39f   : > { %3377 = vmatprep.mubr.msk.bf16.mxu1 %vm3581_vm1, %v7205_v52 }
 0x3c9   : > { %v2635_v29 = vpop.f32.mrb[0].mxu1 }
 0x3ca   : > { %v2713_v57 = vmul.f32 %v6473_v38, %v2635_v29  ;;  %v3327_v60 = vpop.f32.mrb[1].mxu1 }
 0x3cb   : > { %v2638_v37 = vpop.f32.mrb[2].mxu1 }
 0x3cc   : > { %v2738_v42 = vadd.f32 %v6478_v23, %v2713_v57  ;;  %v2714_v7 = vmul.f32 %v6473_v38, %v2638_v37  ;;  %v3328_v25 = vpop.f32.mrb[3].mxu1 }
 0x3ce   : > { %v2739_v62 = vadd.f32 %v6478_v23, %v2714_v7  ;;  %v2756_v11 = vmax.f32 %v2738_v42, 0.0 }
 0x3d0   : > { %v2757_v24 = vmax.f32 %v2739_v62, 0.0 }
 0x3d2   : > { %v2774_v61 = vpack.c.bf16 %v2757_v24, %v2756_v11 }
 0x3d4   : > { %3378 = vmatmul.mubr.bf16.vlgmr.msra.gmra.mrb[36].mxu1 %v2774_v61 }
 0x3d5   : > { %3381 = vmatprep.mubr.msk.bf16.mxu1 %vm3581_vm1, %v7205_v52 }
 0x3e2   : > { %v2643_v41 = vpop.f32.mrb[4].mxu1 }
 0x3e3   : > { %v2715_v17 = vmul.f32 %v6473_v38, %v2643_v41  ;;  %v3331_v26 = vpop.f32.mrb[5].mxu1 }
 0x3e4   : > { %v2646_v22 = vpop.f32.mrb[6].mxu1 }
 0x3e5   : > { %v2740_v36 = vadd.f32 %v6478_v23, %v2715_v17  ;;  %v2716_v30 = vmul.f32 %v6473_v38, %v2646_v22  ;;  %v3332_v20 = vpop.f32.mrb[7].mxu1 }
 0x3e7   : > { %v2741_v39 = vadd.f32 %v6478_v23, %v2716_v30  ;;  %v2758_v31 = vmax.f32 %v2740_v36, 0.0 }
 0x3e9   : > { %v2759_v49 = vmax.f32 %v2741_v39, 0.0 }
 0x3eb   : > { %v2775_v51 = vpack.c.bf16 %v2759_v49, %v2758_v31 }
 0x3ed   : > { %3382 = vmatmul.mubr.bf16.gmra.mrb[40].mxu1 %v2775_v51 }
 0x3ee   : > { %3385 = vmatprep.mubr.msk.bf16.mxu1 %vm3581_vm1, %v7205_v52 }
 0x3ff   : > { %v2651_v15 = vpop.f32.mrb[8].mxu1 }
 0x400   : > { %v2717_v43 = vmul.f32 %v6473_v38, %v2651_v15  ;;  %v3335_v12 = vpop.f32.mrb[9].mxu1 }
 0x401   : > { %v2654_v4 = vpop.f32.mrb[10].mxu1 }
 0x402   : > { %v2742_v2 = vadd.f32 %v6478_v23, %v2717_v43  ;;  %v2718_v45 = vmul.f32 %v6473_v38, %v2654_v4  ;;  %v3336_v32 = vpop.f32.mrb[11].mxu1 }
 0x404   : > { %v2743_v6 = vadd.f32 %v6478_v23, %v2718_v45  ;;  %v2760_v18 = vmax.f32 %v2742_v2, 0.0 }
 0x406   : > { %v2761_v9 = vmax.f32 %v2743_v6, 0.0 }
 0x408   : > { %v2776_v8 = vpack.c.bf16 %v2761_v9, %v2760_v18 }
 0x40a   : > { %3386 = vmatmul.mubr.bf16.gmra.mrb[44].mxu1 %v2776_v8 }
 0x40b   : > { %3389 = vmatprep.mubr.msk.bf16.mxu1 %vm3581_vm1, %v7205_v52 }
 0x41a   : > { %v2659_v46 = vpop.f32.mrb[12].mxu1 }
 0x41b   : > { %v2719_v28 = vmul.f32 %v6473_v38, %v2659_v46  ;;  %v3339_v48 = vpop.f32.mrb[13].mxu1 }
 0x41c   : > { %v2662_v50 = vpop.f32.mrb[14].mxu1 }
 0x41d   : > { %v2744_v3 = vadd.f32 %v6478_v23, %v2719_v28  ;;  %v2720_v19 = vmul.f32 %v6473_v38, %v2662_v50  ;;  %v3340_v40 = vpop.f32.mrb[15].mxu1 }
 0x41f   : > { %v2745_v14 = vadd.f32 %v6478_v23, %v2720_v19  ;;  %v2762_v16 = vmax.f32 %v2744_v3, 0.0 }
 0x421   : > { %v2763_v58 = vmax.f32 %v2745_v14, 0.0 }
 0x423   : > { %v2777_v34 = vpack.c.bf16 %v2763_v58, %v2762_v16 }
 0x425   : > { %3390 = vmatmul.mubr.bf16.gmra.mrb[48].mxu1 %v2777_v34 }
 0x426   : > { %3393 = vmatprep.mubr.msk.bf16.mxu1 %vm3581_vm1, %v7205_v52 }
 0x42c   : > { %v2667_v56 = vpop.f32.mrb[16].mxu1 }
 0x42d   : > { %v2721_v54 = vmul.f32 %v6473_v38, %v2667_v56  ;;  %v3343_v13 = vpop.f32.mrb[17].mxu1 }
 0x42e   : > { %v2670_v55 = vpop.f32.mrb[18].mxu1 }
 0x42f   : > { %v2746_v63 = vadd.f32 %v6478_v23, %v2721_v54  ;;  %v2722_v33 = vmul.f32 %v6473_v38, %v2670_v55  ;;  %v3344_v21 = vpop.f32.mrb[19].mxu1 }
 0x431   : > { %v2747_v5 = vadd.f32 %v6478_v23, %v2722_v33  ;;  %v2764_v44 = vmax.f32 %v2746_v63, 0.0 }
 0x433   : > { %v2765_v0 = vmax.f32 %v2747_v5, 0.0 }
 0x435   : > { %v2778_v59 = vpack.c.bf16 %v2765_v0, %v2764_v44 }
 0x437   : > { %3394 = vmatmul.mubr.bf16.gmra.mrb[52].mxu1 %v2778_v59  ;;  %v2675_v1 = vpop.f32.mrb[20].mxu1 }
 0x438   : > { %3397 = vmatprep.mubr.msk.bf16.mxu1 %vm3581_vm1, %v7205_v52  ;;  %v2723_v10 = vmul.f32 %v6473_v38, %v2675_v1  ;;  %v3347_v27 = vpop.f32.mrb[21].mxu1 }
 0x439   : > { %v2678_v35 = vpop.f32.mrb[22].mxu1 }
 0x43a   : > { %v2748_v47 = vadd.f32 %v6478_v23, %v2723_v10  ;;  %v2724_v53 = vmul.f32 %v6473_v38, %v2678_v35  ;;  %v3348_v29 = vpop.f32.mrb[23].mxu1 }
 0x43c   : > { %v2749_v57 = vadd.f32 %v6478_v23, %v2724_v53  ;;  %v2766_v60 = vmax.f32 %v2748_v47, 0.0 }
 0x43e   : > { %v2767_v37 = vmax.f32 %v2749_v57, 0.0 }
 0x440   : > { %v2779_v42 = vpack.c.bf16 %v2767_v37, %v2766_v60 }
 0x442   : > { %3398 = vmatmul.mubr.bf16.gmra.mrb[56].mxu1 %v2779_v42 }
 0x443   : > { %3401 = vmatprep.mubr.msk.bf16.mxu1 %vm3581_vm1, %v7205_v52 }
 0x44e   : > { %v2683_v7 = vpop.f32.mrb[24].mxu1 }
 0x44f   : > { %v2725_v25 = vmul.f32 %v6473_v38, %v2683_v7  ;;  %v3351_v62 = vpop.f32.mrb[25].mxu1 }
 0x450   : > { %v2686_v11 = vpop.f32.mrb[26].mxu1 }
 0x451   : > { %v2750_v24 = vadd.f32 %v6478_v23, %v2725_v25  ;;  %v2726_v61 = vmul.f32 %v6473_v38, %v2686_v11  ;;  %v3352_v41 = vpop.f32.mrb[27].mxu1 }
 0x453   : > { %v2751_v17 = vadd.f32 %v6478_v23, %v2726_v61  ;;  %v2768_v26 = vmax.f32 %v2750_v24, 0.0 }
 0x455   : > { %v2769_v22 = vmax.f32 %v2751_v17, 0.0 }
 0x457   : > { %v2780_v36 = vpack.c.bf16 %v2769_v22, %v2768_v26 }
 0x459   : > { %3402 = vmatmul.mubr.bf16.gmra.mrb[60].mxu1 %v2780_v36 }
 0x45a   : > { %3405 = vmatprep.mubr.msk.bf16.mxu1 %vm3581_vm1, %v7205_v52 }
 0x460   : > { %v2691_v30 = vpop.f32.mrb[28].mxu1 }
 0x461   : > { %v2727_v20 = vmul.f32 %v6473_v38, %v2691_v30  ;;  %v3355_v39 = vpop.f32.mrb[29].mxu1 }
 0x462   : > { %v2694_v31 = vpop.f32.mrb[30].mxu1 }
 0x463   : > { %v2752_v49 = vadd.f32 %v6478_v23, %v2727_v20  ;;  %v2728_v51 = vmul.f32 %v6473_v38, %v2694_v31  ;;  %v3356_v15 = vpop.f32.mrb[31].mxu1 }
 0x465   : > { %v2753_v43 = vadd.f32 %v6478_v23, %v2728_v51  ;;  %v2770_v12 = vmax.f32 %v2752_v49, 0.0 }
 0x467   : > { %v2771_v4 = vmax.f32 %v2753_v43, 0.0 }
 0x469   : > { %v2781_v2 = vpack.c.bf16 %v2771_v4, %v2770_v12 }
 0x46b   : > { %3406 = vmatmul.mubr.bf16.gmra.mrb[64].mxu1 %v2781_v2 }
 0x46c   : > { %3409 = vmatprep.mubr.msk.bf16.mxu1 %vm3581_vm1, %v7205_v52  ;;  %v6536_v52 = vld [vmem:[%s6590_s12] ss:$0 sm:$0xff] }
 0x471   : > { %v2699_v45 = vpop.f32.mrb[32].mxu1 }
 0x472   : > { %v2729_v32 = vmul.f32 %v6473_v38, %v2699_v45  ;;  %v3359_v6 = vpop.f32.mrb[33].mxu1 }
 0x473   : > { %v2702_v18 = vpop.f32.mrb[34].mxu1 }
 0x474   : > { %v2754_v9 = vadd.f32 %v6478_v23, %v2729_v32  ;;  %v2730_v8 = vmul.f32 %v6473_v38, %v2702_v18  ;;  %v3360_v46 = vpop.f32.mrb[35].mxu1 }
 0x476   : > { %v2755_v28 = vadd.f32 %v6478_v23, %v2730_v8  ;;  %v2772_v48 = vmax.f32 %v2754_v9, 0.0 }
 0x478   : > { %v2773_v50 = vmax.f32 %v2755_v28, 0.0 }
 0x47a   : > { %v2782_v3 = vpack.c.bf16 %v2773_v50, %v2772_v48 }
 0x47c   : > { %3410 = vmatmul.mubr.bf16.gmra.mrb[68].mxu1 %v2782_v3 }
 0x4a7   : > { %v2888_v19 = vpop.f32.mrb[36].mxu1 }
 0x4a8   : > { %v2889_v38 = vadd.f32 %v6536_v52, %v2888_v19  ;;  %v3379_v23 = vpop.f32.mrb[37].mxu1 }
 0x4a9   : > { %v2891_v40 = vpop.f32.mrb[38].mxu1 }
 0x4aa   : > { %2961 = vst [vmem:[%s6541_s16] sm:$0xff] %v2889_v38  ;;  %v2892_v14 = vadd.f32 %v6536_v52, %v2891_v40  ;;  %v3380_v16 = vpop.f32.mrb[39].mxu1 }
 0x4ac   : > { %2962 = vst [vmem:[%s6541_s16 + $0x8] sm:$0xff] %v2892_v14 }
 0x4c0   : > { %v2896_v58 = vpop.f32.mrb[40].mxu1 }
 0x4c1   : > { %v2897_v34 = vadd.f32 %v6536_v52, %v2896_v58  ;;  %v3383_v56 = vpop.f32.mrb[41].mxu1 }
 0x4c2   : > { %v2899_v54 = vpop.f32.mrb[42].mxu1 }
 0x4c3   : > { %2963 = vst [vmem:[%s6541_s16 + $0x10] sm:$0xff] %v2897_v34  ;;  %v2900_v13 = vadd.f32 %v6536_v52, %v2899_v54  ;;  %v3384_v55 = vpop.f32.mrb[43].mxu1 }
 0x4c5   : > { %2964 = vst [vmem:[%s6541_s16 + $0x18] sm:$0xff] %v2900_v13 }
 0x4dd   : > { %v2904_v63 = vpop.f32.mrb[44].mxu1 }
 0x4de   : > { %v2905_v33 = vadd.f32 %v6536_v52, %v2904_v63  ;;  %v3387_v21 = vpop.f32.mrb[45].mxu1 }
 0x4df   : > { %v2907_v5 = vpop.f32.mrb[46].mxu1 }
 0x4e0   : > { %2965 = vst [vmem:[%s6541_s16 + $0x20] sm:$0xff] %v2905_v33  ;;  %v2908_v44 = vadd.f32 %v6536_v52, %v2907_v5  ;;  %v3388_v0 = vpop.f32.mrb[47].mxu1 }
 0x4e2   : > { %2966 = vst [vmem:[%s6541_s16 + $0x28] sm:$0xff] %v2908_v44 }
 0x4f8   : > { %v2912_v59 = vpop.f32.mrb[48].mxu1 }
 0x4f9   : > { %v2913_v1 = vadd.f32 %v6536_v52, %v2912_v59  ;;  %v3391_v10 = vpop.f32.mrb[49].mxu1 }
 0x4fa   : > { %v2915_v27 = vpop.f32.mrb[50].mxu1 }
 0x4fb   : > { %2967 = vst [vmem:[%s6541_s16 + $0x30] sm:$0xff] %v2913_v1  ;;  %v2916_v35 = vadd.f32 %v6536_v52, %v2915_v27  ;;  %v3392_v47 = vpop.f32.mrb[51].mxu1 }
 0x4fd   : > { %2968 = vst [vmem:[%s6541_s16 + $0x38] sm:$0xff] %v2916_v35 }
 0x50a   : > { %v2920_v53 = vpop.f32.mrb[52].mxu1 }
 0x50b   : > { %v2921_v29 = vadd.f32 %v6536_v52, %v2920_v53  ;;  %v3395_v57 = vpop.f32.mrb[53].mxu1 }
 0x50c   : > { %v2923_v60 = vpop.f32.mrb[54].mxu1 }
 0x50d   : > { %2969 = vst [vmem:[%s6541_s16 + $0x40] sm:$0xff] %v2921_v29  ;;  %v2924_v37 = vadd.f32 %v6536_v52, %v2923_v60  ;;  %v3396_v42 = vpop.f32.mrb[55].mxu1 }
 0x50f   : > { %2970 = vst [vmem:[%s6541_s16 + $0x48] sm:$0xff] %v2924_v37 }
 0x515   : > { %v2928_v7 = vpop.f32.mrb[56].mxu1 }
 0x516   : > { %v2929_v25 = vadd.f32 %v6536_v52, %v2928_v7  ;;  %v3399_v62 = vpop.f32.mrb[57].mxu1 }
 0x517   : > { %v2931_v11 = vpop.f32.mrb[58].mxu1 }
 0x518   : > { %2971 = vst [vmem:[%s6541_s16 + $0x50] sm:$0xff] %v2929_v25  ;;  %v2932_v24 = vadd.f32 %v6536_v52, %v2931_v11  ;;  %v3400_v61 = vpop.f32.mrb[59].mxu1 }
 0x51a   : > { %2972 = vst [vmem:[%s6541_s16 + $0x58] sm:$0xff] %v2932_v24 }
 0x52c   : > { %v2936_v41 = vpop.f32.mrb[60].mxu1 }
 0x52d   : > { %v2937_v17 = vadd.f32 %v6536_v52, %v2936_v41  ;;  %v3403_v26 = vpop.f32.mrb[61].mxu1 }
 0x52e   : > { %v2939_v22 = vpop.f32.mrb[62].mxu1 }
 0x52f   : > { %2973 = vst [vmem:[%s6541_s16 + $0x60] sm:$0xff] %v2937_v17  ;;  %v2940_v36 = vadd.f32 %v6536_v52, %v2939_v22  ;;  %v3404_v30 = vpop.f32.mrb[63].mxu1 }
 0x531   : > { %2974 = vst [vmem:[%s6541_s16 + $0x68] sm:$0xff] %v2940_v36 }
 0x53e   : > { %v2944_v20 = vpop.f32.mrb[64].mxu1 }
 0x53f   : > { %v2945_v39 = vadd.f32 %v6536_v52, %v2944_v20  ;;  %v3407_v31 = vpop.f32.mrb[65].mxu1 }
 0x540   : > { %v2947_v49 = vpop.f32.mrb[66].mxu1 }
 0x541   : > { %2975 = vst [vmem:[%s6541_s16 + $0x70] sm:$0xff] %v2945_v39  ;;  %v2948_v51 = vadd.f32 %v6536_v52, %v2947_v49  ;;  %v3408_v15 = vpop.f32.mrb[67].mxu1 }
 0x543   : > { %2976 = vst [vmem:[%s6541_s16 + $0x78] sm:$0xff] %v2948_v51 }
 0x54e   :  { %280 = sbr.rel (!%p278_p0) target bundleno = 271 (0x10f), region = 82 }
 0x54f   : > { %v2952_v43 = vpop.f32.mrb[68].mxu1 }
 0x550   : > { %v2953_v12 = vadd.f32 %v6536_v52, %v2952_v43  ;;  %v3411_v4 = vpop.f32.mrb[69].mxu1 }
 0x551   : > { %v2955_v2 = vpop.f32.mrb[70].mxu1 }
 0x552   : > { %2977 = vst [vmem:[%s6541_s16 + $0x80] sm:$0xff] %v2953_v12  ;;  %v2956_v45 = vadd.f32 %v6536_v52, %v2955_v2  ;;  %v3412_v32 = vpop.f32.mrb[71].mxu1 }
 0x554   : > { %2978 = vst [vmem:[%s6541_s16 + $0x88] sm:$0xff] %v2956_v45 }

</bundles_post_ra>
